<compile_context>
chip_gen: v6e
topology: v6e:2x2x1
jax: 0.10.0
libtpu: 0.0.40
codegen_flags: <defaults>
</compile_context>

<pallas_src>
import functools

import jax
import jax.numpy as jnp
from jax import lax
from jax.experimental import pallas as pl
from jax.experimental.pallas import tpu as pltpu

NUM_LAYERS = 2
EMB = 32              # embedding_size (module default is 400; small synthetic size)
NUM_CLASSES = 13
PADDED_CLASSES = 128  # lane-dense classifier output, sliced back to 13 in the wrapper


# --------------------------------------------------------------------------
# Fully fused forward kernel: one grid step == one sequence (batch element).
#   x_ref:           (1, T, E)   input sequence
#   wih{0,1}_ref:    (Din, 8E)   [Wih_fwd^T | Wih_bwd^T] per layer
#   whh{0,1}_ref:    (2E, 8E)    blockdiag(Whh_fwd^T, Whh_bwd^T) per layer
#   b{0,1}_ref:      (1, 8E)     folded b_ih + b_hh, both directions
#   h0/c0_ref:       (L, 2E)     [fwd | bwd] initial states per layer
#   wpa/wg/wh_ref:   (2E, 2E)    attention W, PostAttention split weights
#   wclf/bclf_ref:   (2E, 128)/(1, 128) padded classifier
#   out_ref:         (1, T, 128) padded logits
#   z_ref:           (T, 8E)     scratch: hoisted input projection
#   y0/y1_ref:       (T, 2E)     scratch: layer outputs
# Gate order matches PyTorch: [i, f, g, o].
# --------------------------------------------------------------------------
def _fused_tagger_kernel(
        x_ref,
        wih0_ref, whh0_ref, b0_ref,
        wih1_ref, whh1_ref, b1_ref,
        h0_ref, c0_ref,
        wpa_ref, wg_ref, wh_ref, wclf_ref, bclf_ref,
        out_ref,
        z_ref, y0_ref, y1_ref,
        *, seq_len, hidden, unroll):
    T, E = seq_len, hidden

    def lstm_gates(pre, c):
        # pre: (1, 4E) pre-activations in PyTorch gate order [i, f, g, o].
        i = jax.nn.sigmoid(pre[:, 0 * E:1 * E])
        f = jax.nn.sigmoid(pre[:, 1 * E:2 * E])
        g = jnp.tanh(pre[:, 2 * E:3 * E])
        o = jax.nn.sigmoid(pre[:, 3 * E:4 * E])
        c_new = f * c + i * g
        h_new = o * jnp.tanh(c_new)
        return h_new, c_new

    def run_layer(x_val, wih_ref, whh_ref, b_ref, layer, y_ref):
        # ---- Input projection for BOTH directions hoisted out of the
        # recurrence: one MXU matmul over all T rows, biases folded in.
        wih = wih_ref[...]
        z_ref[...] = (jnp.dot(x_val.astype(wih.dtype), wih,
                              preferred_element_type=jnp.float32) + b_ref[...])
        whh = whh_ref[...]                                  # (2E, 8E) block-diag

        h_init = h0_ref[pl.ds(layer, 1), :]                 # (1, 2E) [fwd | bwd]
        cf_init = c0_ref[pl.ds(layer, 1), 0:E]
        cb_init = c0_ref[pl.ds(layer, 1), E:2 * E]

        def step(t, carry):
            h, c_f, c_b = carry
            # ONE block-diagonal recurrent matmul covers both directions.
            g = jnp.dot(h.astype(whh.dtype), whh,
                        preferred_element_type=jnp.float32)            # (1, 8E)
            tf = t
            tb = T - 1 - t
            gf = z_ref[pl.ds(tf, 1), 0:4 * E] + g[:, 0:4 * E]
            gb = z_ref[pl.ds(tb, 1), 4 * E:8 * E] + g[:, 4 * E:8 * E]
            h_f, c_f2 = lstm_gates(gf, c_f)
            h_b, c_b2 = lstm_gates(gb, c_b)
            # Forward output at t; backward output at its original timestep tb.
            y_ref[pl.ds(tf, 1), 0:E] = h_f
            y_ref[pl.ds(tb, 1), E:2 * E] = h_b
            return jnp.concatenate([h_f, h_b], axis=1), c_f2, c_b2

        lax.fori_loop(0, T, step, (h_init, cf_init, cb_init), unroll=unroll)

    # ---- Layer 0 and layer 1 BiLSTM; layer 1 consumes layer 0's output straight
    # from VMEM (inter-layer nn.Dropout(0.2) is identity in eval mode).
    run_layer(x_ref[0], wih0_ref, whh0_ref, b0_ref, 0, y0_ref)
    run_layer(y0_ref[...], wih1_ref, whh1_ref, b1_ref, 1, y1_ref)

    # ---- ProjectiveAttention + PostAttentionLayer + classifier
    # (lstm_final_dropout and the attention dropouts are identity in eval mode).
    hb = y1_ref[...]                                                    # (T, 2E)
    wpa = wpa_ref[...]
    hw = jnp.dot(hb.astype(wpa.dtype), wpa, preferred_element_type=jnp.float32)
    # score = (h W) h^T : contract dim 1 of both operands (no materialized h^T).
    s = lax.dot_general(hw, hb, (((1,), (1,)), ((), ())),
                        preferred_element_type=jnp.float32)             # (T, T)
    s = s - jnp.max(s, axis=-1, keepdims=True)
    p = jnp.exp(s)
    p = p / jnp.sum(p, axis=-1, keepdims=True)      # exact softmax (bit-accuracy)
    att = jnp.dot(p, hb, preferred_element_type=jnp.float32)            # (T, 2E)
    wg = wg_ref[...]
    wh = wh_ref[...]
    y = jnp.tanh(
        jnp.dot(hb.astype(wg.dtype), wg, preferred_element_type=jnp.float32)
        + jnp.dot(att.astype(wh.dtype), wh, preferred_element_type=jnp.float32))
    wclf = wclf_ref[...]
    logits = (jnp.dot(y.astype(wclf.dtype), wclf,
                      preferred_element_type=jnp.float32) + bclf_ref[...])  # (T, 128)
    out_ref[0] = logits.astype(out_ref.dtype)


# --------------------------------------------------------------------------
# Wrapper: single pallas_call, grid over batch ("parallel" -> both v7x cores).
# --------------------------------------------------------------------------
def forward(params, x, *, matmul_dtype=jnp.float32):
    B, T, E = x.shape
    assert E == EMB
    H = 2 * E
    C = PADDED_CLASSES
    cast = lambda a: a.astype(matmul_dtype)   # bf16 on v6e/v7x if desired
    unroll = True if T <= 16 else 4           # partial unroll at realistic T

    kernel = functools.partial(_fused_tagger_kernel,
                               seq_len=T, hidden=E, unroll=unroll)
    l0, l1 = params["lstm"]

    logits_pad = pl.pallas_call(
        kernel,
        out_shape=jax.ShapeDtypeStruct((B, T, C), jnp.float32),
        grid=(B,),
        in_specs=[
            pl.BlockSpec((1, T, E), lambda b: (b, 0, 0)),          # x (per sequence)
            pl.BlockSpec((E, 8 * E), lambda b: (0, 0)),            # wih layer 0
            pl.BlockSpec((H, 8 * E), lambda b: (0, 0)),            # whh blockdiag l0
            pl.BlockSpec((1, 8 * E), lambda b: (0, 0)),            # bias l0
            pl.BlockSpec((H, 8 * E), lambda b: (0, 0)),            # wih layer 1
            pl.BlockSpec((H, 8 * E), lambda b: (0, 0)),            # whh blockdiag l1
            pl.BlockSpec((1, 8 * E), lambda b: (0, 0)),            # bias l1
            pl.BlockSpec((NUM_LAYERS, H), lambda b: (0, 0)),       # h0 [fwd|bwd]/layer
            pl.BlockSpec((NUM_LAYERS, H), lambda b: (0, 0)),       # c0 [fwd|bwd]/layer
            pl.BlockSpec((H, H), lambda b: (0, 0)),                # ProjectiveAttention.W
            pl.BlockSpec((H, H), lambda b: (0, 0)),                # PostAttention (on g)
            pl.BlockSpec((H, H), lambda b: (0, 0)),                # PostAttention (on att)
            pl.BlockSpec((H, C), lambda b: (0, 0)),                # classifier W (padded)
            pl.BlockSpec((1, C), lambda b: (0, 0)),                # classifier b (padded)
        ],
        out_specs=pl.BlockSpec((1, T, C), lambda b: (b, 0, 0)),
        scratch_shapes=[
            pltpu.VMEM((T, 8 * E), jnp.float32),   # hoisted input projection z
            pltpu.VMEM((T, H), jnp.float32),       # layer-0 output
            pltpu.VMEM((T, H), jnp.float32),       # layer-1 output
        ],
        compiler_params=pltpu.CompilerParams(
            dimension_semantics=("parallel",)),
    )(x,
      cast(l0["wih"]), cast(l0["whh_blk"]), l0["b"],
      cast(l1["wih"]), cast(l1["whh_blk"]), l1["b"],
      params["h0_cat"], params["c0_cat"],
      cast(params["w_pa"]), cast(params["w_pal_g"]), cast(params["w_pal_h"]),
      cast(params["w_clf_pad"]), params["b_clf_pad"])
    return logits_pad[:, :, :NUM_CLASSES]


# --------------------------------------------------------------------------
# Parameter initialization (deterministic, synthetic; PyTorch-compatible layout).
# --------------------------------------------------------------------------
def init_params(key):
    E = EMB
    k = key

    def nxt():
        nonlocal k
        k, sub = jax.random.split(k)
        return sub

    params = {}
    lstm = []
    for layer in range(NUM_LAYERS):
        d_in = E if layer == 0 else 2 * E
        dirs = []
        for _ in range(2):  # forward, backward
            wih = 0.1 * jax.random.normal(nxt(), (d_in, 4 * E), jnp.float32)  # Wih^T
            whh = 0.1 * jax.random.normal(nxt(), (E, 4 * E), jnp.float32)     # Whh^T
            b = 0.1 * jax.random.normal(nxt(), (1, 4 * E), jnp.float32)       # b_ih+b_hh
            dirs.append((wih, whh, b))
        (wih_f, whh_f, b_f), (wih_b, whh_b, b_b) = dirs
        whh_blk = jnp.zeros((2 * E, 8 * E), jnp.float32)
        whh_blk = whh_blk.at[:E, :4 * E].set(whh_f)       # blockdiag(Whh_f^T, Whh_b^T)
        whh_blk = whh_blk.at[E:, 4 * E:].set(whh_b)
        lstm.append({
            "wih": jnp.concatenate([wih_f, wih_b], axis=1),      # (d_in, 8E)
            "whh_blk": whh_blk,                                  # (2E, 8E)
            "b": jnp.concatenate([b_f, b_b], axis=1),            # (1, 8E)
        })
    params["lstm"] = lstm
    # h0 / c0 parameters: uniform(0, 0.1), shape (2*num_layers, E) as in PyTorch;
    # re-packed to (num_layers, 2E) with [fwd | bwd] per row.
    h0 = jax.random.uniform(nxt(), (2 * NUM_LAYERS, E), jnp.float32, 0.0, 0.1)
    c0 = jax.random.uniform(nxt(), (2 * NUM_LAYERS, E), jnp.float32, 0.0, 0.1)
    params["h0_cat"] = jnp.stack(
        [jnp.concatenate([h0[2 * l], h0[2 * l + 1]]) for l in range(NUM_LAYERS)])
    params["c0_cat"] = jnp.stack(
        [jnp.concatenate([c0[2 * l], c0[2 * l + 1]]) for l in range(NUM_LAYERS)])
    # ProjectiveAttention.W ~ N(0, 0.1), shape (2E, 2E)
    params["w_pa"] = 0.1 * jax.random.normal(nxt(), (2 * E, 2 * E), jnp.float32)
    # PostAttentionLayer.fwd: Linear(4E -> 2E, bias=False); weight (2E, 4E).
    # cat([g, att]) @ Wpal^T == g @ Wpal^T[:2E] + att @ Wpal^T[2E:]
    w_pal = 0.1 * jax.random.normal(nxt(), (2 * E, 4 * E), jnp.float32)
    params["w_pal_g"] = jnp.asarray(w_pal.T[:2 * E])     # (2E, 2E) acts on LSTM output
    params["w_pal_h"] = jnp.asarray(w_pal.T[2 * E:])     # (2E, 2E) acts on attention out
    # Classifier: Linear(2E -> 13), padded to 128 output lanes (lane-dense stores).
    w_clf = 0.1 * jax.random.normal(nxt(), (NUM_CLASSES, 2 * E), jnp.float32)
    b_clf = 0.1 * jax.random.normal(nxt(), (1, NUM_CLASSES), jnp.float32)
    params["w_clf_pad"] = (jnp.zeros((2 * E, PADDED_CLASSES), jnp.float32)
                           .at[:, :NUM_CLASSES].set(w_clf.T))
    params["b_clf_pad"] = (jnp.zeros((1, PADDED_CLASSES), jnp.float32)
                           .at[:, :NUM_CLASSES].set(b_clf))
    return params


# --------------------------------------------------------------------------
# Pure-JAX reference (same math as BiLSTMNERTagger.forward in eval mode).
# --------------------------------------------------------------------------
def forward_reference(params, x):
    B, T, E = x.shape
    feat = jnp.transpose(x, (1, 0, 2))                      # (T, B, Din) time-major
    for layer in range(NUM_LAYERS):
        lp = params["lstm"][layer]
        z = jnp.einsum("tbd,de->tbe", feat, lp["wih"]) + lp["b"]
        h = jnp.broadcast_to(params["h0_cat"][layer][None, :], (B, 2 * E))
        c_f = jnp.broadcast_to(params["c0_cat"][layer][None, :E], (B, E))
        c_b = jnp.broadcast_to(params["c0_cat"][layer][None, E:], (B, E))
        out_f, out_b = [None] * T, [None] * T

        def gates(pre, c):
            i = jax.nn.sigmoid(pre[:, :E]); f = jax.nn.sigmoid(pre[:, E:2 * E])
            g = jnp.tanh(pre[:, 2 * E:3 * E]); o = jax.nn.sigmoid(pre[:, 3 * E:])
            c2 = f * c + i * g
            return o * jnp.tanh(c2), c2

        for t in range(T):
            g_all = h @ lp["whh_blk"]
            gf = z[t, :, :4 * E] + g_all[:, :4 * E]
            gb = z[T - 1 - t, :, 4 * E:] + g_all[:, 4 * E:]
            h_f, c_f = gates(gf, c_f)
            h_b, c_b = gates(gb, c_b)
            out_f[t], out_b[T - 1 - t] = h_f, h_b
            h = jnp.concatenate([h_f, h_b], axis=1)
        feat = jnp.concatenate([jnp.stack(out_f), jnp.stack(out_b)], axis=-1)
    hb = jnp.transpose(feat, (1, 0, 2))                     # (B, T, 2E)
    s = jnp.einsum("bte,bse->bts", hb @ params["w_pa"], hb)
    p = jax.nn.softmax(s, axis=-1)
    att = jnp.einsum("bts,bsd->btd", p, hb)
    y = jnp.tanh(hb @ params["w_pal_g"] + att @ params["w_pal_h"])
    return (y @ params["w_clf_pad"] + params["b_clf_pad"])[:, :, :NUM_CLASSES]


if __name__ == "__main__":
    key = jax.random.PRNGKey(0)
    pkey, xkey = jax.random.split(key)
    params = init_params(pkey)

    B, T = 2, 8
    x = jax.random.normal(xkey, (B, T, EMB), jnp.float32)

    logits = jax.jit(forward)(params, x)
    jax.block_until_ready(logits)
    assert logits.shape == (B, T, NUM_CLASSES)
    assert logits.dtype == jnp.float32

    ref = forward_reference(params, x)
    err = float(jnp.max(jnp.abs(logits - ref)))
    assert err < 1e-3, f"max |pallas - reference| = {err}"
    print("KERNEL_OK")
</pallas_src>

<mosaic_0001>
module attributes {stable_mosaic.version = 11 : i64} {
  func.func @_fused_tagger_kernel(%arg0: i32, %arg1: memref<1x8x32xf32, #tpu.memory_space<vmem>>, %arg2: memref<32x256xf32, #tpu.memory_space<vmem>>, %arg3: memref<64x256xf32, #tpu.memory_space<vmem>>, %arg4: memref<1x256xf32, #tpu.memory_space<vmem>>, %arg5: memref<64x256xf32, #tpu.memory_space<vmem>>, %arg6: memref<64x256xf32, #tpu.memory_space<vmem>>, %arg7: memref<1x256xf32, #tpu.memory_space<vmem>>, %arg8: memref<2x64xf32, #tpu.memory_space<vmem>>, %arg9: memref<2x64xf32, #tpu.memory_space<vmem>>, %arg10: memref<64x64xf32, #tpu.memory_space<vmem>>, %arg11: memref<64x64xf32, #tpu.memory_space<vmem>>, %arg12: memref<64x64xf32, #tpu.memory_space<vmem>>, %arg13: memref<64x128xf32, #tpu.memory_space<vmem>>, %arg14: memref<1x128xf32, #tpu.memory_space<vmem>>, %arg15: memref<1x8x128xf32, #tpu.memory_space<vmem>>, %arg16: memref<8x256xf32, #tpu.memory_space<vmem>>, %arg17: memref<8x64xf32, #tpu.memory_space<vmem>>, %arg18: memref<8x64xf32, #tpu.memory_space<vmem>>) attributes {dimension_semantics = [#tpu.dimension_semantics<parallel>], iteration_bounds = array<i64: 2>, scalar_prefetch = 0 : i64, scratch_operands = 3 : i64, tpu.core_type = #tpu.core_type<tc>, window_params = [{transform_indices = @transform_0, window_bounds = array<i64: 1, 8, 32>}, {pipeline_mode = #tpu.pipeline_mode<synchronous>, transform_indices = @transform_1, window_bounds = array<i64: 32, 256>}, {pipeline_mode = #tpu.pipeline_mode<synchronous>, transform_indices = @transform_2, window_bounds = array<i64: 64, 256>}, {pipeline_mode = #tpu.pipeline_mode<synchronous>, transform_indices = @transform_3, window_bounds = array<i64: 1, 256>}, {pipeline_mode = #tpu.pipeline_mode<synchronous>, transform_indices = @transform_4, window_bounds = array<i64: 64, 256>}, {pipeline_mode = #tpu.pipeline_mode<synchronous>, transform_indices = @transform_5, window_bounds = array<i64: 64, 256>}, {pipeline_mode = #tpu.pipeline_mode<synchronous>, transform_indices = @transform_6, window_bounds = array<i64: 1, 256>}, {pipeline_mode = #tpu.pipeline_mode<synchronous>, transform_indices = @transform_7, window_bounds = array<i64: 2, 64>}, {pipeline_mode = #tpu.pipeline_mode<synchronous>, transform_indices = @transform_8, window_bounds = array<i64: 2, 64>}, {pipeline_mode = #tpu.pipeline_mode<synchronous>, transform_indices = @transform_9, window_bounds = array<i64: 64, 64>}, {pipeline_mode = #tpu.pipeline_mode<synchronous>, transform_indices = @transform_10, window_bounds = array<i64: 64, 64>}, {pipeline_mode = #tpu.pipeline_mode<synchronous>, transform_indices = @transform_11, window_bounds = array<i64: 64, 64>}, {pipeline_mode = #tpu.pipeline_mode<synchronous>, transform_indices = @transform_12, window_bounds = array<i64: 64, 128>}, {pipeline_mode = #tpu.pipeline_mode<synchronous>, transform_indices = @transform_13, window_bounds = array<i64: 1, 128>}, {transform_indices = @transform_14, window_bounds = array<i64: 1, 8, 128>}]} {
    %c0 = arith.constant 0 : index
    %c0_0 = arith.constant 0 : index
    %c0_1 = arith.constant 0 : index
    %0 = vector.load %arg1[%c0, %c0_0, %c0_1] : memref<1x8x32xf32, #tpu.memory_space<vmem>>, vector<1x8x32xf32>
    %1 = vector.shape_cast %0 : vector<1x8x32xf32> to vector<8x32xf32>
    %c0_2 = arith.constant 0 : index
    %c0_3 = arith.constant 0 : index
    %2 = vector.load %arg2[%c0_2, %c0_3] : memref<32x256xf32, #tpu.memory_space<vmem>>, vector<32x256xf32>
    %cst = arith.constant dense<0.000000e+00> : vector<8x256xf32>
    %3 = tpu.matmul %1, %2, %cst {dimension_numbers = #tpu.dot_dimension_numbers<[1], [0], [0], [1], [0, 0, 1, 1], [], []>} : vector<8x32xf32>, vector<32x256xf32>, vector<8x256xf32> -> vector<8x256xf32>
    %c0_4 = arith.constant 0 : index
    %c0_5 = arith.constant 0 : index
    %4 = vector.load %arg4[%c0_4, %c0_5] : memref<1x256xf32, #tpu.memory_space<vmem>>, vector<1x256xf32>
    %5 = vector.broadcast %4 : vector<1x256xf32> to vector<8x256xf32>
    %6 = arith.addf %3, %5 : vector<8x256xf32>
    %c0_6 = arith.constant 0 : index
    %c0_7 = arith.constant 0 : index
    %7 = vector.load %arg16[%c0_6, %c0_7] : memref<8x256xf32, #tpu.memory_space<vmem>>, vector<8x256xf32>
    tpu.vector_store %arg16[%c0_6, %c0_7], %6 {strides = array<i32>} : memref<8x256xf32, #tpu.memory_space<vmem>>, vector<8x256xf32>,
    %c0_8 = arith.constant 0 : index
    %c0_9 = arith.constant 0 : index
    %8 = vector.load %arg3[%c0_8, %c0_9] : memref<64x256xf32, #tpu.memory_space<vmem>>, vector<64x256xf32>
    %c0_10 = arith.constant 0 : index
    %c0_11 = arith.constant 0 : index
    %9 = vector.load %arg8[%c0_10, %c0_11] : memref<2x64xf32, #tpu.memory_space<vmem>>, vector<1x64xf32>
    %c0_12 = arith.constant 0 : index
    %c0_13 = arith.constant 0 : index
    %10 = vector.load %arg9[%c0_12, %c0_13] : memref<2x64xf32, #tpu.memory_space<vmem>>, vector<1x32xf32>
    %c0_14 = arith.constant 0 : index
    %c32 = arith.constant 32 : index
    %11 = vector.load %arg9[%c0_14, %c32] : memref<2x64xf32, #tpu.memory_space<vmem>>, vector<1x32xf32>
    %c0_i32 = arith.constant 0 : i32
    %cst_15 = arith.constant dense<0.000000e+00> : vector<1x256xf32>
    %12 = tpu.matmul %9, %8, %cst_15 {dimension_numbers = #tpu.dot_dimension_numbers<[1], [0], [0], [1], [0, 0, 1, 1], [], []>} : vector<1x64xf32>, vector<64x256xf32>, vector<1x256xf32> -> vector<1x256xf32>
    %c7_i32 = arith.constant 7 : i32
    %13 = arith.subi %c7_i32, %c0_i32 : i32
    %14 = arith.index_cast %c0_i32 : i32 to index
    %c0_16 = arith.constant 0 : index
    %15 = vector.load %arg16[%14, %c0_16] : memref<8x256xf32, #tpu.memory_space<vmem>>, vector<1x128xf32>
    %16 = vector.extract_strided_slice %12 {offsets = [0, 0], sizes = [1, 128], strides = [1, 1]} : vector<1x256xf32> to vector<1x128xf32>
    %17 = arith.addf %15, %16 : vector<1x128xf32>
    %18 = arith.index_cast %13 : i32 to index
    %c128 = arith.constant 128 : index
    %19 = vector.load %arg16[%18, %c128] : memref<8x256xf32, #tpu.memory_space<vmem>>, vector<1x128xf32>
    %20 = vector.extract_strided_slice %12 {offsets = [0, 128], sizes = [1, 128], strides = [1, 1]} : vector<1x256xf32> to vector<1x128xf32>
    %21 = arith.addf %19, %20 : vector<1x128xf32>
    %22 = vector.extract_strided_slice %17 {offsets = [0, 0], sizes = [1, 32], strides = [1, 1]} : vector<1x128xf32> to vector<1x32xf32>
    %23 = arith.negf %22 : vector<1x32xf32>
    %24 = math.exp %23 : vector<1x32xf32>
    %cst_17 = arith.constant 1.000000e+00 : f32
    %25 = vector.broadcast %cst_17 : f32 to vector<1x32xf32>
    %26 = arith.addf %25, %24 : vector<1x32xf32>
    %27 = arith.divf %25, %26 : vector<1x32xf32>
    %28 = vector.extract_strided_slice %17 {offsets = [0, 32], sizes = [1, 32], strides = [1, 1]} : vector<1x128xf32> to vector<1x32xf32>
    %29 = arith.negf %28 : vector<1x32xf32>
    %30 = math.exp %29 : vector<1x32xf32>
    %cst_18 = arith.constant 1.000000e+00 : f32
    %31 = vector.broadcast %cst_18 : f32 to vector<1x32xf32>
    %32 = arith.addf %31, %30 : vector<1x32xf32>
    %33 = arith.divf %31, %32 : vector<1x32xf32>
    %34 = vector.extract_strided_slice %17 {offsets = [0, 64], sizes = [1, 32], strides = [1, 1]} : vector<1x128xf32> to vector<1x32xf32>
    %35 = math.tanh %34 : vector<1x32xf32>
    %36 = vector.extract_strided_slice %17 {offsets = [0, 96], sizes = [1, 32], strides = [1, 1]} : vector<1x128xf32> to vector<1x32xf32>
    %37 = arith.negf %36 : vector<1x32xf32>
    %38 = math.exp %37 : vector<1x32xf32>
    %cst_19 = arith.constant 1.000000e+00 : f32
    %39 = vector.broadcast %cst_19 : f32 to vector<1x32xf32>
    %40 = arith.addf %39, %38 : vector<1x32xf32>
    %41 = arith.divf %39, %40 : vector<1x32xf32>
    %42 = arith.mulf %33, %10 : vector<1x32xf32>
    %43 = arith.mulf %27, %35 : vector<1x32xf32>
    %44 = arith.addf %42, %43 : vector<1x32xf32>
    %45 = math.tanh %44 : vector<1x32xf32>
    %46 = arith.mulf %41, %45 : vector<1x32xf32>
    %47 = vector.extract_strided_slice %21 {offsets = [0, 0], sizes = [1, 32], strides = [1, 1]} : vector<1x128xf32> to vector<1x32xf32>
    %48 = arith.negf %47 : vector<1x32xf32>
    %49 = math.exp %48 : vector<1x32xf32>
    %cst_20 = arith.constant 1.000000e+00 : f32
    %50 = vector.broadcast %cst_20 : f32 to vector<1x32xf32>
    %51 = arith.addf %50, %49 : vector<1x32xf32>
    %52 = arith.divf %50, %51 : vector<1x32xf32>
    %53 = vector.extract_strided_slice %21 {offsets = [0, 32], sizes = [1, 32], strides = [1, 1]} : vector<1x128xf32> to vector<1x32xf32>
    %54 = arith.negf %53 : vector<1x32xf32>
    %55 = math.exp %54 : vector<1x32xf32>
    %cst_21 = arith.constant 1.000000e+00 : f32
    %56 = vector.broadcast %cst_21 : f32 to vector<1x32xf32>
    %57 = arith.addf %56, %55 : vector<1x32xf32>
    %58 = arith.divf %56, %57 : vector<1x32xf32>
    %59 = vector.extract_strided_slice %21 {offsets = [0, 64], sizes = [1, 32], strides = [1, 1]} : vector<1x128xf32> to vector<1x32xf32>
    %60 = math.tanh %59 : vector<1x32xf32>
    %61 = vector.extract_strided_slice %21 {offsets = [0, 96], sizes = [1, 32], strides = [1, 1]} : vector<1x128xf32> to vector<1x32xf32>
    %62 = arith.negf %61 : vector<1x32xf32>
    %63 = math.exp %62 : vector<1x32xf32>
    %cst_22 = arith.constant 1.000000e+00 : f32
    %64 = vector.broadcast %cst_22 : f32 to vector<1x32xf32>
    %65 = arith.addf %64, %63 : vector<1x32xf32>
    %66 = arith.divf %64, %65 : vector<1x32xf32>
    %67 = arith.mulf %58, %11 : vector<1x32xf32>
    %68 = arith.mulf %52, %60 : vector<1x32xf32>
    %69 = arith.addf %67, %68 : vector<1x32xf32>
    %70 = math.tanh %69 : vector<1x32xf32>
    %71 = arith.mulf %66, %70 : vector<1x32xf32>
    %72 = arith.index_cast %c0_i32 : i32 to index
    %c0_23 = arith.constant 0 : index
    %73 = vector.load %arg17[%72, %c0_23] : memref<8x64xf32, #tpu.memory_space<vmem>>, vector<1x32xf32>
    tpu.vector_store %arg17[%72, %c0_23], %46 {strides = array<i32>} : memref<8x64xf32, #tpu.memory_space<vmem>>, vector<1x32xf32>,
    %74 = arith.index_cast %13 : i32 to index
    %c32_24 = arith.constant 32 : index
    %75 = vector.load %arg17[%74, %c32_24] : memref<8x64xf32, #tpu.memory_space<vmem>>, vector<1x32xf32>
    tpu.vector_store %arg17[%74, %c32_24], %71 {strides = array<i32>} : memref<8x64xf32, #tpu.memory_space<vmem>>, vector<1x32xf32>,
    %76 = tpu.concatenate %46, %71 in 1 : vector<1x32xf32>, vector<1x32xf32> -> vector<1x64xf32>
    %c1_i32 = arith.constant 1 : i32
    %cst_25 = arith.constant dense<0.000000e+00> : vector<1x256xf32>
    %77 = tpu.matmul %76, %8, %cst_25 {dimension_numbers = #tpu.dot_dimension_numbers<[1], [0], [0], [1], [0, 0, 1, 1], [], []>} : vector<1x64xf32>, vector<64x256xf32>, vector<1x256xf32> -> vector<1x256xf32>
    %c7_i32_26 = arith.constant 7 : i32
    %78 = arith.subi %c7_i32_26, %c1_i32 : i32
    %79 = arith.index_cast %c1_i32 : i32 to index
    %c0_27 = arith.constant 0 : index
    %80 = vector.load %arg16[%79, %c0_27] : memref<8x256xf32, #tpu.memory_space<vmem>>, vector<1x128xf32>
    %81 = vector.extract_strided_slice %77 {offsets = [0, 0], sizes = [1, 128], strides = [1, 1]} : vector<1x256xf32> to vector<1x128xf32>
    %82 = arith.addf %80, %81 : vector<1x128xf32>
    %83 = arith.index_cast %78 : i32 to index
    %c128_28 = arith.constant 128 : index
    %84 = vector.load %arg16[%83, %c128_28] : memref<8x256xf32, #tpu.memory_space<vmem>>, vector<1x128xf32>
    %85 = vector.extract_strided_slice %77 {offsets = [0, 128], sizes = [1, 128], strides = [1, 1]} : vector<1x256xf32> to vector<1x128xf32>
    %86 = arith.addf %84, %85 : vector<1x128xf32>
    %87 = vector.extract_strided_slice %82 {offsets = [0, 0], sizes = [1, 32], strides = [1, 1]} : vector<1x128xf32> to vector<1x32xf32>
    %88 = arith.negf %87 : vector<1x32xf32>
    %89 = math.exp %88 : vector<1x32xf32>
    %cst_29 = arith.constant 1.000000e+00 : f32
    %90 = vector.broadcast %cst_29 : f32 to vector<1x32xf32>
    %91 = arith.addf %90, %89 : vector<1x32xf32>
    %92 = arith.divf %90, %91 : vector<1x32xf32>
    %93 = vector.extract_strided_slice %82 {offsets = [0, 32], sizes = [1, 32], strides = [1, 1]} : vector<1x128xf32> to vector<1x32xf32>
    %94 = arith.negf %93 : vector<1x32xf32>
    %95 = math.exp %94 : vector<1x32xf32>
    %cst_30 = arith.constant 1.000000e+00 : f32
    %96 = vector.broadcast %cst_30 : f32 to vector<1x32xf32>
    %97 = arith.addf %96, %95 : vector<1x32xf32>
    %98 = arith.divf %96, %97 : vector<1x32xf32>
    %99 = vector.extract_strided_slice %82 {offsets = [0, 64], sizes = [1, 32], strides = [1, 1]} : vector<1x128xf32> to vector<1x32xf32>
    %100 = math.tanh %99 : vector<1x32xf32>
    %101 = vector.extract_strided_slice %82 {offsets = [0, 96], sizes = [1, 32], strides = [1, 1]} : vector<1x128xf32> to vector<1x32xf32>
    %102 = arith.negf %101 : vector<1x32xf32>
    %103 = math.exp %102 : vector<1x32xf32>
    %cst_31 = arith.constant 1.000000e+00 : f32
    %104 = vector.broadcast %cst_31 : f32 to vector<1x32xf32>
    %105 = arith.addf %104, %103 : vector<1x32xf32>
    %106 = arith.divf %104, %105 : vector<1x32xf32>
    %107 = arith.mulf %98, %44 : vector<1x32xf32>
    %108 = arith.mulf %92, %100 : vector<1x32xf32>
    %109 = arith.addf %107, %108 : vector<1x32xf32>
    %110 = math.tanh %109 : vector<1x32xf32>
    %111 = arith.mulf %106, %110 : vector<1x32xf32>
    %112 = vector.extract_strided_slice %86 {offsets = [0, 0], sizes = [1, 32], strides = [1, 1]} : vector<1x128xf32> to vector<1x32xf32>
    %113 = arith.negf %112 : vector<1x32xf32>
    %114 = math.exp %113 : vector<1x32xf32>
    %cst_32 = arith.constant 1.000000e+00 : f32
    %115 = vector.broadcast %cst_32 : f32 to vector<1x32xf32>
    %116 = arith.addf %115, %114 : vector<1x32xf32>
    %117 = arith.divf %115, %116 : vector<1x32xf32>
    %118 = vector.extract_strided_slice %86 {offsets = [0, 32], sizes = [1, 32], strides = [1, 1]} : vector<1x128xf32> to vector<1x32xf32>
    %119 = arith.negf %118 : vector<1x32xf32>
    %120 = math.exp %119 : vector<1x32xf32>
    %cst_33 = arith.constant 1.000000e+00 : f32
    %121 = vector.broadcast %cst_33 : f32 to vector<1x32xf32>
    %122 = arith.addf %121, %120 : vector<1x32xf32>
    %123 = arith.divf %121, %122 : vector<1x32xf32>
    %124 = vector.extract_strided_slice %86 {offsets = [0, 64], sizes = [1, 32], strides = [1, 1]} : vector<1x128xf32> to vector<1x32xf32>
    %125 = math.tanh %124 : vector<1x32xf32>
    %126 = vector.extract_strided_slice %86 {offsets = [0, 96], sizes = [1, 32], strides = [1, 1]} : vector<1x128xf32> to vector<1x32xf32>
    %127 = arith.negf %126 : vector<1x32xf32>
    %128 = math.exp %127 : vector<1x32xf32>
    %cst_34 = arith.constant 1.000000e+00 : f32
    %129 = vector.broadcast %cst_34 : f32 to vector<1x32xf32>
    %130 = arith.addf %129, %128 : vector<1x32xf32>
    %131 = arith.divf %129, %130 : vector<1x32xf32>
    %132 = arith.mulf %123, %69 : vector<1x32xf32>
    %133 = arith.mulf %117, %125 : vector<1x32xf32>
    %134 = arith.addf %132, %133 : vector<1x32xf32>
    %135 = math.tanh %134 : vector<1x32xf32>
    %136 = arith.mulf %131, %135 : vector<1x32xf32>
    %137 = arith.index_cast %c1_i32 : i32 to index
    %c0_35 = arith.constant 0 : index
    %138 = vector.load %arg17[%137, %c0_35] : memref<8x64xf32, #tpu.memory_space<vmem>>, vector<1x32xf32>
    tpu.vector_store %arg17[%137, %c0_35], %111 {strides = array<i32>} : memref<8x64xf32, #tpu.memory_space<vmem>>, vector<1x32xf32>,
    %139 = arith.index_cast %78 : i32 to index
    %c32_36 = arith.constant 32 : index
    %140 = vector.load %arg17[%139, %c32_36] : memref<8x64xf32, #tpu.memory_space<vmem>>, vector<1x32xf32>
    tpu.vector_store %arg17[%139, %c32_36], %136 {strides = array<i32>} : memref<8x64xf32, #tpu.memory_space<vmem>>, vector<1x32xf32>,
    %141 = tpu.concatenate %111, %136 in 1 : vector<1x32xf32>, vector<1x32xf32> -> vector<1x64xf32>
    %c2_i32 = arith.constant 2 : i32
    %cst_37 = arith.constant dense<0.000000e+00> : vector<1x256xf32>
    %142 = tpu.matmul %141, %8, %cst_37 {dimension_numbers = #tpu.dot_dimension_numbers<[1], [0], [0], [1], [0, 0, 1, 1], [], []>} : vector<1x64xf32>, vector<64x256xf32>, vector<1x256xf32> -> vector<1x256xf32>
    %c7_i32_38 = arith.constant 7 : i32
    %143 = arith.subi %c7_i32_38, %c2_i32 : i32
    %144 = arith.index_cast %c2_i32 : i32 to index
    %c0_39 = arith.constant 0 : index
    %145 = vector.load %arg16[%144, %c0_39] : memref<8x256xf32, #tpu.memory_space<vmem>>, vector<1x128xf32>
    %146 = vector.extract_strided_slice %142 {offsets = [0, 0], sizes = [1, 128], strides = [1, 1]} : vector<1x256xf32> to vector<1x128xf32>
    %147 = arith.addf %145, %146 : vector<1x128xf32>
    %148 = arith.index_cast %143 : i32 to index
    %c128_40 = arith.constant 128 : index
    %149 = vector.load %arg16[%148, %c128_40] : memref<8x256xf32, #tpu.memory_space<vmem>>, vector<1x128xf32>
    %150 = vector.extract_strided_slice %142 {offsets = [0, 128], sizes = [1, 128], strides = [1, 1]} : vector<1x256xf32> to vector<1x128xf32>
    %151 = arith.addf %149, %150 : vector<1x128xf32>
    %152 = vector.extract_strided_slice %147 {offsets = [0, 0], sizes = [1, 32], strides = [1, 1]} : vector<1x128xf32> to vector<1x32xf32>
    %153 = arith.negf %152 : vector<1x32xf32>
    %154 = math.exp %153 : vector<1x32xf32>
    %cst_41 = arith.constant 1.000000e+00 : f32
    %155 = vector.broadcast %cst_41 : f32 to vector<1x32xf32>
    %156 = arith.addf %155, %154 : vector<1x32xf32>
    %157 = arith.divf %155, %156 : vector<1x32xf32>
    %158 = vector.extract_strided_slice %147 {offsets = [0, 32], sizes = [1, 32], strides = [1, 1]} : vector<1x128xf32> to vector<1x32xf32>
    %159 = arith.negf %158 : vector<1x32xf32>
    %160 = math.exp %159 : vector<1x32xf32>
    %cst_42 = arith.constant 1.000000e+00 : f32
    %161 = vector.broadcast %cst_42 : f32 to vector<1x32xf32>
    %162 = arith.addf %161, %160 : vector<1x32xf32>
    %163 = arith.divf %161, %162 : vector<1x32xf32>
    %164 = vector.extract_strided_slice %147 {offsets = [0, 64], sizes = [1, 32], strides = [1, 1]} : vector<1x128xf32> to vector<1x32xf32>
    %165 = math.tanh %164 : vector<1x32xf32>
    %166 = vector.extract_strided_slice %147 {offsets = [0, 96], sizes = [1, 32], strides = [1, 1]} : vector<1x128xf32> to vector<1x32xf32>
    %167 = arith.negf %166 : vector<1x32xf32>
    %168 = math.exp %167 : vector<1x32xf32>
    %cst_43 = arith.constant 1.000000e+00 : f32
    %169 = vector.broadcast %cst_43 : f32 to vector<1x32xf32>
    %170 = arith.addf %169, %168 : vector<1x32xf32>
    %171 = arith.divf %169, %170 : vector<1x32xf32>
    %172 = arith.mulf %163, %109 : vector<1x32xf32>
    %173 = arith.mulf %157, %165 : vector<1x32xf32>
    %174 = arith.addf %172, %173 : vector<1x32xf32>
    %175 = math.tanh %174 : vector<1x32xf32>
    %176 = arith.mulf %171, %175 : vector<1x32xf32>
    %177 = vector.extract_strided_slice %151 {offsets = [0, 0], sizes = [1, 32], strides = [1, 1]} : vector<1x128xf32> to vector<1x32xf32>
    %178 = arith.negf %177 : vector<1x32xf32>
    %179 = math.exp %178 : vector<1x32xf32>
    %cst_44 = arith.constant 1.000000e+00 : f32
    %180 = vector.broadcast %cst_44 : f32 to vector<1x32xf32>
    %181 = arith.addf %180, %179 : vector<1x32xf32>
    %182 = arith.divf %180, %181 : vector<1x32xf32>
    %183 = vector.extract_strided_slice %151 {offsets = [0, 32], sizes = [1, 32], strides = [1, 1]} : vector<1x128xf32> to vector<1x32xf32>
    %184 = arith.negf %183 : vector<1x32xf32>
    %185 = math.exp %184 : vector<1x32xf32>
    %cst_45 = arith.constant 1.000000e+00 : f32
    %186 = vector.broadcast %cst_45 : f32 to vector<1x32xf32>
    %187 = arith.addf %186, %185 : vector<1x32xf32>
    %188 = arith.divf %186, %187 : vector<1x32xf32>
    %189 = vector.extract_strided_slice %151 {offsets = [0, 64], sizes = [1, 32], strides = [1, 1]} : vector<1x128xf32> to vector<1x32xf32>
    %190 = math.tanh %189 : vector<1x32xf32>
    %191 = vector.extract_strided_slice %151 {offsets = [0, 96], sizes = [1, 32], strides = [1, 1]} : vector<1x128xf32> to vector<1x32xf32>
    %192 = arith.negf %191 : vector<1x32xf32>
    %193 = math.exp %192 : vector<1x32xf32>
    %cst_46 = arith.constant 1.000000e+00 : f32
    %194 = vector.broadcast %cst_46 : f32 to vector<1x32xf32>
    %195 = arith.addf %194, %193 : vector<1x32xf32>
    %196 = arith.divf %194, %195 : vector<1x32xf32>
    %197 = arith.mulf %188, %134 : vector<1x32xf32>
    %198 = arith.mulf %182, %190 : vector<1x32xf32>
    %199 = arith.addf %197, %198 : vector<1x32xf32>
    %200 = math.tanh %199 : vector<1x32xf32>
    %201 = arith.mulf %196, %200 : vector<1x32xf32>
    %202 = arith.index_cast %c2_i32 : i32 to index
    %c0_47 = arith.constant 0 : index
    %203 = vector.load %arg17[%202, %c0_47] : memref<8x64xf32, #tpu.memory_space<vmem>>, vector<1x32xf32>
    tpu.vector_store %arg17[%202, %c0_47], %176 {strides = array<i32>} : memref<8x64xf32, #tpu.memory_space<vmem>>, vector<1x32xf32>,
    %204 = arith.index_cast %143 : i32 to index
    %c32_48 = arith.constant 32 : index
    %205 = vector.load %arg17[%204, %c32_48] : memref<8x64xf32, #tpu.memory_space<vmem>>, vector<1x32xf32>
    tpu.vector_store %arg17[%204, %c32_48], %201 {strides = array<i32>} : memref<8x64xf32, #tpu.memory_space<vmem>>, vector<1x32xf32>,
    %206 = tpu.concatenate %176, %201 in 1 : vector<1x32xf32>, vector<1x32xf32> -> vector<1x64xf32>
    %c3_i32 = arith.constant 3 : i32
    %cst_49 = arith.constant dense<0.000000e+00> : vector<1x256xf32>
    %207 = tpu.matmul %206, %8, %cst_49 {dimension_numbers = #tpu.dot_dimension_numbers<[1], [0], [0], [1], [0, 0, 1, 1], [], []>} : vector<1x64xf32>, vector<64x256xf32>, vector<1x256xf32> -> vector<1x256xf32>
    %c7_i32_50 = arith.constant 7 : i32
    %208 = arith.subi %c7_i32_50, %c3_i32 : i32
    %209 = arith.index_cast %c3_i32 : i32 to index
    %c0_51 = arith.constant 0 : index
    %210 = vector.load %arg16[%209, %c0_51] : memref<8x256xf32, #tpu.memory_space<vmem>>, vector<1x128xf32>
    %211 = vector.extract_strided_slice %207 {offsets = [0, 0], sizes = [1, 128], strides = [1, 1]} : vector<1x256xf32> to vector<1x128xf32>
    %212 = arith.addf %210, %211 : vector<1x128xf32>
    %213 = arith.index_cast %208 : i32 to index
    %c128_52 = arith.constant 128 : index
    %214 = vector.load %arg16[%213, %c128_52] : memref<8x256xf32, #tpu.memory_space<vmem>>, vector<1x128xf32>
    %215 = vector.extract_strided_slice %207 {offsets = [0, 128], sizes = [1, 128], strides = [1, 1]} : vector<1x256xf32> to vector<1x128xf32>
    %216 = arith.addf %214, %215 : vector<1x128xf32>
    %217 = vector.extract_strided_slice %212 {offsets = [0, 0], sizes = [1, 32], strides = [1, 1]} : vector<1x128xf32> to vector<1x32xf32>
    %218 = arith.negf %217 : vector<1x32xf32>
    %219 = math.exp %218 : vector<1x32xf32>
    %cst_53 = arith.constant 1.000000e+00 : f32
    %220 = vector.broadcast %cst_53 : f32 to vector<1x32xf32>
    %221 = arith.addf %220, %219 : vector<1x32xf32>
    %222 = arith.divf %220, %221 : vector<1x32xf32>
    %223 = vector.extract_strided_slice %212 {offsets = [0, 32], sizes = [1, 32], strides = [1, 1]} : vector<1x128xf32> to vector<1x32xf32>
    %224 = arith.negf %223 : vector<1x32xf32>
    %225 = math.exp %224 : vector<1x32xf32>
    %cst_54 = arith.constant 1.000000e+00 : f32
    %226 = vector.broadcast %cst_54 : f32 to vector<1x32xf32>
    %227 = arith.addf %226, %225 : vector<1x32xf32>
    %228 = arith.divf %226, %227 : vector<1x32xf32>
    %229 = vector.extract_strided_slice %212 {offsets = [0, 64], sizes = [1, 32], strides = [1, 1]} : vector<1x128xf32> to vector<1x32xf32>
    %230 = math.tanh %229 : vector<1x32xf32>
    %231 = vector.extract_strided_slice %212 {offsets = [0, 96], sizes = [1, 32], strides = [1, 1]} : vector<1x128xf32> to vector<1x32xf32>
    %232 = arith.negf %231 : vector<1x32xf32>
    %233 = math.exp %232 : vector<1x32xf32>
    %cst_55 = arith.constant 1.000000e+00 : f32
    %234 = vector.broadcast %cst_55 : f32 to vector<1x32xf32>
    %235 = arith.addf %234, %233 : vector<1x32xf32>
    %236 = arith.divf %234, %235 : vector<1x32xf32>
    %237 = arith.mulf %228, %174 : vector<1x32xf32>
    %238 = arith.mulf %222, %230 : vector<1x32xf32>
    %239 = arith.addf %237, %238 : vector<1x32xf32>
    %240 = math.tanh %239 : vector<1x32xf32>
    %241 = arith.mulf %236, %240 : vector<1x32xf32>
    %242 = vector.extract_strided_slice %216 {offsets = [0, 0], sizes = [1, 32], strides = [1, 1]} : vector<1x128xf32> to vector<1x32xf32>
    %243 = arith.negf %242 : vector<1x32xf32>
    %244 = math.exp %243 : vector<1x32xf32>
    %cst_56 = arith.constant 1.000000e+00 : f32
    %245 = vector.broadcast %cst_56 : f32 to vector<1x32xf32>
    %246 = arith.addf %245, %244 : vector<1x32xf32>
    %247 = arith.divf %245, %246 : vector<1x32xf32>
    %248 = vector.extract_strided_slice %216 {offsets = [0, 32], sizes = [1, 32], strides = [1, 1]} : vector<1x128xf32> to vector<1x32xf32>
    %249 = arith.negf %248 : vector<1x32xf32>
    %250 = math.exp %249 : vector<1x32xf32>
    %cst_57 = arith.constant 1.000000e+00 : f32
    %251 = vector.broadcast %cst_57 : f32 to vector<1x32xf32>
    %252 = arith.addf %251, %250 : vector<1x32xf32>
    %253 = arith.divf %251, %252 : vector<1x32xf32>
    %254 = vector.extract_strided_slice %216 {offsets = [0, 64], sizes = [1, 32], strides = [1, 1]} : vector<1x128xf32> to vector<1x32xf32>
    %255 = math.tanh %254 : vector<1x32xf32>
    %256 = vector.extract_strided_slice %216 {offsets = [0, 96], sizes = [1, 32], strides = [1, 1]} : vector<1x128xf32> to vector<1x32xf32>
    %257 = arith.negf %256 : vector<1x32xf32>
    %258 = math.exp %257 : vector<1x32xf32>
    %cst_58 = arith.constant 1.000000e+00 : f32
    %259 = vector.broadcast %cst_58 : f32 to vector<1x32xf32>
    %260 = arith.addf %259, %258 : vector<1x32xf32>
    %261 = arith.divf %259, %260 : vector<1x32xf32>
    %262 = arith.mulf %253, %199 : vector<1x32xf32>
    %263 = arith.mulf %247, %255 : vector<1x32xf32>
    %264 = arith.addf %262, %263 : vector<1x32xf32>
    %265 = math.tanh %264 : vector<1x32xf32>
    %266 = arith.mulf %261, %265 : vector<1x32xf32>
    %267 = arith.index_cast %c3_i32 : i32 to index
    %c0_59 = arith.constant 0 : index
    %268 = vector.load %arg17[%267, %c0_59] : memref<8x64xf32, #tpu.memory_space<vmem>>, vector<1x32xf32>
    tpu.vector_store %arg17[%267, %c0_59], %241 {strides = array<i32>} : memref<8x64xf32, #tpu.memory_space<vmem>>, vector<1x32xf32>,
    %269 = arith.index_cast %208 : i32 to index
    %c32_60 = arith.constant 32 : index
    %270 = vector.load %arg17[%269, %c32_60] : memref<8x64xf32, #tpu.memory_space<vmem>>, vector<1x32xf32>
    tpu.vector_store %arg17[%269, %c32_60], %266 {strides = array<i32>} : memref<8x64xf32, #tpu.memory_space<vmem>>, vector<1x32xf32>,
    %271 = tpu.concatenate %241, %266 in 1 : vector<1x32xf32>, vector<1x32xf32> -> vector<1x64xf32>
    %c4_i32 = arith.constant 4 : i32
    %cst_61 = arith.constant dense<0.000000e+00> : vector<1x256xf32>
    %272 = tpu.matmul %271, %8, %cst_61 {dimension_numbers = #tpu.dot_dimension_numbers<[1], [0], [0], [1], [0, 0, 1, 1], [], []>} : vector<1x64xf32>, vector<64x256xf32>, vector<1x256xf32> -> vector<1x256xf32>
    %c7_i32_62 = arith.constant 7 : i32
    %273 = arith.subi %c7_i32_62, %c4_i32 : i32
    %274 = arith.index_cast %c4_i32 : i32 to index
    %c0_63 = arith.constant 0 : index
    %275 = vector.load %arg16[%274, %c0_63] : memref<8x256xf32, #tpu.memory_space<vmem>>, vector<1x128xf32>
    %276 = vector.extract_strided_slice %272 {offsets = [0, 0], sizes = [1, 128], strides = [1, 1]} : vector<1x256xf32> to vector<1x128xf32>
    %277 = arith.addf %275, %276 : vector<1x128xf32>
    %278 = arith.index_cast %273 : i32 to index
    %c128_64 = arith.constant 128 : index
    %279 = vector.load %arg16[%278, %c128_64] : memref<8x256xf32, #tpu.memory_space<vmem>>, vector<1x128xf32>
    %280 = vector.extract_strided_slice %272 {offsets = [0, 128], sizes = [1, 128], strides = [1, 1]} : vector<1x256xf32> to vector<1x128xf32>
    %281 = arith.addf %279, %280 : vector<1x128xf32>
    %282 = vector.extract_strided_slice %277 {offsets = [0, 0], sizes = [1, 32], strides = [1, 1]} : vector<1x128xf32> to vector<1x32xf32>
    %283 = arith.negf %282 : vector<1x32xf32>
    %284 = math.exp %283 : vector<1x32xf32>
    %cst_65 = arith.constant 1.000000e+00 : f32
    %285 = vector.broadcast %cst_65 : f32 to vector<1x32xf32>
    %286 = arith.addf %285, %284 : vector<1x32xf32>
    %287 = arith.divf %285, %286 : vector<1x32xf32>
    %288 = vector.extract_strided_slice %277 {offsets = [0, 32], sizes = [1, 32], strides = [1, 1]} : vector<1x128xf32> to vector<1x32xf32>
    %289 = arith.negf %288 : vector<1x32xf32>
    %290 = math.exp %289 : vector<1x32xf32>
    %cst_66 = arith.constant 1.000000e+00 : f32
    %291 = vector.broadcast %cst_66 : f32 to vector<1x32xf32>
    %292 = arith.addf %291, %290 : vector<1x32xf32>
    %293 = arith.divf %291, %292 : vector<1x32xf32>
    %294 = vector.extract_strided_slice %277 {offsets = [0, 64], sizes = [1, 32], strides = [1, 1]} : vector<1x128xf32> to vector<1x32xf32>
    %295 = math.tanh %294 : vector<1x32xf32>
    %296 = vector.extract_strided_slice %277 {offsets = [0, 96], sizes = [1, 32], strides = [1, 1]} : vector<1x128xf32> to vector<1x32xf32>
    %297 = arith.negf %296 : vector<1x32xf32>
    %298 = math.exp %297 : vector<1x32xf32>
    %cst_67 = arith.constant 1.000000e+00 : f32
    %299 = vector.broadcast %cst_67 : f32 to vector<1x32xf32>
    %300 = arith.addf %299, %298 : vector<1x32xf32>
    %301 = arith.divf %299, %300 : vector<1x32xf32>
    %302 = arith.mulf %293, %239 : vector<1x32xf32>
    %303 = arith.mulf %287, %295 : vector<1x32xf32>
    %304 = arith.addf %302, %303 : vector<1x32xf32>
    %305 = math.tanh %304 : vector<1x32xf32>
    %306 = arith.mulf %301, %305 : vector<1x32xf32>
    %307 = vector.extract_strided_slice %281 {offsets = [0, 0], sizes = [1, 32], strides = [1, 1]} : vector<1x128xf32> to vector<1x32xf32>
    %308 = arith.negf %307 : vector<1x32xf32>
    %309 = math.exp %308 : vector<1x32xf32>
    %cst_68 = arith.constant 1.000000e+00 : f32
    %310 = vector.broadcast %cst_68 : f32 to vector<1x32xf32>
    %311 = arith.addf %310, %309 : vector<1x32xf32>
    %312 = arith.divf %310, %311 : vector<1x32xf32>
    %313 = vector.extract_strided_slice %281 {offsets = [0, 32], sizes = [1, 32], strides = [1, 1]} : vector<1x128xf32> to vector<1x32xf32>
    %314 = arith.negf %313 : vector<1x32xf32>
    %315 = math.exp %314 : vector<1x32xf32>
    %cst_69 = arith.constant 1.000000e+00 : f32
    %316 = vector.broadcast %cst_69 : f32 to vector<1x32xf32>
    %317 = arith.addf %316, %315 : vector<1x32xf32>
    %318 = arith.divf %316, %317 : vector<1x32xf32>
    %319 = vector.extract_strided_slice %281 {offsets = [0, 64], sizes = [1, 32], strides = [1, 1]} : vector<1x128xf32> to vector<1x32xf32>
    %320 = math.tanh %319 : vector<1x32xf32>
    %321 = vector.extract_strided_slice %281 {offsets = [0, 96], sizes = [1, 32], strides = [1, 1]} : vector<1x128xf32> to vector<1x32xf32>
    %322 = arith.negf %321 : vector<1x32xf32>
    %323 = math.exp %322 : vector<1x32xf32>
    %cst_70 = arith.constant 1.000000e+00 : f32
    %324 = vector.broadcast %cst_70 : f32 to vector<1x32xf32>
    %325 = arith.addf %324, %323 : vector<1x32xf32>
    %326 = arith.divf %324, %325 : vector<1x32xf32>
    %327 = arith.mulf %318, %264 : vector<1x32xf32>
    %328 = arith.mulf %312, %320 : vector<1x32xf32>
    %329 = arith.addf %327, %328 : vector<1x32xf32>
    %330 = math.tanh %329 : vector<1x32xf32>
    %331 = arith.mulf %326, %330 : vector<1x32xf32>
    %332 = arith.index_cast %c4_i32 : i32 to index
    %c0_71 = arith.constant 0 : index
    %333 = vector.load %arg17[%332, %c0_71] : memref<8x64xf32, #tpu.memory_space<vmem>>, vector<1x32xf32>
    tpu.vector_store %arg17[%332, %c0_71], %306 {strides = array<i32>} : memref<8x64xf32, #tpu.memory_space<vmem>>, vector<1x32xf32>,
    %334 = arith.index_cast %273 : i32 to index
    %c32_72 = arith.constant 32 : index
    %335 = vector.load %arg17[%334, %c32_72] : memref<8x64xf32, #tpu.memory_space<vmem>>, vector<1x32xf32>
    tpu.vector_store %arg17[%334, %c32_72], %331 {strides = array<i32>} : memref<8x64xf32, #tpu.memory_space<vmem>>, vector<1x32xf32>,
    %336 = tpu.concatenate %306, %331 in 1 : vector<1x32xf32>, vector<1x32xf32> -> vector<1x64xf32>
    %c5_i32 = arith.constant 5 : i32
    %cst_73 = arith.constant dense<0.000000e+00> : vector<1x256xf32>
    %337 = tpu.matmul %336, %8, %cst_73 {dimension_numbers = #tpu.dot_dimension_numbers<[1], [0], [0], [1], [0, 0, 1, 1], [], []>} : vector<1x64xf32>, vector<64x256xf32>, vector<1x256xf32> -> vector<1x256xf32>
    %c7_i32_74 = arith.constant 7 : i32
    %338 = arith.subi %c7_i32_74, %c5_i32 : i32
    %339 = arith.index_cast %c5_i32 : i32 to index
    %c0_75 = arith.constant 0 : index
    %340 = vector.load %arg16[%339, %c0_75] : memref<8x256xf32, #tpu.memory_space<vmem>>, vector<1x128xf32>
    %341 = vector.extract_strided_slice %337 {offsets = [0, 0], sizes = [1, 128], strides = [1, 1]} : vector<1x256xf32> to vector<1x128xf32>
    %342 = arith.addf %340, %341 : vector<1x128xf32>
    %343 = arith.index_cast %338 : i32 to index
    %c128_76 = arith.constant 128 : index
    %344 = vector.load %arg16[%343, %c128_76] : memref<8x256xf32, #tpu.memory_space<vmem>>, vector<1x128xf32>
    %345 = vector.extract_strided_slice %337 {offsets = [0, 128], sizes = [1, 128], strides = [1, 1]} : vector<1x256xf32> to vector<1x128xf32>
    %346 = arith.addf %344, %345 : vector<1x128xf32>
    %347 = vector.extract_strided_slice %342 {offsets = [0, 0], sizes = [1, 32], strides = [1, 1]} : vector<1x128xf32> to vector<1x32xf32>
    %348 = arith.negf %347 : vector<1x32xf32>
    %349 = math.exp %348 : vector<1x32xf32>
    %cst_77 = arith.constant 1.000000e+00 : f32
    %350 = vector.broadcast %cst_77 : f32 to vector<1x32xf32>
    %351 = arith.addf %350, %349 : vector<1x32xf32>
    %352 = arith.divf %350, %351 : vector<1x32xf32>
    %353 = vector.extract_strided_slice %342 {offsets = [0, 32], sizes = [1, 32], strides = [1, 1]} : vector<1x128xf32> to vector<1x32xf32>
    %354 = arith.negf %353 : vector<1x32xf32>
    %355 = math.exp %354 : vector<1x32xf32>
    %cst_78 = arith.constant 1.000000e+00 : f32
    %356 = vector.broadcast %cst_78 : f32 to vector<1x32xf32>
    %357 = arith.addf %356, %355 : vector<1x32xf32>
    %358 = arith.divf %356, %357 : vector<1x32xf32>
    %359 = vector.extract_strided_slice %342 {offsets = [0, 64], sizes = [1, 32], strides = [1, 1]} : vector<1x128xf32> to vector<1x32xf32>
    %360 = math.tanh %359 : vector<1x32xf32>
    %361 = vector.extract_strided_slice %342 {offsets = [0, 96], sizes = [1, 32], strides = [1, 1]} : vector<1x128xf32> to vector<1x32xf32>
    %362 = arith.negf %361 : vector<1x32xf32>
    %363 = math.exp %362 : vector<1x32xf32>
    %cst_79 = arith.constant 1.000000e+00 : f32
    %364 = vector.broadcast %cst_79 : f32 to vector<1x32xf32>
    %365 = arith.addf %364, %363 : vector<1x32xf32>
    %366 = arith.divf %364, %365 : vector<1x32xf32>
    %367 = arith.mulf %358, %304 : vector<1x32xf32>
    %368 = arith.mulf %352, %360 : vector<1x32xf32>
    %369 = arith.addf %367, %368 : vector<1x32xf32>
    %370 = math.tanh %369 : vector<1x32xf32>
    %371 = arith.mulf %366, %370 : vector<1x32xf32>
    %372 = vector.extract_strided_slice %346 {offsets = [0, 0], sizes = [1, 32], strides = [1, 1]} : vector<1x128xf32> to vector<1x32xf32>
    %373 = arith.negf %372 : vector<1x32xf32>
    %374 = math.exp %373 : vector<1x32xf32>
    %cst_80 = arith.constant 1.000000e+00 : f32
    %375 = vector.broadcast %cst_80 : f32 to vector<1x32xf32>
    %376 = arith.addf %375, %374 : vector<1x32xf32>
    %377 = arith.divf %375, %376 : vector<1x32xf32>
    %378 = vector.extract_strided_slice %346 {offsets = [0, 32], sizes = [1, 32], strides = [1, 1]} : vector<1x128xf32> to vector<1x32xf32>
    %379 = arith.negf %378 : vector<1x32xf32>
    %380 = math.exp %379 : vector<1x32xf32>
    %cst_81 = arith.constant 1.000000e+00 : f32
    %381 = vector.broadcast %cst_81 : f32 to vector<1x32xf32>
    %382 = arith.addf %381, %380 : vector<1x32xf32>
    %383 = arith.divf %381, %382 : vector<1x32xf32>
    %384 = vector.extract_strided_slice %346 {offsets = [0, 64], sizes = [1, 32], strides = [1, 1]} : vector<1x128xf32> to vector<1x32xf32>
    %385 = math.tanh %384 : vector<1x32xf32>
    %386 = vector.extract_strided_slice %346 {offsets = [0, 96], sizes = [1, 32], strides = [1, 1]} : vector<1x128xf32> to vector<1x32xf32>
    %387 = arith.negf %386 : vector<1x32xf32>
    %388 = math.exp %387 : vector<1x32xf32>
    %cst_82 = arith.constant 1.000000e+00 : f32
    %389 = vector.broadcast %cst_82 : f32 to vector<1x32xf32>
    %390 = arith.addf %389, %388 : vector<1x32xf32>
    %391 = arith.divf %389, %390 : vector<1x32xf32>
    %392 = arith.mulf %383, %329 : vector<1x32xf32>
    %393 = arith.mulf %377, %385 : vector<1x32xf32>
    %394 = arith.addf %392, %393 : vector<1x32xf32>
    %395 = math.tanh %394 : vector<1x32xf32>
    %396 = arith.mulf %391, %395 : vector<1x32xf32>
    %397 = arith.index_cast %c5_i32 : i32 to index
    %c0_83 = arith.constant 0 : index
    %398 = vector.load %arg17[%397, %c0_83] : memref<8x64xf32, #tpu.memory_space<vmem>>, vector<1x32xf32>
    tpu.vector_store %arg17[%397, %c0_83], %371 {strides = array<i32>} : memref<8x64xf32, #tpu.memory_space<vmem>>, vector<1x32xf32>,
    %399 = arith.index_cast %338 : i32 to index
    %c32_84 = arith.constant 32 : index
    %400 = vector.load %arg17[%399, %c32_84] : memref<8x64xf32, #tpu.memory_space<vmem>>, vector<1x32xf32>
    tpu.vector_store %arg17[%399, %c32_84], %396 {strides = array<i32>} : memref<8x64xf32, #tpu.memory_space<vmem>>, vector<1x32xf32>,
    %401 = tpu.concatenate %371, %396 in 1 : vector<1x32xf32>, vector<1x32xf32> -> vector<1x64xf32>
    %c6_i32 = arith.constant 6 : i32
    %cst_85 = arith.constant dense<0.000000e+00> : vector<1x256xf32>
    %402 = tpu.matmul %401, %8, %cst_85 {dimension_numbers = #tpu.dot_dimension_numbers<[1], [0], [0], [1], [0, 0, 1, 1], [], []>} : vector<1x64xf32>, vector<64x256xf32>, vector<1x256xf32> -> vector<1x256xf32>
    %c7_i32_86 = arith.constant 7 : i32
    %403 = arith.subi %c7_i32_86, %c6_i32 : i32
    %404 = arith.index_cast %c6_i32 : i32 to index
    %c0_87 = arith.constant 0 : index
    %405 = vector.load %arg16[%404, %c0_87] : memref<8x256xf32, #tpu.memory_space<vmem>>, vector<1x128xf32>
    %406 = vector.extract_strided_slice %402 {offsets = [0, 0], sizes = [1, 128], strides = [1, 1]} : vector<1x256xf32> to vector<1x128xf32>
    %407 = arith.addf %405, %406 : vector<1x128xf32>
    %408 = arith.index_cast %403 : i32 to index
    %c128_88 = arith.constant 128 : index
    %409 = vector.load %arg16[%408, %c128_88] : memref<8x256xf32, #tpu.memory_space<vmem>>, vector<1x128xf32>
    %410 = vector.extract_strided_slice %402 {offsets = [0, 128], sizes = [1, 128], strides = [1, 1]} : vector<1x256xf32> to vector<1x128xf32>
    %411 = arith.addf %409, %410 : vector<1x128xf32>
    %412 = vector.extract_strided_slice %407 {offsets = [0, 0], sizes = [1, 32], strides = [1, 1]} : vector<1x128xf32> to vector<1x32xf32>
    %413 = arith.negf %412 : vector<1x32xf32>
    %414 = math.exp %413 : vector<1x32xf32>
    %cst_89 = arith.constant 1.000000e+00 : f32
    %415 = vector.broadcast %cst_89 : f32 to vector<1x32xf32>
    %416 = arith.addf %415, %414 : vector<1x32xf32>
    %417 = arith.divf %415, %416 : vector<1x32xf32>
    %418 = vector.extract_strided_slice %407 {offsets = [0, 32], sizes = [1, 32], strides = [1, 1]} : vector<1x128xf32> to vector<1x32xf32>
    %419 = arith.negf %418 : vector<1x32xf32>
    %420 = math.exp %419 : vector<1x32xf32>
    %cst_90 = arith.constant 1.000000e+00 : f32
    %421 = vector.broadcast %cst_90 : f32 to vector<1x32xf32>
    %422 = arith.addf %421, %420 : vector<1x32xf32>
    %423 = arith.divf %421, %422 : vector<1x32xf32>
    %424 = vector.extract_strided_slice %407 {offsets = [0, 64], sizes = [1, 32], strides = [1, 1]} : vector<1x128xf32> to vector<1x32xf32>
    %425 = math.tanh %424 : vector<1x32xf32>
    %426 = vector.extract_strided_slice %407 {offsets = [0, 96], sizes = [1, 32], strides = [1, 1]} : vector<1x128xf32> to vector<1x32xf32>
    %427 = arith.negf %426 : vector<1x32xf32>
    %428 = math.exp %427 : vector<1x32xf32>
    %cst_91 = arith.constant 1.000000e+00 : f32
    %429 = vector.broadcast %cst_91 : f32 to vector<1x32xf32>
    %430 = arith.addf %429, %428 : vector<1x32xf32>
    %431 = arith.divf %429, %430 : vector<1x32xf32>
    %432 = arith.mulf %423, %369 : vector<1x32xf32>
    %433 = arith.mulf %417, %425 : vector<1x32xf32>
    %434 = arith.addf %432, %433 : vector<1x32xf32>
    %435 = math.tanh %434 : vector<1x32xf32>
    %436 = arith.mulf %431, %435 : vector<1x32xf32>
    %437 = vector.extract_strided_slice %411 {offsets = [0, 0], sizes = [1, 32], strides = [1, 1]} : vector<1x128xf32> to vector<1x32xf32>
    %438 = arith.negf %437 : vector<1x32xf32>
    %439 = math.exp %438 : vector<1x32xf32>
    %cst_92 = arith.constant 1.000000e+00 : f32
    %440 = vector.broadcast %cst_92 : f32 to vector<1x32xf32>
    %441 = arith.addf %440, %439 : vector<1x32xf32>
    %442 = arith.divf %440, %441 : vector<1x32xf32>
    %443 = vector.extract_strided_slice %411 {offsets = [0, 32], sizes = [1, 32], strides = [1, 1]} : vector<1x128xf32> to vector<1x32xf32>
    %444 = arith.negf %443 : vector<1x32xf32>
    %445 = math.exp %444 : vector<1x32xf32>
    %cst_93 = arith.constant 1.000000e+00 : f32
    %446 = vector.broadcast %cst_93 : f32 to vector<1x32xf32>
    %447 = arith.addf %446, %445 : vector<1x32xf32>
    %448 = arith.divf %446, %447 : vector<1x32xf32>
    %449 = vector.extract_strided_slice %411 {offsets = [0, 64], sizes = [1, 32], strides = [1, 1]} : vector<1x128xf32> to vector<1x32xf32>
    %450 = math.tanh %449 : vector<1x32xf32>
    %451 = vector.extract_strided_slice %411 {offsets = [0, 96], sizes = [1, 32], strides = [1, 1]} : vector<1x128xf32> to vector<1x32xf32>
    %452 = arith.negf %451 : vector<1x32xf32>
    %453 = math.exp %452 : vector<1x32xf32>
    %cst_94 = arith.constant 1.000000e+00 : f32
    %454 = vector.broadcast %cst_94 : f32 to vector<1x32xf32>
    %455 = arith.addf %454, %453 : vector<1x32xf32>
    %456 = arith.divf %454, %455 : vector<1x32xf32>
    %457 = arith.mulf %448, %394 : vector<1x32xf32>
    %458 = arith.mulf %442, %450 : vector<1x32xf32>
    %459 = arith.addf %457, %458 : vector<1x32xf32>
    %460 = math.tanh %459 : vector<1x32xf32>
    %461 = arith.mulf %456, %460 : vector<1x32xf32>
    %462 = arith.index_cast %c6_i32 : i32 to index
    %c0_95 = arith.constant 0 : index
    %463 = vector.load %arg17[%462, %c0_95] : memref<8x64xf32, #tpu.memory_space<vmem>>, vector<1x32xf32>
    tpu.vector_store %arg17[%462, %c0_95], %436 {strides = array<i32>} : memref<8x64xf32, #tpu.memory_space<vmem>>, vector<1x32xf32>,
    %464 = arith.index_cast %403 : i32 to index
    %c32_96 = arith.constant 32 : index
    %465 = vector.load %arg17[%464, %c32_96] : memref<8x64xf32, #tpu.memory_space<vmem>>, vector<1x32xf32>
    tpu.vector_store %arg17[%464, %c32_96], %461 {strides = array<i32>} : memref<8x64xf32, #tpu.memory_space<vmem>>, vector<1x32xf32>,
    %466 = tpu.concatenate %436, %461 in 1 : vector<1x32xf32>, vector<1x32xf32> -> vector<1x64xf32>
    %c7_i32_97 = arith.constant 7 : i32
    %cst_98 = arith.constant dense<0.000000e+00> : vector<1x256xf32>
    %467 = tpu.matmul %466, %8, %cst_98 {dimension_numbers = #tpu.dot_dimension_numbers<[1], [0], [0], [1], [0, 0, 1, 1], [], []>} : vector<1x64xf32>, vector<64x256xf32>, vector<1x256xf32> -> vector<1x256xf32>
    %c7_i32_99 = arith.constant 7 : i32
    %468 = arith.subi %c7_i32_99, %c7_i32_97 : i32
    %469 = arith.index_cast %c7_i32_97 : i32 to index
    %c0_100 = arith.constant 0 : index
    %470 = vector.load %arg16[%469, %c0_100] : memref<8x256xf32, #tpu.memory_space<vmem>>, vector<1x128xf32>
    %471 = vector.extract_strided_slice %467 {offsets = [0, 0], sizes = [1, 128], strides = [1, 1]} : vector<1x256xf32> to vector<1x128xf32>
    %472 = arith.addf %470, %471 : vector<1x128xf32>
    %473 = arith.index_cast %468 : i32 to index
    %c128_101 = arith.constant 128 : index
    %474 = vector.load %arg16[%473, %c128_101] : memref<8x256xf32, #tpu.memory_space<vmem>>, vector<1x128xf32>
    %475 = vector.extract_strided_slice %467 {offsets = [0, 128], sizes = [1, 128], strides = [1, 1]} : vector<1x256xf32> to vector<1x128xf32>
    %476 = arith.addf %474, %475 : vector<1x128xf32>
    %477 = vector.extract_strided_slice %472 {offsets = [0, 0], sizes = [1, 32], strides = [1, 1]} : vector<1x128xf32> to vector<1x32xf32>
    %478 = arith.negf %477 : vector<1x32xf32>
    %479 = math.exp %478 : vector<1x32xf32>
    %cst_102 = arith.constant 1.000000e+00 : f32
    %480 = vector.broadcast %cst_102 : f32 to vector<1x32xf32>
    %481 = arith.addf %480, %479 : vector<1x32xf32>
    %482 = arith.divf %480, %481 : vector<1x32xf32>
    %483 = vector.extract_strided_slice %472 {offsets = [0, 32], sizes = [1, 32], strides = [1, 1]} : vector<1x128xf32> to vector<1x32xf32>
    %484 = arith.negf %483 : vector<1x32xf32>
    %485 = math.exp %484 : vector<1x32xf32>
    %cst_103 = arith.constant 1.000000e+00 : f32
    %486 = vector.broadcast %cst_103 : f32 to vector<1x32xf32>
    %487 = arith.addf %486, %485 : vector<1x32xf32>
    %488 = arith.divf %486, %487 : vector<1x32xf32>
    %489 = vector.extract_strided_slice %472 {offsets = [0, 64], sizes = [1, 32], strides = [1, 1]} : vector<1x128xf32> to vector<1x32xf32>
    %490 = math.tanh %489 : vector<1x32xf32>
    %491 = vector.extract_strided_slice %472 {offsets = [0, 96], sizes = [1, 32], strides = [1, 1]} : vector<1x128xf32> to vector<1x32xf32>
    %492 = arith.negf %491 : vector<1x32xf32>
    %493 = math.exp %492 : vector<1x32xf32>
    %cst_104 = arith.constant 1.000000e+00 : f32
    %494 = vector.broadcast %cst_104 : f32 to vector<1x32xf32>
    %495 = arith.addf %494, %493 : vector<1x32xf32>
    %496 = arith.divf %494, %495 : vector<1x32xf32>
    %497 = arith.mulf %488, %434 : vector<1x32xf32>
    %498 = arith.mulf %482, %490 : vector<1x32xf32>
    %499 = arith.addf %497, %498 : vector<1x32xf32>
    %500 = math.tanh %499 : vector<1x32xf32>
    %501 = arith.mulf %496, %500 : vector<1x32xf32>
    %502 = vector.extract_strided_slice %476 {offsets = [0, 0], sizes = [1, 32], strides = [1, 1]} : vector<1x128xf32> to vector<1x32xf32>
    %503 = arith.negf %502 : vector<1x32xf32>
    %504 = math.exp %503 : vector<1x32xf32>
    %cst_105 = arith.constant 1.000000e+00 : f32
    %505 = vector.broadcast %cst_105 : f32 to vector<1x32xf32>
    %506 = arith.addf %505, %504 : vector<1x32xf32>
    %507 = arith.divf %505, %506 : vector<1x32xf32>
    %508 = vector.extract_strided_slice %476 {offsets = [0, 32], sizes = [1, 32], strides = [1, 1]} : vector<1x128xf32> to vector<1x32xf32>
    %509 = arith.negf %508 : vector<1x32xf32>
    %510 = math.exp %509 : vector<1x32xf32>
    %cst_106 = arith.constant 1.000000e+00 : f32
    %511 = vector.broadcast %cst_106 : f32 to vector<1x32xf32>
    %512 = arith.addf %511, %510 : vector<1x32xf32>
    %513 = arith.divf %511, %512 : vector<1x32xf32>
    %514 = vector.extract_strided_slice %476 {offsets = [0, 64], sizes = [1, 32], strides = [1, 1]} : vector<1x128xf32> to vector<1x32xf32>
    %515 = math.tanh %514 : vector<1x32xf32>
    %516 = vector.extract_strided_slice %476 {offsets = [0, 96], sizes = [1, 32], strides = [1, 1]} : vector<1x128xf32> to vector<1x32xf32>
    %517 = arith.negf %516 : vector<1x32xf32>
    %518 = math.exp %517 : vector<1x32xf32>
    %cst_107 = arith.constant 1.000000e+00 : f32
    %519 = vector.broadcast %cst_107 : f32 to vector<1x32xf32>
    %520 = arith.addf %519, %518 : vector<1x32xf32>
    %521 = arith.divf %519, %520 : vector<1x32xf32>
    %522 = arith.mulf %513, %459 : vector<1x32xf32>
    %523 = arith.mulf %507, %515 : vector<1x32xf32>
    %524 = arith.addf %522, %523 : vector<1x32xf32>
    %525 = math.tanh %524 : vector<1x32xf32>
    %526 = arith.mulf %521, %525 : vector<1x32xf32>
    %527 = arith.index_cast %c7_i32_97 : i32 to index
    %c0_108 = arith.constant 0 : index
    %528 = vector.load %arg17[%527, %c0_108] : memref<8x64xf32, #tpu.memory_space<vmem>>, vector<1x32xf32>
    tpu.vector_store %arg17[%527, %c0_108], %501 {strides = array<i32>} : memref<8x64xf32, #tpu.memory_space<vmem>>, vector<1x32xf32>,
    %529 = arith.index_cast %468 : i32 to index
    %c32_109 = arith.constant 32 : index
    %530 = vector.load %arg17[%529, %c32_109] : memref<8x64xf32, #tpu.memory_space<vmem>>, vector<1x32xf32>
    tpu.vector_store %arg17[%529, %c32_109], %526 {strides = array<i32>} : memref<8x64xf32, #tpu.memory_space<vmem>>, vector<1x32xf32>,
    %531 = tpu.concatenate %501, %526 in 1 : vector<1x32xf32>, vector<1x32xf32> -> vector<1x64xf32>
    %c8_i32 = arith.constant 8 : i32
    %c0_110 = arith.constant 0 : index
    %c0_111 = arith.constant 0 : index
    %532 = vector.load %arg17[%c0_110, %c0_111] : memref<8x64xf32, #tpu.memory_space<vmem>>, vector<8x64xf32>
    %c0_112 = arith.constant 0 : index
    %c0_113 = arith.constant 0 : index
    %533 = vector.load %arg5[%c0_112, %c0_113] : memref<64x256xf32, #tpu.memory_space<vmem>>, vector<64x256xf32>
    %cst_114 = arith.constant dense<0.000000e+00> : vector<8x256xf32>
    %534 = tpu.matmul %532, %533, %cst_114 {dimension_numbers = #tpu.dot_dimension_numbers<[1], [0], [0], [1], [0, 0, 1, 1], [], []>} : vector<8x64xf32>, vector<64x256xf32>, vector<8x256xf32> -> vector<8x256xf32>
    %c0_115 = arith.constant 0 : index
    %c0_116 = arith.constant 0 : index
    %535 = vector.load %arg7[%c0_115, %c0_116] : memref<1x256xf32, #tpu.memory_space<vmem>>, vector<1x256xf32>
    %536 = vector.broadcast %535 : vector<1x256xf32> to vector<8x256xf32>
    %537 = arith.addf %534, %536 : vector<8x256xf32>
    %c0_117 = arith.constant 0 : index
    %c0_118 = arith.constant 0 : index
    %538 = vector.load %arg16[%c0_117, %c0_118] : memref<8x256xf32, #tpu.memory_space<vmem>>, vector<8x256xf32>
    tpu.vector_store %arg16[%c0_117, %c0_118], %537 {strides = array<i32>} : memref<8x256xf32, #tpu.memory_space<vmem>>, vector<8x256xf32>,
    %c0_119 = arith.constant 0 : index
    %c0_120 = arith.constant 0 : index
    %539 = vector.load %arg6[%c0_119, %c0_120] : memref<64x256xf32, #tpu.memory_space<vmem>>, vector<64x256xf32>
    %c1 = arith.constant 1 : index
    %c0_121 = arith.constant 0 : index
    %540 = vector.load %arg8[%c1, %c0_121] : memref<2x64xf32, #tpu.memory_space<vmem>>, vector<1x64xf32>
    %c1_122 = arith.constant 1 : index
    %c0_123 = arith.constant 0 : index
    %541 = vector.load %arg9[%c1_122, %c0_123] : memref<2x64xf32, #tpu.memory_space<vmem>>, vector<1x32xf32>
    %c1_124 = arith.constant 1 : index
    %c32_125 = arith.constant 32 : index
    %542 = vector.load %arg9[%c1_124, %c32_125] : memref<2x64xf32, #tpu.memory_space<vmem>>, vector<1x32xf32>
    %c0_i32_126 = arith.constant 0 : i32
    %cst_127 = arith.constant dense<0.000000e+00> : vector<1x256xf32>
    %543 = tpu.matmul %540, %539, %cst_127 {dimension_numbers = #tpu.dot_dimension_numbers<[1], [0], [0], [1], [0, 0, 1, 1], [], []>} : vector<1x64xf32>, vector<64x256xf32>, vector<1x256xf32> -> vector<1x256xf32>
    %c7_i32_128 = arith.constant 7 : i32
    %544 = arith.subi %c7_i32_128, %c0_i32_126 : i32
    %545 = arith.index_cast %c0_i32_126 : i32 to index
    %c0_129 = arith.constant 0 : index
    %546 = vector.load %arg16[%545, %c0_129] : memref<8x256xf32, #tpu.memory_space<vmem>>, vector<1x128xf32>
    %547 = vector.extract_strided_slice %543 {offsets = [0, 0], sizes = [1, 128], strides = [1, 1]} : vector<1x256xf32> to vector<1x128xf32>
    %548 = arith.addf %546, %547 : vector<1x128xf32>
    %549 = arith.index_cast %544 : i32 to index
    %c128_130 = arith.constant 128 : index
    %550 = vector.load %arg16[%549, %c128_130] : memref<8x256xf32, #tpu.memory_space<vmem>>, vector<1x128xf32>
    %551 = vector.extract_strided_slice %543 {offsets = [0, 128], sizes = [1, 128], strides = [1, 1]} : vector<1x256xf32> to vector<1x128xf32>
    %552 = arith.addf %550, %551 : vector<1x128xf32>
    %553 = vector.extract_strided_slice %548 {offsets = [0, 0], sizes = [1, 32], strides = [1, 1]} : vector<1x128xf32> to vector<1x32xf32>
    %554 = arith.negf %553 : vector<1x32xf32>
    %555 = math.exp %554 : vector<1x32xf32>
    %cst_131 = arith.constant 1.000000e+00 : f32
    %556 = vector.broadcast %cst_131 : f32 to vector<1x32xf32>
    %557 = arith.addf %556, %555 : vector<1x32xf32>
    %558 = arith.divf %556, %557 : vector<1x32xf32>
    %559 = vector.extract_strided_slice %548 {offsets = [0, 32], sizes = [1, 32], strides = [1, 1]} : vector<1x128xf32> to vector<1x32xf32>
    %560 = arith.negf %559 : vector<1x32xf32>
    %561 = math.exp %560 : vector<1x32xf32>
    %cst_132 = arith.constant 1.000000e+00 : f32
    %562 = vector.broadcast %cst_132 : f32 to vector<1x32xf32>
    %563 = arith.addf %562, %561 : vector<1x32xf32>
    %564 = arith.divf %562, %563 : vector<1x32xf32>
    %565 = vector.extract_strided_slice %548 {offsets = [0, 64], sizes = [1, 32], strides = [1, 1]} : vector<1x128xf32> to vector<1x32xf32>
    %566 = math.tanh %565 : vector<1x32xf32>
    %567 = vector.extract_strided_slice %548 {offsets = [0, 96], sizes = [1, 32], strides = [1, 1]} : vector<1x128xf32> to vector<1x32xf32>
    %568 = arith.negf %567 : vector<1x32xf32>
    %569 = math.exp %568 : vector<1x32xf32>
    %cst_133 = arith.constant 1.000000e+00 : f32
    %570 = vector.broadcast %cst_133 : f32 to vector<1x32xf32>
    %571 = arith.addf %570, %569 : vector<1x32xf32>
    %572 = arith.divf %570, %571 : vector<1x32xf32>
    %573 = arith.mulf %564, %541 : vector<1x32xf32>
    %574 = arith.mulf %558, %566 : vector<1x32xf32>
    %575 = arith.addf %573, %574 : vector<1x32xf32>
    %576 = math.tanh %575 : vector<1x32xf32>
    %577 = arith.mulf %572, %576 : vector<1x32xf32>
    %578 = vector.extract_strided_slice %552 {offsets = [0, 0], sizes = [1, 32], strides = [1, 1]} : vector<1x128xf32> to vector<1x32xf32>
    %579 = arith.negf %578 : vector<1x32xf32>
    %580 = math.exp %579 : vector<1x32xf32>
    %cst_134 = arith.constant 1.000000e+00 : f32
    %581 = vector.broadcast %cst_134 : f32 to vector<1x32xf32>
    %582 = arith.addf %581, %580 : vector<1x32xf32>
    %583 = arith.divf %581, %582 : vector<1x32xf32>
    %584 = vector.extract_strided_slice %552 {offsets = [0, 32], sizes = [1, 32], strides = [1, 1]} : vector<1x128xf32> to vector<1x32xf32>
    %585 = arith.negf %584 : vector<1x32xf32>
    %586 = math.exp %585 : vector<1x32xf32>
    %cst_135 = arith.constant 1.000000e+00 : f32
    %587 = vector.broadcast %cst_135 : f32 to vector<1x32xf32>
    %588 = arith.addf %587, %586 : vector<1x32xf32>
    %589 = arith.divf %587, %588 : vector<1x32xf32>
    %590 = vector.extract_strided_slice %552 {offsets = [0, 64], sizes = [1, 32], strides = [1, 1]} : vector<1x128xf32> to vector<1x32xf32>
    %591 = math.tanh %590 : vector<1x32xf32>
    %592 = vector.extract_strided_slice %552 {offsets = [0, 96], sizes = [1, 32], strides = [1, 1]} : vector<1x128xf32> to vector<1x32xf32>
    %593 = arith.negf %592 : vector<1x32xf32>
    %594 = math.exp %593 : vector<1x32xf32>
    %cst_136 = arith.constant 1.000000e+00 : f32
    %595 = vector.broadcast %cst_136 : f32 to vector<1x32xf32>
    %596 = arith.addf %595, %594 : vector<1x32xf32>
    %597 = arith.divf %595, %596 : vector<1x32xf32>
    %598 = arith.mulf %589, %542 : vector<1x32xf32>
    %599 = arith.mulf %583, %591 : vector<1x32xf32>
    %600 = arith.addf %598, %599 : vector<1x32xf32>
    %601 = math.tanh %600 : vector<1x32xf32>
    %602 = arith.mulf %597, %601 : vector<1x32xf32>
    %603 = arith.index_cast %c0_i32_126 : i32 to index
    %c0_137 = arith.constant 0 : index
    %604 = vector.load %arg18[%603, %c0_137] : memref<8x64xf32, #tpu.memory_space<vmem>>, vector<1x32xf32>
    tpu.vector_store %arg18[%603, %c0_137], %577 {strides = array<i32>} : memref<8x64xf32, #tpu.memory_space<vmem>>, vector<1x32xf32>,
    %605 = arith.index_cast %544 : i32 to index
    %c32_138 = arith.constant 32 : index
    %606 = vector.load %arg18[%605, %c32_138] : memref<8x64xf32, #tpu.memory_space<vmem>>, vector<1x32xf32>
    tpu.vector_store %arg18[%605, %c32_138], %602 {strides = array<i32>} : memref<8x64xf32, #tpu.memory_space<vmem>>, vector<1x32xf32>,
    %607 = tpu.concatenate %577, %602 in 1 : vector<1x32xf32>, vector<1x32xf32> -> vector<1x64xf32>
    %c1_i32_139 = arith.constant 1 : i32
    %cst_140 = arith.constant dense<0.000000e+00> : vector<1x256xf32>
    %608 = tpu.matmul %607, %539, %cst_140 {dimension_numbers = #tpu.dot_dimension_numbers<[1], [0], [0], [1], [0, 0, 1, 1], [], []>} : vector<1x64xf32>, vector<64x256xf32>, vector<1x256xf32> -> vector<1x256xf32>
    %c7_i32_141 = arith.constant 7 : i32
    %609 = arith.subi %c7_i32_141, %c1_i32_139 : i32
    %610 = arith.index_cast %c1_i32_139 : i32 to index
    %c0_142 = arith.constant 0 : index
    %611 = vector.load %arg16[%610, %c0_142] : memref<8x256xf32, #tpu.memory_space<vmem>>, vector<1x128xf32>
    %612 = vector.extract_strided_slice %608 {offsets = [0, 0], sizes = [1, 128], strides = [1, 1]} : vector<1x256xf32> to vector<1x128xf32>
    %613 = arith.addf %611, %612 : vector<1x128xf32>
    %614 = arith.index_cast %609 : i32 to index
    %c128_143 = arith.constant 128 : index
    %615 = vector.load %arg16[%614, %c128_143] : memref<8x256xf32, #tpu.memory_space<vmem>>, vector<1x128xf32>
    %616 = vector.extract_strided_slice %608 {offsets = [0, 128], sizes = [1, 128], strides = [1, 1]} : vector<1x256xf32> to vector<1x128xf32>
    %617 = arith.addf %615, %616 : vector<1x128xf32>
    %618 = vector.extract_strided_slice %613 {offsets = [0, 0], sizes = [1, 32], strides = [1, 1]} : vector<1x128xf32> to vector<1x32xf32>
    %619 = arith.negf %618 : vector<1x32xf32>
    %620 = math.exp %619 : vector<1x32xf32>
    %cst_144 = arith.constant 1.000000e+00 : f32
    %621 = vector.broadcast %cst_144 : f32 to vector<1x32xf32>
    %622 = arith.addf %621, %620 : vector<1x32xf32>
    %623 = arith.divf %621, %622 : vector<1x32xf32>
    %624 = vector.extract_strided_slice %613 {offsets = [0, 32], sizes = [1, 32], strides = [1, 1]} : vector<1x128xf32> to vector<1x32xf32>
    %625 = arith.negf %624 : vector<1x32xf32>
    %626 = math.exp %625 : vector<1x32xf32>
    %cst_145 = arith.constant 1.000000e+00 : f32
    %627 = vector.broadcast %cst_145 : f32 to vector<1x32xf32>
    %628 = arith.addf %627, %626 : vector<1x32xf32>
    %629 = arith.divf %627, %628 : vector<1x32xf32>
    %630 = vector.extract_strided_slice %613 {offsets = [0, 64], sizes = [1, 32], strides = [1, 1]} : vector<1x128xf32> to vector<1x32xf32>
    %631 = math.tanh %630 : vector<1x32xf32>
    %632 = vector.extract_strided_slice %613 {offsets = [0, 96], sizes = [1, 32], strides = [1, 1]} : vector<1x128xf32> to vector<1x32xf32>
    %633 = arith.negf %632 : vector<1x32xf32>
    %634 = math.exp %633 : vector<1x32xf32>
    %cst_146 = arith.constant 1.000000e+00 : f32
    %635 = vector.broadcast %cst_146 : f32 to vector<1x32xf32>
    %636 = arith.addf %635, %634 : vector<1x32xf32>
    %637 = arith.divf %635, %636 : vector<1x32xf32>
    %638 = arith.mulf %629, %575 : vector<1x32xf32>
    %639 = arith.mulf %623, %631 : vector<1x32xf32>
    %640 = arith.addf %638, %639 : vector<1x32xf32>
    %641 = math.tanh %640 : vector<1x32xf32>
    %642 = arith.mulf %637, %641 : vector<1x32xf32>
    %643 = vector.extract_strided_slice %617 {offsets = [0, 0], sizes = [1, 32], strides = [1, 1]} : vector<1x128xf32> to vector<1x32xf32>
    %644 = arith.negf %643 : vector<1x32xf32>
    %645 = math.exp %644 : vector<1x32xf32>
    %cst_147 = arith.constant 1.000000e+00 : f32
    %646 = vector.broadcast %cst_147 : f32 to vector<1x32xf32>
    %647 = arith.addf %646, %645 : vector<1x32xf32>
    %648 = arith.divf %646, %647 : vector<1x32xf32>
    %649 = vector.extract_strided_slice %617 {offsets = [0, 32], sizes = [1, 32], strides = [1, 1]} : vector<1x128xf32> to vector<1x32xf32>
    %650 = arith.negf %649 : vector<1x32xf32>
    %651 = math.exp %650 : vector<1x32xf32>
    %cst_148 = arith.constant 1.000000e+00 : f32
    %652 = vector.broadcast %cst_148 : f32 to vector<1x32xf32>
    %653 = arith.addf %652, %651 : vector<1x32xf32>
    %654 = arith.divf %652, %653 : vector<1x32xf32>
    %655 = vector.extract_strided_slice %617 {offsets = [0, 64], sizes = [1, 32], strides = [1, 1]} : vector<1x128xf32> to vector<1x32xf32>
    %656 = math.tanh %655 : vector<1x32xf32>
    %657 = vector.extract_strided_slice %617 {offsets = [0, 96], sizes = [1, 32], strides = [1, 1]} : vector<1x128xf32> to vector<1x32xf32>
    %658 = arith.negf %657 : vector<1x32xf32>
    %659 = math.exp %658 : vector<1x32xf32>
    %cst_149 = arith.constant 1.000000e+00 : f32
    %660 = vector.broadcast %cst_149 : f32 to vector<1x32xf32>
    %661 = arith.addf %660, %659 : vector<1x32xf32>
    %662 = arith.divf %660, %661 : vector<1x32xf32>
    %663 = arith.mulf %654, %600 : vector<1x32xf32>
    %664 = arith.mulf %648, %656 : vector<1x32xf32>
    %665 = arith.addf %663, %664 : vector<1x32xf32>
    %666 = math.tanh %665 : vector<1x32xf32>
    %667 = arith.mulf %662, %666 : vector<1x32xf32>
    %668 = arith.index_cast %c1_i32_139 : i32 to index
    %c0_150 = arith.constant 0 : index
    %669 = vector.load %arg18[%668, %c0_150] : memref<8x64xf32, #tpu.memory_space<vmem>>, vector<1x32xf32>
    tpu.vector_store %arg18[%668, %c0_150], %642 {strides = array<i32>} : memref<8x64xf32, #tpu.memory_space<vmem>>, vector<1x32xf32>,
    %670 = arith.index_cast %609 : i32 to index
    %c32_151 = arith.constant 32 : index
    %671 = vector.load %arg18[%670, %c32_151] : memref<8x64xf32, #tpu.memory_space<vmem>>, vector<1x32xf32>
    tpu.vector_store %arg18[%670, %c32_151], %667 {strides = array<i32>} : memref<8x64xf32, #tpu.memory_space<vmem>>, vector<1x32xf32>,
    %672 = tpu.concatenate %642, %667 in 1 : vector<1x32xf32>, vector<1x32xf32> -> vector<1x64xf32>
    %c2_i32_152 = arith.constant 2 : i32
    %cst_153 = arith.constant dense<0.000000e+00> : vector<1x256xf32>
    %673 = tpu.matmul %672, %539, %cst_153 {dimension_numbers = #tpu.dot_dimension_numbers<[1], [0], [0], [1], [0, 0, 1, 1], [], []>} : vector<1x64xf32>, vector<64x256xf32>, vector<1x256xf32> -> vector<1x256xf32>
    %c7_i32_154 = arith.constant 7 : i32
    %674 = arith.subi %c7_i32_154, %c2_i32_152 : i32
    %675 = arith.index_cast %c2_i32_152 : i32 to index
    %c0_155 = arith.constant 0 : index
    %676 = vector.load %arg16[%675, %c0_155] : memref<8x256xf32, #tpu.memory_space<vmem>>, vector<1x128xf32>
    %677 = vector.extract_strided_slice %673 {offsets = [0, 0], sizes = [1, 128], strides = [1, 1]} : vector<1x256xf32> to vector<1x128xf32>
    %678 = arith.addf %676, %677 : vector<1x128xf32>
    %679 = arith.index_cast %674 : i32 to index
    %c128_156 = arith.constant 128 : index
    %680 = vector.load %arg16[%679, %c128_156] : memref<8x256xf32, #tpu.memory_space<vmem>>, vector<1x128xf32>
    %681 = vector.extract_strided_slice %673 {offsets = [0, 128], sizes = [1, 128], strides = [1, 1]} : vector<1x256xf32> to vector<1x128xf32>
    %682 = arith.addf %680, %681 : vector<1x128xf32>
    %683 = vector.extract_strided_slice %678 {offsets = [0, 0], sizes = [1, 32], strides = [1, 1]} : vector<1x128xf32> to vector<1x32xf32>
    %684 = arith.negf %683 : vector<1x32xf32>
    %685 = math.exp %684 : vector<1x32xf32>
    %cst_157 = arith.constant 1.000000e+00 : f32
    %686 = vector.broadcast %cst_157 : f32 to vector<1x32xf32>
    %687 = arith.addf %686, %685 : vector<1x32xf32>
    %688 = arith.divf %686, %687 : vector<1x32xf32>
    %689 = vector.extract_strided_slice %678 {offsets = [0, 32], sizes = [1, 32], strides = [1, 1]} : vector<1x128xf32> to vector<1x32xf32>
    %690 = arith.negf %689 : vector<1x32xf32>
    %691 = math.exp %690 : vector<1x32xf32>
    %cst_158 = arith.constant 1.000000e+00 : f32
    %692 = vector.broadcast %cst_158 : f32 to vector<1x32xf32>
    %693 = arith.addf %692, %691 : vector<1x32xf32>
    %694 = arith.divf %692, %693 : vector<1x32xf32>
    %695 = vector.extract_strided_slice %678 {offsets = [0, 64], sizes = [1, 32], strides = [1, 1]} : vector<1x128xf32> to vector<1x32xf32>
    %696 = math.tanh %695 : vector<1x32xf32>
    %697 = vector.extract_strided_slice %678 {offsets = [0, 96], sizes = [1, 32], strides = [1, 1]} : vector<1x128xf32> to vector<1x32xf32>
    %698 = arith.negf %697 : vector<1x32xf32>
    %699 = math.exp %698 : vector<1x32xf32>
    %cst_159 = arith.constant 1.000000e+00 : f32
    %700 = vector.broadcast %cst_159 : f32 to vector<1x32xf32>
    %701 = arith.addf %700, %699 : vector<1x32xf32>
    %702 = arith.divf %700, %701 : vector<1x32xf32>
    %703 = arith.mulf %694, %640 : vector<1x32xf32>
    %704 = arith.mulf %688, %696 : vector<1x32xf32>
    %705 = arith.addf %703, %704 : vector<1x32xf32>
    %706 = math.tanh %705 : vector<1x32xf32>
    %707 = arith.mulf %702, %706 : vector<1x32xf32>
    %708 = vector.extract_strided_slice %682 {offsets = [0, 0], sizes = [1, 32], strides = [1, 1]} : vector<1x128xf32> to vector<1x32xf32>
    %709 = arith.negf %708 : vector<1x32xf32>
    %710 = math.exp %709 : vector<1x32xf32>
    %cst_160 = arith.constant 1.000000e+00 : f32
    %711 = vector.broadcast %cst_160 : f32 to vector<1x32xf32>
    %712 = arith.addf %711, %710 : vector<1x32xf32>
    %713 = arith.divf %711, %712 : vector<1x32xf32>
    %714 = vector.extract_strided_slice %682 {offsets = [0, 32], sizes = [1, 32], strides = [1, 1]} : vector<1x128xf32> to vector<1x32xf32>
    %715 = arith.negf %714 : vector<1x32xf32>
    %716 = math.exp %715 : vector<1x32xf32>
    %cst_161 = arith.constant 1.000000e+00 : f32
    %717 = vector.broadcast %cst_161 : f32 to vector<1x32xf32>
    %718 = arith.addf %717, %716 : vector<1x32xf32>
    %719 = arith.divf %717, %718 : vector<1x32xf32>
    %720 = vector.extract_strided_slice %682 {offsets = [0, 64], sizes = [1, 32], strides = [1, 1]} : vector<1x128xf32> to vector<1x32xf32>
    %721 = math.tanh %720 : vector<1x32xf32>
    %722 = vector.extract_strided_slice %682 {offsets = [0, 96], sizes = [1, 32], strides = [1, 1]} : vector<1x128xf32> to vector<1x32xf32>
    %723 = arith.negf %722 : vector<1x32xf32>
    %724 = math.exp %723 : vector<1x32xf32>
    %cst_162 = arith.constant 1.000000e+00 : f32
    %725 = vector.broadcast %cst_162 : f32 to vector<1x32xf32>
    %726 = arith.addf %725, %724 : vector<1x32xf32>
    %727 = arith.divf %725, %726 : vector<1x32xf32>
    %728 = arith.mulf %719, %665 : vector<1x32xf32>
    %729 = arith.mulf %713, %721 : vector<1x32xf32>
    %730 = arith.addf %728, %729 : vector<1x32xf32>
    %731 = math.tanh %730 : vector<1x32xf32>
    %732 = arith.mulf %727, %731 : vector<1x32xf32>
    %733 = arith.index_cast %c2_i32_152 : i32 to index
    %c0_163 = arith.constant 0 : index
    %734 = vector.load %arg18[%733, %c0_163] : memref<8x64xf32, #tpu.memory_space<vmem>>, vector<1x32xf32>
    tpu.vector_store %arg18[%733, %c0_163], %707 {strides = array<i32>} : memref<8x64xf32, #tpu.memory_space<vmem>>, vector<1x32xf32>,
    %735 = arith.index_cast %674 : i32 to index
    %c32_164 = arith.constant 32 : index
    %736 = vector.load %arg18[%735, %c32_164] : memref<8x64xf32, #tpu.memory_space<vmem>>, vector<1x32xf32>
    tpu.vector_store %arg18[%735, %c32_164], %732 {strides = array<i32>} : memref<8x64xf32, #tpu.memory_space<vmem>>, vector<1x32xf32>,
    %737 = tpu.concatenate %707, %732 in 1 : vector<1x32xf32>, vector<1x32xf32> -> vector<1x64xf32>
    %c3_i32_165 = arith.constant 3 : i32
    %cst_166 = arith.constant dense<0.000000e+00> : vector<1x256xf32>
    %738 = tpu.matmul %737, %539, %cst_166 {dimension_numbers = #tpu.dot_dimension_numbers<[1], [0], [0], [1], [0, 0, 1, 1], [], []>} : vector<1x64xf32>, vector<64x256xf32>, vector<1x256xf32> -> vector<1x256xf32>
    %c7_i32_167 = arith.constant 7 : i32
    %739 = arith.subi %c7_i32_167, %c3_i32_165 : i32
    %740 = arith.index_cast %c3_i32_165 : i32 to index
    %c0_168 = arith.constant 0 : index
    %741 = vector.load %arg16[%740, %c0_168] : memref<8x256xf32, #tpu.memory_space<vmem>>, vector<1x128xf32>
    %742 = vector.extract_strided_slice %738 {offsets = [0, 0], sizes = [1, 128], strides = [1, 1]} : vector<1x256xf32> to vector<1x128xf32>
    %743 = arith.addf %741, %742 : vector<1x128xf32>
    %744 = arith.index_cast %739 : i32 to index
    %c128_169 = arith.constant 128 : index
    %745 = vector.load %arg16[%744, %c128_169] : memref<8x256xf32, #tpu.memory_space<vmem>>, vector<1x128xf32>
    %746 = vector.extract_strided_slice %738 {offsets = [0, 128], sizes = [1, 128], strides = [1, 1]} : vector<1x256xf32> to vector<1x128xf32>
    %747 = arith.addf %745, %746 : vector<1x128xf32>
    %748 = vector.extract_strided_slice %743 {offsets = [0, 0], sizes = [1, 32], strides = [1, 1]} : vector<1x128xf32> to vector<1x32xf32>
    %749 = arith.negf %748 : vector<1x32xf32>
    %750 = math.exp %749 : vector<1x32xf32>
    %cst_170 = arith.constant 1.000000e+00 : f32
    %751 = vector.broadcast %cst_170 : f32 to vector<1x32xf32>
    %752 = arith.addf %751, %750 : vector<1x32xf32>
    %753 = arith.divf %751, %752 : vector<1x32xf32>
    %754 = vector.extract_strided_slice %743 {offsets = [0, 32], sizes = [1, 32], strides = [1, 1]} : vector<1x128xf32> to vector<1x32xf32>
    %755 = arith.negf %754 : vector<1x32xf32>
    %756 = math.exp %755 : vector<1x32xf32>
    %cst_171 = arith.constant 1.000000e+00 : f32
    %757 = vector.broadcast %cst_171 : f32 to vector<1x32xf32>
    %758 = arith.addf %757, %756 : vector<1x32xf32>
    %759 = arith.divf %757, %758 : vector<1x32xf32>
    %760 = vector.extract_strided_slice %743 {offsets = [0, 64], sizes = [1, 32], strides = [1, 1]} : vector<1x128xf32> to vector<1x32xf32>
    %761 = math.tanh %760 : vector<1x32xf32>
    %762 = vector.extract_strided_slice %743 {offsets = [0, 96], sizes = [1, 32], strides = [1, 1]} : vector<1x128xf32> to vector<1x32xf32>
    %763 = arith.negf %762 : vector<1x32xf32>
    %764 = math.exp %763 : vector<1x32xf32>
    %cst_172 = arith.constant 1.000000e+00 : f32
    %765 = vector.broadcast %cst_172 : f32 to vector<1x32xf32>
    %766 = arith.addf %765, %764 : vector<1x32xf32>
    %767 = arith.divf %765, %766 : vector<1x32xf32>
    %768 = arith.mulf %759, %705 : vector<1x32xf32>
    %769 = arith.mulf %753, %761 : vector<1x32xf32>
    %770 = arith.addf %768, %769 : vector<1x32xf32>
    %771 = math.tanh %770 : vector<1x32xf32>
    %772 = arith.mulf %767, %771 : vector<1x32xf32>
    %773 = vector.extract_strided_slice %747 {offsets = [0, 0], sizes = [1, 32], strides = [1, 1]} : vector<1x128xf32> to vector<1x32xf32>
    %774 = arith.negf %773 : vector<1x32xf32>
    %775 = math.exp %774 : vector<1x32xf32>
    %cst_173 = arith.constant 1.000000e+00 : f32
    %776 = vector.broadcast %cst_173 : f32 to vector<1x32xf32>
    %777 = arith.addf %776, %775 : vector<1x32xf32>
    %778 = arith.divf %776, %777 : vector<1x32xf32>
    %779 = vector.extract_strided_slice %747 {offsets = [0, 32], sizes = [1, 32], strides = [1, 1]} : vector<1x128xf32> to vector<1x32xf32>
    %780 = arith.negf %779 : vector<1x32xf32>
    %781 = math.exp %780 : vector<1x32xf32>
    %cst_174 = arith.constant 1.000000e+00 : f32
    %782 = vector.broadcast %cst_174 : f32 to vector<1x32xf32>
    %783 = arith.addf %782, %781 : vector<1x32xf32>
    %784 = arith.divf %782, %783 : vector<1x32xf32>
    %785 = vector.extract_strided_slice %747 {offsets = [0, 64], sizes = [1, 32], strides = [1, 1]} : vector<1x128xf32> to vector<1x32xf32>
    %786 = math.tanh %785 : vector<1x32xf32>
    %787 = vector.extract_strided_slice %747 {offsets = [0, 96], sizes = [1, 32], strides = [1, 1]} : vector<1x128xf32> to vector<1x32xf32>
    %788 = arith.negf %787 : vector<1x32xf32>
    %789 = math.exp %788 : vector<1x32xf32>
    %cst_175 = arith.constant 1.000000e+00 : f32
    %790 = vector.broadcast %cst_175 : f32 to vector<1x32xf32>
    %791 = arith.addf %790, %789 : vector<1x32xf32>
    %792 = arith.divf %790, %791 : vector<1x32xf32>
    %793 = arith.mulf %784, %730 : vector<1x32xf32>
    %794 = arith.mulf %778, %786 : vector<1x32xf32>
    %795 = arith.addf %793, %794 : vector<1x32xf32>
    %796 = math.tanh %795 : vector<1x32xf32>
    %797 = arith.mulf %792, %796 : vector<1x32xf32>
    %798 = arith.index_cast %c3_i32_165 : i32 to index
    %c0_176 = arith.constant 0 : index
    %799 = vector.load %arg18[%798, %c0_176] : memref<8x64xf32, #tpu.memory_space<vmem>>, vector<1x32xf32>
    tpu.vector_store %arg18[%798, %c0_176], %772 {strides = array<i32>} : memref<8x64xf32, #tpu.memory_space<vmem>>, vector<1x32xf32>,
    %800 = arith.index_cast %739 : i32 to index
    %c32_177 = arith.constant 32 : index
    %801 = vector.load %arg18[%800, %c32_177] : memref<8x64xf32, #tpu.memory_space<vmem>>, vector<1x32xf32>
    tpu.vector_store %arg18[%800, %c32_177], %797 {strides = array<i32>} : memref<8x64xf32, #tpu.memory_space<vmem>>, vector<1x32xf32>,
    %802 = tpu.concatenate %772, %797 in 1 : vector<1x32xf32>, vector<1x32xf32> -> vector<1x64xf32>
    %c4_i32_178 = arith.constant 4 : i32
    %cst_179 = arith.constant dense<0.000000e+00> : vector<1x256xf32>
    %803 = tpu.matmul %802, %539, %cst_179 {dimension_numbers = #tpu.dot_dimension_numbers<[1], [0], [0], [1], [0, 0, 1, 1], [], []>} : vector<1x64xf32>, vector<64x256xf32>, vector<1x256xf32> -> vector<1x256xf32>
    %c7_i32_180 = arith.constant 7 : i32
    %804 = arith.subi %c7_i32_180, %c4_i32_178 : i32
    %805 = arith.index_cast %c4_i32_178 : i32 to index
    %c0_181 = arith.constant 0 : index
    %806 = vector.load %arg16[%805, %c0_181] : memref<8x256xf32, #tpu.memory_space<vmem>>, vector<1x128xf32>
    %807 = vector.extract_strided_slice %803 {offsets = [0, 0], sizes = [1, 128], strides = [1, 1]} : vector<1x256xf32> to vector<1x128xf32>
    %808 = arith.addf %806, %807 : vector<1x128xf32>
    %809 = arith.index_cast %804 : i32 to index
    %c128_182 = arith.constant 128 : index
    %810 = vector.load %arg16[%809, %c128_182] : memref<8x256xf32, #tpu.memory_space<vmem>>, vector<1x128xf32>
    %811 = vector.extract_strided_slice %803 {offsets = [0, 128], sizes = [1, 128], strides = [1, 1]} : vector<1x256xf32> to vector<1x128xf32>
    %812 = arith.addf %810, %811 : vector<1x128xf32>
    %813 = vector.extract_strided_slice %808 {offsets = [0, 0], sizes = [1, 32], strides = [1, 1]} : vector<1x128xf32> to vector<1x32xf32>
    %814 = arith.negf %813 : vector<1x32xf32>
    %815 = math.exp %814 : vector<1x32xf32>
    %cst_183 = arith.constant 1.000000e+00 : f32
    %816 = vector.broadcast %cst_183 : f32 to vector<1x32xf32>
    %817 = arith.addf %816, %815 : vector<1x32xf32>
    %818 = arith.divf %816, %817 : vector<1x32xf32>
    %819 = vector.extract_strided_slice %808 {offsets = [0, 32], sizes = [1, 32], strides = [1, 1]} : vector<1x128xf32> to vector<1x32xf32>
    %820 = arith.negf %819 : vector<1x32xf32>
    %821 = math.exp %820 : vector<1x32xf32>
    %cst_184 = arith.constant 1.000000e+00 : f32
    %822 = vector.broadcast %cst_184 : f32 to vector<1x32xf32>
    %823 = arith.addf %822, %821 : vector<1x32xf32>
    %824 = arith.divf %822, %823 : vector<1x32xf32>
    %825 = vector.extract_strided_slice %808 {offsets = [0, 64], sizes = [1, 32], strides = [1, 1]} : vector<1x128xf32> to vector<1x32xf32>
    %826 = math.tanh %825 : vector<1x32xf32>
    %827 = vector.extract_strided_slice %808 {offsets = [0, 96], sizes = [1, 32], strides = [1, 1]} : vector<1x128xf32> to vector<1x32xf32>
    %828 = arith.negf %827 : vector<1x32xf32>
    %829 = math.exp %828 : vector<1x32xf32>
    %cst_185 = arith.constant 1.000000e+00 : f32
    %830 = vector.broadcast %cst_185 : f32 to vector<1x32xf32>
    %831 = arith.addf %830, %829 : vector<1x32xf32>
    %832 = arith.divf %830, %831 : vector<1x32xf32>
    %833 = arith.mulf %824, %770 : vector<1x32xf32>
    %834 = arith.mulf %818, %826 : vector<1x32xf32>
    %835 = arith.addf %833, %834 : vector<1x32xf32>
    %836 = math.tanh %835 : vector<1x32xf32>
    %837 = arith.mulf %832, %836 : vector<1x32xf32>
    %838 = vector.extract_strided_slice %812 {offsets = [0, 0], sizes = [1, 32], strides = [1, 1]} : vector<1x128xf32> to vector<1x32xf32>
    %839 = arith.negf %838 : vector<1x32xf32>
    %840 = math.exp %839 : vector<1x32xf32>
    %cst_186 = arith.constant 1.000000e+00 : f32
    %841 = vector.broadcast %cst_186 : f32 to vector<1x32xf32>
    %842 = arith.addf %841, %840 : vector<1x32xf32>
    %843 = arith.divf %841, %842 : vector<1x32xf32>
    %844 = vector.extract_strided_slice %812 {offsets = [0, 32], sizes = [1, 32], strides = [1, 1]} : vector<1x128xf32> to vector<1x32xf32>
    %845 = arith.negf %844 : vector<1x32xf32>
    %846 = math.exp %845 : vector<1x32xf32>
    %cst_187 = arith.constant 1.000000e+00 : f32
    %847 = vector.broadcast %cst_187 : f32 to vector<1x32xf32>
    %848 = arith.addf %847, %846 : vector<1x32xf32>
    %849 = arith.divf %847, %848 : vector<1x32xf32>
    %850 = vector.extract_strided_slice %812 {offsets = [0, 64], sizes = [1, 32], strides = [1, 1]} : vector<1x128xf32> to vector<1x32xf32>
    %851 = math.tanh %850 : vector<1x32xf32>
    %852 = vector.extract_strided_slice %812 {offsets = [0, 96], sizes = [1, 32], strides = [1, 1]} : vector<1x128xf32> to vector<1x32xf32>
    %853 = arith.negf %852 : vector<1x32xf32>
    %854 = math.exp %853 : vector<1x32xf32>
    %cst_188 = arith.constant 1.000000e+00 : f32
    %855 = vector.broadcast %cst_188 : f32 to vector<1x32xf32>
    %856 = arith.addf %855, %854 : vector<1x32xf32>
    %857 = arith.divf %855, %856 : vector<1x32xf32>
    %858 = arith.mulf %849, %795 : vector<1x32xf32>
    %859 = arith.mulf %843, %851 : vector<1x32xf32>
    %860 = arith.addf %858, %859 : vector<1x32xf32>
    %861 = math.tanh %860 : vector<1x32xf32>
    %862 = arith.mulf %857, %861 : vector<1x32xf32>
    %863 = arith.index_cast %c4_i32_178 : i32 to index
    %c0_189 = arith.constant 0 : index
    %864 = vector.load %arg18[%863, %c0_189] : memref<8x64xf32, #tpu.memory_space<vmem>>, vector<1x32xf32>
    tpu.vector_store %arg18[%863, %c0_189], %837 {strides = array<i32>} : memref<8x64xf32, #tpu.memory_space<vmem>>, vector<1x32xf32>,
    %865 = arith.index_cast %804 : i32 to index
    %c32_190 = arith.constant 32 : index
    %866 = vector.load %arg18[%865, %c32_190] : memref<8x64xf32, #tpu.memory_space<vmem>>, vector<1x32xf32>
    tpu.vector_store %arg18[%865, %c32_190], %862 {strides = array<i32>} : memref<8x64xf32, #tpu.memory_space<vmem>>, vector<1x32xf32>,
    %867 = tpu.concatenate %837, %862 in 1 : vector<1x32xf32>, vector<1x32xf32> -> vector<1x64xf32>
    %c5_i32_191 = arith.constant 5 : i32
    %cst_192 = arith.constant dense<0.000000e+00> : vector<1x256xf32>
    %868 = tpu.matmul %867, %539, %cst_192 {dimension_numbers = #tpu.dot_dimension_numbers<[1], [0], [0], [1], [0, 0, 1, 1], [], []>} : vector<1x64xf32>, vector<64x256xf32>, vector<1x256xf32> -> vector<1x256xf32>
    %c7_i32_193 = arith.constant 7 : i32
    %869 = arith.subi %c7_i32_193, %c5_i32_191 : i32
    %870 = arith.index_cast %c5_i32_191 : i32 to index
    %c0_194 = arith.constant 0 : index
    %871 = vector.load %arg16[%870, %c0_194] : memref<8x256xf32, #tpu.memory_space<vmem>>, vector<1x128xf32>
    %872 = vector.extract_strided_slice %868 {offsets = [0, 0], sizes = [1, 128], strides = [1, 1]} : vector<1x256xf32> to vector<1x128xf32>
    %873 = arith.addf %871, %872 : vector<1x128xf32>
    %874 = arith.index_cast %869 : i32 to index
    %c128_195 = arith.constant 128 : index
    %875 = vector.load %arg16[%874, %c128_195] : memref<8x256xf32, #tpu.memory_space<vmem>>, vector<1x128xf32>
    %876 = vector.extract_strided_slice %868 {offsets = [0, 128], sizes = [1, 128], strides = [1, 1]} : vector<1x256xf32> to vector<1x128xf32>
    %877 = arith.addf %875, %876 : vector<1x128xf32>
    %878 = vector.extract_strided_slice %873 {offsets = [0, 0], sizes = [1, 32], strides = [1, 1]} : vector<1x128xf32> to vector<1x32xf32>
    %879 = arith.negf %878 : vector<1x32xf32>
    %880 = math.exp %879 : vector<1x32xf32>
    %cst_196 = arith.constant 1.000000e+00 : f32
    %881 = vector.broadcast %cst_196 : f32 to vector<1x32xf32>
    %882 = arith.addf %881, %880 : vector<1x32xf32>
    %883 = arith.divf %881, %882 : vector<1x32xf32>
    %884 = vector.extract_strided_slice %873 {offsets = [0, 32], sizes = [1, 32], strides = [1, 1]} : vector<1x128xf32> to vector<1x32xf32>
    %885 = arith.negf %884 : vector<1x32xf32>
    %886 = math.exp %885 : vector<1x32xf32>
    %cst_197 = arith.constant 1.000000e+00 : f32
    %887 = vector.broadcast %cst_197 : f32 to vector<1x32xf32>
    %888 = arith.addf %887, %886 : vector<1x32xf32>
    %889 = arith.divf %887, %888 : vector<1x32xf32>
    %890 = vector.extract_strided_slice %873 {offsets = [0, 64], sizes = [1, 32], strides = [1, 1]} : vector<1x128xf32> to vector<1x32xf32>
    %891 = math.tanh %890 : vector<1x32xf32>
    %892 = vector.extract_strided_slice %873 {offsets = [0, 96], sizes = [1, 32], strides = [1, 1]} : vector<1x128xf32> to vector<1x32xf32>
    %893 = arith.negf %892 : vector<1x32xf32>
    %894 = math.exp %893 : vector<1x32xf32>
    %cst_198 = arith.constant 1.000000e+00 : f32
    %895 = vector.broadcast %cst_198 : f32 to vector<1x32xf32>
    %896 = arith.addf %895, %894 : vector<1x32xf32>
    %897 = arith.divf %895, %896 : vector<1x32xf32>
    %898 = arith.mulf %889, %835 : vector<1x32xf32>
    %899 = arith.mulf %883, %891 : vector<1x32xf32>
    %900 = arith.addf %898, %899 : vector<1x32xf32>
    %901 = math.tanh %900 : vector<1x32xf32>
    %902 = arith.mulf %897, %901 : vector<1x32xf32>
    %903 = vector.extract_strided_slice %877 {offsets = [0, 0], sizes = [1, 32], strides = [1, 1]} : vector<1x128xf32> to vector<1x32xf32>
    %904 = arith.negf %903 : vector<1x32xf32>
    %905 = math.exp %904 : vector<1x32xf32>
    %cst_199 = arith.constant 1.000000e+00 : f32
    %906 = vector.broadcast %cst_199 : f32 to vector<1x32xf32>
    %907 = arith.addf %906, %905 : vector<1x32xf32>
    %908 = arith.divf %906, %907 : vector<1x32xf32>
    %909 = vector.extract_strided_slice %877 {offsets = [0, 32], sizes = [1, 32], strides = [1, 1]} : vector<1x128xf32> to vector<1x32xf32>
    %910 = arith.negf %909 : vector<1x32xf32>
    %911 = math.exp %910 : vector<1x32xf32>
    %cst_200 = arith.constant 1.000000e+00 : f32
    %912 = vector.broadcast %cst_200 : f32 to vector<1x32xf32>
    %913 = arith.addf %912, %911 : vector<1x32xf32>
    %914 = arith.divf %912, %913 : vector<1x32xf32>
    %915 = vector.extract_strided_slice %877 {offsets = [0, 64], sizes = [1, 32], strides = [1, 1]} : vector<1x128xf32> to vector<1x32xf32>
    %916 = math.tanh %915 : vector<1x32xf32>
    %917 = vector.extract_strided_slice %877 {offsets = [0, 96], sizes = [1, 32], strides = [1, 1]} : vector<1x128xf32> to vector<1x32xf32>
    %918 = arith.negf %917 : vector<1x32xf32>
    %919 = math.exp %918 : vector<1x32xf32>
    %cst_201 = arith.constant 1.000000e+00 : f32
    %920 = vector.broadcast %cst_201 : f32 to vector<1x32xf32>
    %921 = arith.addf %920, %919 : vector<1x32xf32>
    %922 = arith.divf %920, %921 : vector<1x32xf32>
    %923 = arith.mulf %914, %860 : vector<1x32xf32>
    %924 = arith.mulf %908, %916 : vector<1x32xf32>
    %925 = arith.addf %923, %924 : vector<1x32xf32>
    %926 = math.tanh %925 : vector<1x32xf32>
    %927 = arith.mulf %922, %926 : vector<1x32xf32>
    %928 = arith.index_cast %c5_i32_191 : i32 to index
    %c0_202 = arith.constant 0 : index
    %929 = vector.load %arg18[%928, %c0_202] : memref<8x64xf32, #tpu.memory_space<vmem>>, vector<1x32xf32>
    tpu.vector_store %arg18[%928, %c0_202], %902 {strides = array<i32>} : memref<8x64xf32, #tpu.memory_space<vmem>>, vector<1x32xf32>,
    %930 = arith.index_cast %869 : i32 to index
    %c32_203 = arith.constant 32 : index
    %931 = vector.load %arg18[%930, %c32_203] : memref<8x64xf32, #tpu.memory_space<vmem>>, vector<1x32xf32>
    tpu.vector_store %arg18[%930, %c32_203], %927 {strides = array<i32>} : memref<8x64xf32, #tpu.memory_space<vmem>>, vector<1x32xf32>,
    %932 = tpu.concatenate %902, %927 in 1 : vector<1x32xf32>, vector<1x32xf32> -> vector<1x64xf32>
    %c6_i32_204 = arith.constant 6 : i32
    %cst_205 = arith.constant dense<0.000000e+00> : vector<1x256xf32>
    %933 = tpu.matmul %932, %539, %cst_205 {dimension_numbers = #tpu.dot_dimension_numbers<[1], [0], [0], [1], [0, 0, 1, 1], [], []>} : vector<1x64xf32>, vector<64x256xf32>, vector<1x256xf32> -> vector<1x256xf32>
    %c7_i32_206 = arith.constant 7 : i32
    %934 = arith.subi %c7_i32_206, %c6_i32_204 : i32
    %935 = arith.index_cast %c6_i32_204 : i32 to index
    %c0_207 = arith.constant 0 : index
    %936 = vector.load %arg16[%935, %c0_207] : memref<8x256xf32, #tpu.memory_space<vmem>>, vector<1x128xf32>
    %937 = vector.extract_strided_slice %933 {offsets = [0, 0], sizes = [1, 128], strides = [1, 1]} : vector<1x256xf32> to vector<1x128xf32>
    %938 = arith.addf %936, %937 : vector<1x128xf32>
    %939 = arith.index_cast %934 : i32 to index
    %c128_208 = arith.constant 128 : index
    %940 = vector.load %arg16[%939, %c128_208] : memref<8x256xf32, #tpu.memory_space<vmem>>, vector<1x128xf32>
    %941 = vector.extract_strided_slice %933 {offsets = [0, 128], sizes = [1, 128], strides = [1, 1]} : vector<1x256xf32> to vector<1x128xf32>
    %942 = arith.addf %940, %941 : vector<1x128xf32>
    %943 = vector.extract_strided_slice %938 {offsets = [0, 0], sizes = [1, 32], strides = [1, 1]} : vector<1x128xf32> to vector<1x32xf32>
    %944 = arith.negf %943 : vector<1x32xf32>
    %945 = math.exp %944 : vector<1x32xf32>
    %cst_209 = arith.constant 1.000000e+00 : f32
    %946 = vector.broadcast %cst_209 : f32 to vector<1x32xf32>
    %947 = arith.addf %946, %945 : vector<1x32xf32>
    %948 = arith.divf %946, %947 : vector<1x32xf32>
    %949 = vector.extract_strided_slice %938 {offsets = [0, 32], sizes = [1, 32], strides = [1, 1]} : vector<1x128xf32> to vector<1x32xf32>
    %950 = arith.negf %949 : vector<1x32xf32>
    %951 = math.exp %950 : vector<1x32xf32>
    %cst_210 = arith.constant 1.000000e+00 : f32
    %952 = vector.broadcast %cst_210 : f32 to vector<1x32xf32>
    %953 = arith.addf %952, %951 : vector<1x32xf32>
    %954 = arith.divf %952, %953 : vector<1x32xf32>
    %955 = vector.extract_strided_slice %938 {offsets = [0, 64], sizes = [1, 32], strides = [1, 1]} : vector<1x128xf32> to vector<1x32xf32>
    %956 = math.tanh %955 : vector<1x32xf32>
    %957 = vector.extract_strided_slice %938 {offsets = [0, 96], sizes = [1, 32], strides = [1, 1]} : vector<1x128xf32> to vector<1x32xf32>
    %958 = arith.negf %957 : vector<1x32xf32>
    %959 = math.exp %958 : vector<1x32xf32>
    %cst_211 = arith.constant 1.000000e+00 : f32
    %960 = vector.broadcast %cst_211 : f32 to vector<1x32xf32>
    %961 = arith.addf %960, %959 : vector<1x32xf32>
    %962 = arith.divf %960, %961 : vector<1x32xf32>
    %963 = arith.mulf %954, %900 : vector<1x32xf32>
    %964 = arith.mulf %948, %956 : vector<1x32xf32>
    %965 = arith.addf %963, %964 : vector<1x32xf32>
    %966 = math.tanh %965 : vector<1x32xf32>
    %967 = arith.mulf %962, %966 : vector<1x32xf32>
    %968 = vector.extract_strided_slice %942 {offsets = [0, 0], sizes = [1, 32], strides = [1, 1]} : vector<1x128xf32> to vector<1x32xf32>
    %969 = arith.negf %968 : vector<1x32xf32>
    %970 = math.exp %969 : vector<1x32xf32>
    %cst_212 = arith.constant 1.000000e+00 : f32
    %971 = vector.broadcast %cst_212 : f32 to vector<1x32xf32>
    %972 = arith.addf %971, %970 : vector<1x32xf32>
    %973 = arith.divf %971, %972 : vector<1x32xf32>
    %974 = vector.extract_strided_slice %942 {offsets = [0, 32], sizes = [1, 32], strides = [1, 1]} : vector<1x128xf32> to vector<1x32xf32>
    %975 = arith.negf %974 : vector<1x32xf32>
    %976 = math.exp %975 : vector<1x32xf32>
    %cst_213 = arith.constant 1.000000e+00 : f32
    %977 = vector.broadcast %cst_213 : f32 to vector<1x32xf32>
    %978 = arith.addf %977, %976 : vector<1x32xf32>
    %979 = arith.divf %977, %978 : vector<1x32xf32>
    %980 = vector.extract_strided_slice %942 {offsets = [0, 64], sizes = [1, 32], strides = [1, 1]} : vector<1x128xf32> to vector<1x32xf32>
    %981 = math.tanh %980 : vector<1x32xf32>
    %982 = vector.extract_strided_slice %942 {offsets = [0, 96], sizes = [1, 32], strides = [1, 1]} : vector<1x128xf32> to vector<1x32xf32>
    %983 = arith.negf %982 : vector<1x32xf32>
    %984 = math.exp %983 : vector<1x32xf32>
    %cst_214 = arith.constant 1.000000e+00 : f32
    %985 = vector.broadcast %cst_214 : f32 to vector<1x32xf32>
    %986 = arith.addf %985, %984 : vector<1x32xf32>
    %987 = arith.divf %985, %986 : vector<1x32xf32>
    %988 = arith.mulf %979, %925 : vector<1x32xf32>
    %989 = arith.mulf %973, %981 : vector<1x32xf32>
    %990 = arith.addf %988, %989 : vector<1x32xf32>
    %991 = math.tanh %990 : vector<1x32xf32>
    %992 = arith.mulf %987, %991 : vector<1x32xf32>
    %993 = arith.index_cast %c6_i32_204 : i32 to index
    %c0_215 = arith.constant 0 : index
    %994 = vector.load %arg18[%993, %c0_215] : memref<8x64xf32, #tpu.memory_space<vmem>>, vector<1x32xf32>
    tpu.vector_store %arg18[%993, %c0_215], %967 {strides = array<i32>} : memref<8x64xf32, #tpu.memory_space<vmem>>, vector<1x32xf32>,
    %995 = arith.index_cast %934 : i32 to index
    %c32_216 = arith.constant 32 : index
    %996 = vector.load %arg18[%995, %c32_216] : memref<8x64xf32, #tpu.memory_space<vmem>>, vector<1x32xf32>
    tpu.vector_store %arg18[%995, %c32_216], %992 {strides = array<i32>} : memref<8x64xf32, #tpu.memory_space<vmem>>, vector<1x32xf32>,
    %997 = tpu.concatenate %967, %992 in 1 : vector<1x32xf32>, vector<1x32xf32> -> vector<1x64xf32>
    %c7_i32_217 = arith.constant 7 : i32
    %cst_218 = arith.constant dense<0.000000e+00> : vector<1x256xf32>
    %998 = tpu.matmul %997, %539, %cst_218 {dimension_numbers = #tpu.dot_dimension_numbers<[1], [0], [0], [1], [0, 0, 1, 1], [], []>} : vector<1x64xf32>, vector<64x256xf32>, vector<1x256xf32> -> vector<1x256xf32>
    %c7_i32_219 = arith.constant 7 : i32
    %999 = arith.subi %c7_i32_219, %c7_i32_217 : i32
    %1000 = arith.index_cast %c7_i32_217 : i32 to index
    %c0_220 = arith.constant 0 : index
    %1001 = vector.load %arg16[%1000, %c0_220] : memref<8x256xf32, #tpu.memory_space<vmem>>, vector<1x128xf32>
    %1002 = vector.extract_strided_slice %998 {offsets = [0, 0], sizes = [1, 128], strides = [1, 1]} : vector<1x256xf32> to vector<1x128xf32>
    %1003 = arith.addf %1001, %1002 : vector<1x128xf32>
    %1004 = arith.index_cast %999 : i32 to index
    %c128_221 = arith.constant 128 : index
    %1005 = vector.load %arg16[%1004, %c128_221] : memref<8x256xf32, #tpu.memory_space<vmem>>, vector<1x128xf32>
    %1006 = vector.extract_strided_slice %998 {offsets = [0, 128], sizes = [1, 128], strides = [1, 1]} : vector<1x256xf32> to vector<1x128xf32>
    %1007 = arith.addf %1005, %1006 : vector<1x128xf32>
    %1008 = vector.extract_strided_slice %1003 {offsets = [0, 0], sizes = [1, 32], strides = [1, 1]} : vector<1x128xf32> to vector<1x32xf32>
    %1009 = arith.negf %1008 : vector<1x32xf32>
    %1010 = math.exp %1009 : vector<1x32xf32>
    %cst_222 = arith.constant 1.000000e+00 : f32
    %1011 = vector.broadcast %cst_222 : f32 to vector<1x32xf32>
    %1012 = arith.addf %1011, %1010 : vector<1x32xf32>
    %1013 = arith.divf %1011, %1012 : vector<1x32xf32>
    %1014 = vector.extract_strided_slice %1003 {offsets = [0, 32], sizes = [1, 32], strides = [1, 1]} : vector<1x128xf32> to vector<1x32xf32>
    %1015 = arith.negf %1014 : vector<1x32xf32>
    %1016 = math.exp %1015 : vector<1x32xf32>
    %cst_223 = arith.constant 1.000000e+00 : f32
    %1017 = vector.broadcast %cst_223 : f32 to vector<1x32xf32>
    %1018 = arith.addf %1017, %1016 : vector<1x32xf32>
    %1019 = arith.divf %1017, %1018 : vector<1x32xf32>
    %1020 = vector.extract_strided_slice %1003 {offsets = [0, 64], sizes = [1, 32], strides = [1, 1]} : vector<1x128xf32> to vector<1x32xf32>
    %1021 = math.tanh %1020 : vector<1x32xf32>
    %1022 = vector.extract_strided_slice %1003 {offsets = [0, 96], sizes = [1, 32], strides = [1, 1]} : vector<1x128xf32> to vector<1x32xf32>
    %1023 = arith.negf %1022 : vector<1x32xf32>
    %1024 = math.exp %1023 : vector<1x32xf32>
    %cst_224 = arith.constant 1.000000e+00 : f32
    %1025 = vector.broadcast %cst_224 : f32 to vector<1x32xf32>
    %1026 = arith.addf %1025, %1024 : vector<1x32xf32>
    %1027 = arith.divf %1025, %1026 : vector<1x32xf32>
    %1028 = arith.mulf %1019, %965 : vector<1x32xf32>
    %1029 = arith.mulf %1013, %1021 : vector<1x32xf32>
    %1030 = arith.addf %1028, %1029 : vector<1x32xf32>
    %1031 = math.tanh %1030 : vector<1x32xf32>
    %1032 = arith.mulf %1027, %1031 : vector<1x32xf32>
    %1033 = vector.extract_strided_slice %1007 {offsets = [0, 0], sizes = [1, 32], strides = [1, 1]} : vector<1x128xf32> to vector<1x32xf32>
    %1034 = arith.negf %1033 : vector<1x32xf32>
    %1035 = math.exp %1034 : vector<1x32xf32>
    %cst_225 = arith.constant 1.000000e+00 : f32
    %1036 = vector.broadcast %cst_225 : f32 to vector<1x32xf32>
    %1037 = arith.addf %1036, %1035 : vector<1x32xf32>
    %1038 = arith.divf %1036, %1037 : vector<1x32xf32>
    %1039 = vector.extract_strided_slice %1007 {offsets = [0, 32], sizes = [1, 32], strides = [1, 1]} : vector<1x128xf32> to vector<1x32xf32>
    %1040 = arith.negf %1039 : vector<1x32xf32>
    %1041 = math.exp %1040 : vector<1x32xf32>
    %cst_226 = arith.constant 1.000000e+00 : f32
    %1042 = vector.broadcast %cst_226 : f32 to vector<1x32xf32>
    %1043 = arith.addf %1042, %1041 : vector<1x32xf32>
    %1044 = arith.divf %1042, %1043 : vector<1x32xf32>
    %1045 = vector.extract_strided_slice %1007 {offsets = [0, 64], sizes = [1, 32], strides = [1, 1]} : vector<1x128xf32> to vector<1x32xf32>
    %1046 = math.tanh %1045 : vector<1x32xf32>
    %1047 = vector.extract_strided_slice %1007 {offsets = [0, 96], sizes = [1, 32], strides = [1, 1]} : vector<1x128xf32> to vector<1x32xf32>
    %1048 = arith.negf %1047 : vector<1x32xf32>
    %1049 = math.exp %1048 : vector<1x32xf32>
    %cst_227 = arith.constant 1.000000e+00 : f32
    %1050 = vector.broadcast %cst_227 : f32 to vector<1x32xf32>
    %1051 = arith.addf %1050, %1049 : vector<1x32xf32>
    %1052 = arith.divf %1050, %1051 : vector<1x32xf32>
    %1053 = arith.mulf %1044, %990 : vector<1x32xf32>
    %1054 = arith.mulf %1038, %1046 : vector<1x32xf32>
    %1055 = arith.addf %1053, %1054 : vector<1x32xf32>
    %1056 = math.tanh %1055 : vector<1x32xf32>
    %1057 = arith.mulf %1052, %1056 : vector<1x32xf32>
    %1058 = arith.index_cast %c7_i32_217 : i32 to index
    %c0_228 = arith.constant 0 : index
    %1059 = vector.load %arg18[%1058, %c0_228] : memref<8x64xf32, #tpu.memory_space<vmem>>, vector<1x32xf32>
    tpu.vector_store %arg18[%1058, %c0_228], %1032 {strides = array<i32>} : memref<8x64xf32, #tpu.memory_space<vmem>>, vector<1x32xf32>,
    %1060 = arith.index_cast %999 : i32 to index
    %c32_229 = arith.constant 32 : index
    %1061 = vector.load %arg18[%1060, %c32_229] : memref<8x64xf32, #tpu.memory_space<vmem>>, vector<1x32xf32>
    tpu.vector_store %arg18[%1060, %c32_229], %1057 {strides = array<i32>} : memref<8x64xf32, #tpu.memory_space<vmem>>, vector<1x32xf32>,
    %1062 = tpu.concatenate %1032, %1057 in 1 : vector<1x32xf32>, vector<1x32xf32> -> vector<1x64xf32>
    %c8_i32_230 = arith.constant 8 : i32
    %c0_231 = arith.constant 0 : index
    %c0_232 = arith.constant 0 : index
    %1063 = vector.load %arg18[%c0_231, %c0_232] : memref<8x64xf32, #tpu.memory_space<vmem>>, vector<8x64xf32>
    %c0_233 = arith.constant 0 : index
    %c0_234 = arith.constant 0 : index
    %1064 = vector.load %arg10[%c0_233, %c0_234] : memref<64x64xf32, #tpu.memory_space<vmem>>, vector<64x64xf32>
    %cst_235 = arith.constant dense<0.000000e+00> : vector<8x64xf32>
    %1065 = tpu.matmul %1063, %1064, %cst_235 {dimension_numbers = #tpu.dot_dimension_numbers<[1], [0], [0], [1], [0, 0, 1, 1], [], []>} : vector<8x64xf32>, vector<64x64xf32>, vector<8x64xf32> -> vector<8x64xf32>
    %cst_236 = arith.constant dense<0.000000e+00> : vector<8x8xf32>
    %1066 = tpu.matmul %1065, %1063, %cst_236 {dimension_numbers = #tpu.dot_dimension_numbers<[1], [1], [0], [0], [0, 0, 1, 0], [], []>} : vector<8x64xf32>, vector<8x64xf32>, vector<8x8xf32> -> vector<8x8xf32>
    %cst_237 = arith.constant dense<0xFF800000> : vector<8xf32>
    %1067 = vector.multi_reduction <maximumf>, %1066, %cst_237 [1] : vector<8x8xf32> to vector<8xf32>
    %1068 = vector.shape_cast %1067 : vector<8xf32> to vector<8x1xf32>
    %1069 = vector.broadcast %1068 : vector<8x1xf32> to vector<8x8xf32>
    %1070 = arith.subf %1066, %1069 : vector<8x8xf32>
    %1071 = math.exp %1070 : vector<8x8xf32>
    %cst_238 = arith.constant dense<0.000000e+00> : vector<8xf32>
    %1072 = vector.multi_reduction <add>, %1071, %cst_238 [1] : vector<8x8xf32> to vector<8xf32>
    %1073 = vector.shape_cast %1072 : vector<8xf32> to vector<8x1xf32>
    %1074 = vector.broadcast %1073 : vector<8x1xf32> to vector<8x8xf32>
    %1075 = arith.divf %1071, %1074 : vector<8x8xf32>
    %cst_239 = arith.constant dense<0.000000e+00> : vector<8x64xf32>
    %1076 = tpu.matmul %1075, %1063, %cst_239 {dimension_numbers = #tpu.dot_dimension_numbers<[1], [0], [0], [1], [0, 0, 1, 1], [], []>} : vector<8x8xf32>, vector<8x64xf32>, vector<8x64xf32> -> vector<8x64xf32>
    %c0_240 = arith.constant 0 : index
    %c0_241 = arith.constant 0 : index
    %1077 = vector.load %arg11[%c0_240, %c0_241] : memref<64x64xf32, #tpu.memory_space<vmem>>, vector<64x64xf32>
    %c0_242 = arith.constant 0 : index
    %c0_243 = arith.constant 0 : index
    %1078 = vector.load %arg12[%c0_242, %c0_243] : memref<64x64xf32, #tpu.memory_space<vmem>>, vector<64x64xf32>
    %cst_244 = arith.constant dense<0.000000e+00> : vector<8x64xf32>
    %1079 = tpu.matmul %1063, %1077, %cst_244 {dimension_numbers = #tpu.dot_dimension_numbers<[1], [0], [0], [1], [0, 0, 1, 1], [], []>} : vector<8x64xf32>, vector<64x64xf32>, vector<8x64xf32> -> vector<8x64xf32>
    %cst_245 = arith.constant dense<0.000000e+00> : vector<8x64xf32>
    %1080 = tpu.matmul %1076, %1078, %cst_245 {dimension_numbers = #tpu.dot_dimension_numbers<[1], [0], [0], [1], [0, 0, 1, 1], [], []>} : vector<8x64xf32>, vector<64x64xf32>, vector<8x64xf32> -> vector<8x64xf32>
    %1081 = arith.addf %1079, %1080 : vector<8x64xf32>
    %1082 = math.tanh %1081 : vector<8x64xf32>
    %c0_246 = arith.constant 0 : index
    %c0_247 = arith.constant 0 : index
    %1083 = vector.load %arg13[%c0_246, %c0_247] : memref<64x128xf32, #tpu.memory_space<vmem>>, vector<64x128xf32>
    %cst_248 = arith.constant dense<0.000000e+00> : vector<8x128xf32>
    %1084 = tpu.matmul %1082, %1083, %cst_248 {dimension_numbers = #tpu.dot_dimension_numbers<[1], [0], [0], [1], [0, 0, 1, 1], [], []>} : vector<8x64xf32>, vector<64x128xf32>, vector<8x128xf32> -> vector<8x128xf32>
    %c0_249 = arith.constant 0 : index
    %c0_250 = arith.constant 0 : index
    %1085 = vector.load %arg14[%c0_249, %c0_250] : memref<1x128xf32, #tpu.memory_space<vmem>>, vector<1x128xf32>
    %1086 = vector.broadcast %1085 : vector<1x128xf32> to vector<8x128xf32>
    %1087 = arith.addf %1084, %1086 : vector<8x128xf32>
    %c0_251 = arith.constant 0 : index
    %c0_252 = arith.constant 0 : index
    %c0_253 = arith.constant 0 : index
    %1088 = vector.load %arg15[%c0_251, %c0_252, %c0_253] : memref<1x8x128xf32, #tpu.memory_space<vmem>>, vector<1x8x128xf32>
    %1089 = vector.shape_cast %1088 : vector<1x8x128xf32> to vector<8x128xf32>
    %1090 = vector.shape_cast %1087 : vector<8x128xf32> to vector<1x8x128xf32>
    tpu.vector_store %arg15[%c0_251, %c0_252, %c0_253], %1090 {strides = array<i32>} : memref<1x8x128xf32, #tpu.memory_space<vmem>>, vector<1x8x128xf32>,
    return
  }
  func.func @transform_0(%arg0: i32) -> (i32, i32, i32) {
    %c0_i32 = arith.constant 0 : i32
    %c0_i32_0 = arith.constant 0 : i32
    %c0_i32_1 = arith.constant 0 : i32
    return %arg0, %c0_i32, %c0_i32_0 : i32, i32, i32
  }
  func.func @transform_1(%arg0: i32) -> (i32, i32) {
    %c0_i32 = arith.constant 0 : i32
    %c0_i32_0 = arith.constant 0 : i32
    %c0_i32_1 = arith.constant 0 : i32
    return %c0_i32, %c0_i32_0 : i32, i32
  }
  func.func @transform_2(%arg0: i32) -> (i32, i32) {
    %c0_i32 = arith.constant 0 : i32
    %c0_i32_0 = arith.constant 0 : i32
    %c0_i32_1 = arith.constant 0 : i32
    return %c0_i32, %c0_i32_0 : i32, i32
  }
  func.func @transform_3(%arg0: i32) -> (i32, i32) {
    %c0_i32 = arith.constant 0 : i32
    %c0_i32_0 = arith.constant 0 : i32
    %c0_i32_1 = arith.constant 0 : i32
    return %c0_i32, %c0_i32_0 : i32, i32
  }
  func.func @transform_4(%arg0: i32) -> (i32, i32) {
    %c0_i32 = arith.constant 0 : i32
    %c0_i32_0 = arith.constant 0 : i32
    %c0_i32_1 = arith.constant 0 : i32
    return %c0_i32, %c0_i32_0 : i32, i32
  }
  func.func @transform_5(%arg0: i32) -> (i32, i32) {
    %c0_i32 = arith.constant 0 : i32
    %c0_i32_0 = arith.constant 0 : i32
    %c0_i32_1 = arith.constant 0 : i32
    return %c0_i32, %c0_i32_0 : i32, i32
  }
  func.func @transform_6(%arg0: i32) -> (i32, i32) {
    %c0_i32 = arith.constant 0 : i32
    %c0_i32_0 = arith.constant 0 : i32
    %c0_i32_1 = arith.constant 0 : i32
    return %c0_i32, %c0_i32_0 : i32, i32
  }
  func.func @transform_7(%arg0: i32) -> (i32, i32) {
    %c0_i32 = arith.constant 0 : i32
    %c0_i32_0 = arith.constant 0 : i32
    %c0_i32_1 = arith.constant 0 : i32
    return %c0_i32, %c0_i32_0 : i32, i32
  }
  func.func @transform_8(%arg0: i32) -> (i32, i32) {
    %c0_i32 = arith.constant 0 : i32
    %c0_i32_0 = arith.constant 0 : i32
    %c0_i32_1 = arith.constant 0 : i32
    return %c0_i32, %c0_i32_0 : i32, i32
  }
  func.func @transform_9(%arg0: i32) -> (i32, i32) {
    %c0_i32 = arith.constant 0 : i32
    %c0_i32_0 = arith.constant 0 : i32
    %c0_i32_1 = arith.constant 0 : i32
    return %c0_i32, %c0_i32_0 : i32, i32
  }
  func.func @transform_10(%arg0: i32) -> (i32, i32) {
    %c0_i32 = arith.constant 0 : i32
    %c0_i32_0 = arith.constant 0 : i32
    %c0_i32_1 = arith.constant 0 : i32
    return %c0_i32, %c0_i32_0 : i32, i32
  }
  func.func @transform_11(%arg0: i32) -> (i32, i32) {
    %c0_i32 = arith.constant 0 : i32
    %c0_i32_0 = arith.constant 0 : i32
    %c0_i32_1 = arith.constant 0 : i32
    return %c0_i32, %c0_i32_0 : i32, i32
  }
  func.func @transform_12(%arg0: i32) -> (i32, i32) {
    %c0_i32 = arith.constant 0 : i32
    %c0_i32_0 = arith.constant 0 : i32
    %c0_i32_1 = arith.constant 0 : i32
    return %c0_i32, %c0_i32_0 : i32, i32
  }
  func.func @transform_13(%arg0: i32) -> (i32, i32) {
    %c0_i32 = arith.constant 0 : i32
    %c0_i32_0 = arith.constant 0 : i32
    %c0_i32_1 = arith.constant 0 : i32
    return %c0_i32, %c0_i32_0 : i32, i32
  }
  func.func @transform_14(%arg0: i32) -> (i32, i32, i32) {
    %c0_i32 = arith.constant 0 : i32
    %c0_i32_0 = arith.constant 0 : i32
    %c0_i32_1 = arith.constant 0 : i32
    return %arg0, %c0_i32, %c0_i32_0 : i32, i32, i32
  }
}

</mosaic_0001>

<bundles_post_ra>
// kernel: forward.1
= control target key start
LH: loop header
LB: loop body
LE: loop exit
PB: predicated region body
PF: predicated region fallthrough
CT: control target
= control target key end

     0   :  { %s5773_s0 = inlined_call_operand.vmem [shape: f32[2,8,32], index: 0, kind: input, shape index: {}]   ;;  %s5774_s1 = inlined_call_operand.hbm [shape: f32[32,256], index: 1, kind: input, shape index: {}]   ;;  %s5775_s2 = inlined_call_operand.hbm [shape: f32[64,256], index: 2, kind: input, shape index: {}]   ;;  %s5776_s3 = inlined_call_operand.vmem [shape: f32[1,256], index: 3, kind: input, shape index: {}]   ;;  %s5777_s4 = inlined_call_operand.hbm [shape: f32[64,256], index: 4, kind: input, shape index: {}]   ;;  %s5778_s5 = inlined_call_operand.hbm [shape: f32[64,256], index: 5, kind: input, shape index: {}]   ;;  %s5779_s6 = inlined_call_operand.vmem [shape: f32[1,256], index: 6, kind: input, shape index: {}]   ;;  %s5780_s7 = inlined_call_operand.hbm [shape: f32[2,64], index: 7, kind: input, shape index: {}]   ;;  %s5781_s8 = inlined_call_operand.hbm [shape: f32[2,64], index: 8, kind: input, shape index: {}]   ;;  %s5782_s9 = inlined_call_operand.hbm [shape: f32[64,64], index: 9, kind: input, shape index: {}]   ;;  %s5783_s10 = inlined_call_operand.hbm [shape: f32[64,64], index: 10, kind: input, shape index: {}]   ;;  %s5784_s11 = inlined_call_operand.hbm [shape: f32[64,64], index: 11, kind: input, shape index: {}]   ;;  %s5785_s12 = inlined_call_operand.hbm [shape: f32[64,128], index: 12, kind: input, shape index: {}]   ;;  %s5786_s13 = inlined_call_operand.hbm [shape: f32[1,128], index: 13, kind: input, shape index: {}]   ;;  %s5787_s14 = inlined_call_operand.hbm [shape: f32[2,8,128], index: 14, kind: output, shape index: {}]  }
   0x1   :  { %5805 = sst [smem:[#allocation37_spill]] %s5775_s2 }
   0x2   :  { %19 = vsyncpa [#allocation6], 0 }
   0x3   :  { %20 = vsyncpa [#allocation9], 0 }
   0x4   :  { %21 = vsyncpa [#allocation12], 0 }
   0x5   :  { %22 = vsyncpa [#allocation15], 0 }
   0x6   :  { %23 = vsyncpa [#allocation18], 0 }
   0x7   :  { %24 = vsyncpa [#allocation21], 0 }
   0x8   :  { %25 = vsyncpa [#allocation7], 0 }
   0x9   :  { %27 = vsyncpa [#allocation7 + $0x1], 0  ;;  %s4829_s29 = smov 0   ;;  %s4831_s30 = smov 0  }
   0xa   :  { %s4833_s15 = smov 0   ;;  %s4835_s16 = smov 0  }
   0xb LB: > { %5806 = sst [smem:[#allocation31_spill]] %s4720_s29  ;;  %s4850_s17 = sadd.s32 4294967295, %s4732_s16   ;;  %s4732_s16 = sphi %s4835_s16, %s5840_s16   ;;  %s4728_s15 = sphi %s4833_s15, %s5842_s15   ;;  %s4724_s30 = sphi %s4831_s30, %s5844_s30   ;;  %s4720_s29 = sphi %s4829_s29, %s5843_s29  }
   0xc   : > { %5807 = sst [smem:[#allocation32_spill]] %s4728_s15  ;;  %s3726_s18 = sadd.s32 4294967294, %s4732_s16  }
   0xd   : > { %5808 = sst [smem:[#allocation33_spill]] %s4732_s16  ;;  %s4854_s19 = sadd.s32 1, %s4732_s16  }
   0xe   : > { %5809 = sst [smem:[#allocation34_spill]] %s4854_s19  ;;  %s339_s20 = sadd.s32 1, %s4728_s15 }
   0xf   : > { %s336_s21 = ssub.s32 %s4732_s16, %s4854_s19  ;;  %p349_p0 = scmp.ne.s32.totalorder %s4728_s15, %s4724_s30 }
  0x10   : > { %p337_p1 = scmp.eq.s32.totalorder %s336_s21, 0  ;;  %p350_p2 = scmp.eq.s32.totalorder %s4850_s17, 1 }
  0x11   : > { %p355_p3 = scmp.ne.s32.totalorder %s4724_s30, %s4720_s29  ;;  %p356_p4 = scmp.eq.s32.totalorder %s3726_s18, 1 }
  0x12   : > { %s4865_s22 = scalar_select %p337_p1, %s4728_s15, %s339_s20  }
  0x13   : > { %p4867_p5 = por %p350_p2, %p349_p0  ;;  %p4871_p6 = por %p356_p4, %p355_p3 }
  0x14   : > { %5810 = sst [smem:[#allocation35_spill]] %s4865_s22  ;;  %p3727_p7 = scmp.ge.s32.totalorder %s4732_s16, 1 }
  0x15   : > { %s5811_s23 = scalar_select %p4867_p5, 1, 0 }
  0x16   : > { %s5812_s24 = scalar_select %p4871_p6, 1, 0 }
  0x17   : > { %p363_p8 = scmp.lt.s32.totalorder %s4732_s16, 3  ;;  %p5794_p9 = scmp.eq.s32.totalorder %s4850_s17, 0 }
  0x18   : > { %5813 = sst [smem:[#allocation36_spill]] %s5812_s24  ;;  %s4734_s26 = smov [#allocation8]  }
  0x19   : > { %p4878_p10 = pnand %p3727_p7, %p363_p8  ;;  %s388_s27 = sshll.u32 %s4734_s26, 4  ;;  %s389_s27 = int_to_ptr.vmem [resolvable:$true] %s388_s27 }
  0x1a   : > { %s4735_s18 = smov [#allocation11]   ;;  %s4736_s21 = smov [#allocation14]  }
  0x1b   : > { %s5814_s25 = scalar_select %p4878_p10, 1, 0 }
  0x1c   : > { %p3988_p11 = pneg %p4878_p10  ;;  %s417_s20 = sshll.u32 %s4735_s18, 4  ;;  %s418_s20 = int_to_ptr.vmem [resolvable:$true] %s417_s20 }
  0x1d   : > { %s445_s22 = sshll.u32 %s4736_s21, 4  ;;  %s4373_s19 = scalar_lea.vmem %s389_s27, 2048  ;;  %s446_s22 = int_to_ptr.vmem [resolvable:$true] %s445_s22 }
  0x1e   : > { %p4886_p12 = pnand %p5794_p9, %p3988_p11  ;;  %p4374_p0 = scmp.ne.s32.totalorder %s389_s27, %s4373_s19 }
  0x1f   : > { %p4381_p3 = scmp.lt.s32.totalorder %s389_s27, %s389_s27  ;;  %p4382_p4 = scmp.lt.s32.totalorder %s4373_s19, %s4373_s19 }
  0x20   : > { %p4892_p13 = pneg %p4886_p12 }
  0x21   : > { %p4383_p7 = por %p4382_p4, %p4381_p3 }
  0x22   : > { %p4376_p1 = pnand %p4374_p0, %p4892_p13 }
  0x24   : > { %p4377_p2 = pneg %p4376_p1 }
  0x26   : > { %p4384_p8 = pnand %p4383_p7, %p4377_p2 }
  0x28   : > { %4387 = shalt.err (!%p4384_p8)
}
  0x29   : > { %s5795_s26 = smov 256   ;;  %s5797_s18 = smov 16  }
  0x2a   : > { %s5817_s2 = sld [smem:[#allocation37_spill]]  ;;  %s4399_s29 = scalar_lea.vmem %s418_s20, 2048 }
  0x2b   : > { %p4400_p11 = scmp.ne.s32.totalorder %s418_s20, %s4399_s29  ;;  %p4407_p3 = scmp.lt.s32.totalorder %s418_s20, %s418_s20 }
  0x2c   : > { %p4408_p2 = scmp.lt.s32.totalorder %s4399_s29, %s4399_s29 }
  0x2d   : > { %p4402_p0 = pnand %p4400_p11, %p4892_p13 }
  0x2e   : > { %p4409_p4 = por %p4408_p2, %p4407_p3 }
  0x2f   : > { %p4403_p1 = pneg %p4402_p0 }
  0x30   : > { %3994 = dma.hbm_to_vmem [thread:$0]  (!%p4886_p12), %s5817_s2, 2048, %s389_s27, [#allocation9], %s5795_s26, %s5795_s26, %s5797_s18  }
  0x31   : > { %p4410_p7 = pnand %p4409_p4, %p4403_p1 }
  0x33   : > { %4413 = shalt.err (!%p4410_p7)
}
  0x34   : > { %4000 = dma.hbm_to_vmem [thread:$0]  (!%p4886_p12), %s5778_s5, 2048, %s418_s20, [#allocation12], %s5795_s26, %s5795_s26, %s5797_s18  }
  0x35   : > { %s4425_s24 = scalar_lea.vmem %s446_s22, 32  ;;  %p4433_p9 = scmp.lt.s32.totalorder %s446_s22, %s446_s22 }
  0x36   : > { %p4426_p8 = scmp.ne.s32.totalorder %s446_s22, %s4425_s24  ;;  %p4434_p3 = scmp.lt.s32.totalorder %s4425_s24, %s4425_s24 }
  0x38   : > { %p4428_p11 = pnand %p4426_p8, %p4892_p13  ;;  %p4435_p1 = por %p4434_p3, %p4433_p9 }
  0x3a   : > { %p4429_p0 = pneg %p4428_p11 }
  0x3c   : > { %p4436_p2 = pnand %p4435_p1, %p4429_p0 }
  0x3e   : > { %4439 = shalt.err (!%p4436_p2)
}
  0x3f   : > { %4006 = dma.hbm_to_vmem [thread:$0]  (!%p4886_p12), %s5781_s8, 32, %s446_s22, [#allocation15]  }
  0x40   : > { %s4739_s16 = smov [#allocation17]   ;;  %s4740_s21 = smov [#allocation20]  }
  0x41   : > { %s468_s20 = sshll.u32 %s4739_s16, 4  ;;  %s494_s19 = sshll.u32 %s4740_s21, 4  ;;  %s469_s20 = int_to_ptr.vmem [resolvable:$true] %s468_s20  ;;  %s495_s19 = int_to_ptr.vmem [resolvable:$true] %s494_s19 }
  0x42   : > { %s4451_s26 = scalar_lea.vmem %s469_s20, 1024  ;;  %p4459_p9 = scmp.lt.s32.totalorder %s469_s20, %s469_s20 }
  0x43   : > { %p4452_p4 = scmp.ne.s32.totalorder %s469_s20, %s4451_s26  ;;  %p4460_p11 = scmp.lt.s32.totalorder %s4451_s26, %s4451_s26 }
  0x45   : > { %p4454_p7 = pnand %p4452_p4, %p4892_p13  ;;  %p4461_p0 = por %p4460_p11, %p4459_p9 }
  0x47   : > { %p4455_p8 = pneg %p4454_p7 }
  0x49   : > { %p4462_p3 = pnand %p4461_p0, %p4455_p8 }
  0x4b   : > { %4465 = shalt.err (!%p4462_p3)
}
  0x4c   : > { %s5799_s24 = smov 128   ;;  %s5801_s29 = smov 8  }
  0x4d   : > { %4012 = dma.hbm_to_vmem [thread:$0]  (!%p4886_p12), %s5783_s10, 1024, %s469_s20, [#allocation18], %s5799_s24, %s5799_s24, %s5801_s29  }
  0x4e   : > { %s4477_s16 = scalar_lea.vmem %s495_s19, 1024  ;;  %p4485_p7 = scmp.lt.s32.totalorder %s495_s19, %s495_s19 }
  0x4f   : > { %p4478_p1 = scmp.ne.s32.totalorder %s495_s19, %s4477_s16  ;;  %p4486_p8 = scmp.lt.s32.totalorder %s4477_s16, %s4477_s16 }
  0x51   : > { %p4480_p2 = pnand %p4478_p1, %p4892_p13  ;;  %p4487_p9 = por %p4486_p8, %p4485_p7 }
  0x53   : > { %p4481_p4 = pneg %p4480_p2 }
  0x55   : > { %p4488_p11 = pnand %p4487_p9, %p4481_p4 }
  0x57   : > { %4491 = shalt.err (!%p4488_p11)
}
  0x58   : > { %4018 = dma.hbm_to_vmem [thread:$0]  (!%p4886_p12), %s5785_s12, 1024, %s495_s19, [#allocation21], %s5799_s24, %s5799_s24, %s5801_s29  }
  0x59   : > { %s4743_s20 = smov [#allocation5]   ;;  %s4744_s27 = smov [#allocation10]  }
  0x5a   : > { %s375_s22 = sshll.u32 %s4743_s20, 4  ;;  %s404_s18 = sshll.u32 %s4744_s27, 4  ;;  %s376_s22 = int_to_ptr.vmem [resolvable:$true] %s375_s22  ;;  %s405_s18 = int_to_ptr.vmem [resolvable:$true] %s404_s18 }
  0x5b   : > { %s4503_s2 = scalar_lea.vmem %s376_s22, 1024  ;;  %p4511_p2 = scmp.lt.s32.totalorder %s376_s22, %s376_s22 }
  0x5c   : > { %p4504_p0 = scmp.ne.s32.totalorder %s376_s22, %s4503_s2  ;;  %p4512_p4 = scmp.lt.s32.totalorder %s4503_s2, %s4503_s2 }
  0x5e   : > { %p4506_p3 = pnand %p4504_p0, %p4892_p13  ;;  %p4513_p7 = por %p4512_p4, %p4511_p2 }
  0x60   : > { %p4507_p1 = pneg %p4506_p3 }
  0x62   : > { %p4514_p8 = pnand %p4513_p7, %p4507_p1 }
  0x64   : > { %4517 = shalt.err (!%p4514_p8)
}
  0x65   : > { %s5818_s16 = smov 16   ;;  %s5819_s26 = smov 256  }
  0x66   : > { %3991 = dma.hbm_to_vmem [thread:$0]  (!%p4886_p12), %s5774_s1, 1024, %s376_s22, [#allocation6], %s5819_s26, %s5819_s26, %s5818_s16  }
  0x67   : > { %s4529_s20 = scalar_lea.vmem %s405_s18, 2048  ;;  %p4537_p3 = scmp.lt.s32.totalorder %s405_s18, %s405_s18 }
  0x68   : > { %p4530_p9 = scmp.ne.s32.totalorder %s405_s18, %s4529_s20  ;;  %p4538_p2 = scmp.lt.s32.totalorder %s4529_s20, %s4529_s20 }
  0x6a   : > { %p4532_p11 = pnand %p4530_p9, %p4892_p13  ;;  %p4539_p1 = por %p4538_p2, %p4537_p3 }
  0x6c   : > { %p4533_p0 = pneg %p4532_p11 }
  0x6e   : > { %p4540_p4 = pnand %p4539_p1, %p4533_p0 }
  0x70   : > { %4543 = shalt.err (!%p4540_p4)
}
  0x71   : > { %3997 = dma.hbm_to_vmem [thread:$0]  (!%p4886_p12), %s5777_s4, 2048, %s405_s18, [#allocation9], %s5819_s26, %s5819_s26, %s5818_s16  }
  0x72   : > { %s4745_s22 = smov [#allocation13]   ;;  %s4746_s21 = smov [#allocation16]  }
  0x73   : > { %s434_s19 = sshll.u32 %s4745_s22, 4  ;;  %s455_s24 = sshll.u32 %s4746_s21, 4  ;;  %s435_s19 = int_to_ptr.vmem [resolvable:$true] %s434_s19  ;;  %s456_s24 = int_to_ptr.vmem [resolvable:$true] %s455_s24 }
  0x74   : > { %s4555_s29 = scalar_lea.vmem %s435_s19, 32  ;;  %p4563_p11 = scmp.lt.s32.totalorder %s435_s19, %s435_s19 }
  0x75   : > { %p4556_p7 = scmp.ne.s32.totalorder %s435_s19, %s4555_s29  ;;  %p4564_p0 = scmp.lt.s32.totalorder %s4555_s29, %s4555_s29 }
  0x77   : > { %p4558_p8 = pnand %p4556_p7, %p4892_p13  ;;  %p4565_p3 = por %p4564_p0, %p4563_p11 }
  0x79   : > { %p4559_p9 = pneg %p4558_p8 }
  0x7b   : > { %p4566_p2 = pnand %p4565_p3, %p4559_p9 }
  0x7d   : > { %4569 = shalt.err (!%p4566_p2)
}
  0x7e   : > { %4003 = dma.hbm_to_vmem [thread:$0]  (!%p4886_p12), %s5780_s7, 32, %s435_s19, [#allocation12]  }
  0x7f   : > { %s4581_s18 = scalar_lea.vmem %s456_s24, 1024  ;;  %p4589_p7 = scmp.lt.s32.totalorder %s456_s24, %s456_s24 }
  0x80   : > { %p4582_p1 = scmp.ne.s32.totalorder %s456_s24, %s4581_s18  ;;  %p4590_p8 = scmp.lt.s32.totalorder %s4581_s18, %s4581_s18 }
  0x82   : > { %p4584_p4 = pnand %p4582_p1, %p4892_p13  ;;  %p4591_p5 = por %p4590_p8, %p4589_p7 }
  0x84   : > { %p4585_p6 = pneg %p4584_p4 }
  0x86   : > { %p4592_p10 = pnand %p4591_p5, %p4585_p6 }
  0x88   : > { %4595 = shalt.err (!%p4592_p10)
}
  0x89   : > { %s5820_s29 = smov 8   ;;  %s5821_s16 = smov 128  }
  0x8a   : > { %4009 = dma.hbm_to_vmem [thread:$0]  (!%p4886_p12), %s5782_s9, 1024, %s456_s24, [#allocation15], %s5821_s16, %s5821_s16, %s5820_s29  }
  0x8b   : > { %s4747_s22 = smov [#allocation19]   ;;  %s4748_s21 = smov [#allocation22]  }
  0x8c   : > { %s481_s19 = sshll.u32 %s4747_s22, 4  ;;  %s508_s20 = sshll.u32 %s4748_s21, 4  ;;  %s482_s19 = int_to_ptr.vmem [resolvable:$true] %s481_s19  ;;  %s509_s20 = int_to_ptr.vmem [resolvable:$true] %s508_s20 }
  0x8d   : > { %s4607_s2 = scalar_lea.vmem %s482_s19, 1024  ;;  %p4615_p10 = scmp.lt.s32.totalorder %s482_s19, %s482_s19 }
  0x8e   : > { %p4608_p9 = scmp.ne.s32.totalorder %s482_s19, %s4607_s2  ;;  %p4616_p11 = scmp.lt.s32.totalorder %s4607_s2, %s4607_s2 }
  0x90   : > { %p4610_p5 = pnand %p4608_p9, %p4892_p13  ;;  %p4617_p0 = por %p4616_p11, %p4615_p10 }
  0x92   : > { %p4611_p6 = pneg %p4610_p5 }
  0x94   : > { %p4618_p3 = pnand %p4617_p0, %p4611_p6 }
  0x96   : > { %4621 = shalt.err (!%p4618_p3)
}
  0x97   : > { %4015 = dma.hbm_to_vmem [thread:$0]  (!%p4886_p12), %s5784_s11, 1024, %s482_s19, [#allocation18], %s5821_s16, %s5821_s16, %s5820_s29  }
  0x98   : > { %s4633_s26 = scalar_lea.vmem %s509_s20, 16  ;;  %s4640_s27 = scalar_lea.vmem %s509_s20, 32 }
  0x99   : > { %p4634_p2 = scmp.ne.s32.totalorder %s509_s20, %s4633_s26  ;;  %p4641_p7 = scmp.lt.s32.totalorder %s509_s20, %s509_s20 }
  0x9a   : > { %p4642_p8 = scmp.lt.s32.totalorder %s4640_s27, %s4633_s26 }
  0x9b   : > { %p4636_p1 = pnand %p4634_p2, %p4892_p13 }
  0x9c   : > { %p4643_p9 = por %p4642_p8, %p4641_p7 }
  0x9d   : > { %p4637_p4 = pneg %p4636_p1 }
  0x9f   : > { %p4644_p5 = pnand %p4643_p9, %p4637_p4 }
  0xa1   : > { %4647 = shalt.err (!%p4644_p5)
}
  0xa2   : > { %4021 = dma.hbm_to_vmem [thread:$0]  (!%p4886_p12), %s5786_s13, 16, %s509_s20, [#allocation21]  }
  0xa3   : > { %p5822_p6 = scmp.ne.s32.totalorder %s5814_s25, 0 }
  0xa4   : > { %p5823_p10 = scmp.eq.s32.totalorder (!%p5822_p6), %s4850_s17, 0 }
  0xa5   : > { %528 = sbr.rel (%p5822_p6) target bundleno = 12619 (0x314b), region = 76 }
  0xaa   : > { %4691 = dma.done.wait (%p5823_p10), [#allocation6], 1024   ;;  %p5824_p13 = pmov %p5823_p10 }
  0xab   : > { %p5825_p11 = pmov %p5823_p10 }
  0xac   : > { %4693 = vsyncadd (%p5824_p13), [#allocation6], 4294966272 }
  0xad   : > { %4695 = dma.done.wait (%p5825_p11), [#allocation9], 4096   ;;  %p5826_p0 = pmov %p5823_p10 }
  0xaf   : > { %4697 = vsyncadd (%p5826_p0), [#allocation9], 4294963200  ;;  %p5827_p3 = pmov %p5826_p0 }
  0xb0   : > { %p5828_p12 = pmov %p5826_p0 }
  0xb1   : > { %4699 = dma.done.wait (%p5827_p3), [#allocation12], 2080  }
  0xb2   : > { %4701 = vsyncadd (%p5828_p12), [#allocation12], 4294965216  ;;  %p5829_p2 = pmov %p5826_p0 }
  0xb3   : > { %p5830_p1 = pmov %p5826_p0 }
  0xb4   : > { %4703 = dma.done.wait (%p5829_p2), [#allocation15], 1056  }
  0xb5   : > { %4705 = vsyncadd (%p5830_p1), [#allocation15], 4294966240  ;;  %p5831_p4 = pmov %p5826_p0 }
  0xb6   : > { %p5832_p7 = pmov %p5826_p0 }
  0xb7   : > { %4707 = dma.done.wait (%p5831_p4), [#allocation18], 2048  }
  0xb8   : > { %4709 = vsyncadd (%p5832_p7), [#allocation18], 4294965248  ;;  %p5833_p8 = pmov %p5826_p0 }
  0xb9   : > { %p5834_p9 = pmov %p5826_p0 }
  0xba   : > { %4711 = dma.done.wait (%p5833_p8), [#allocation21], 1040  }
  0xbb   : > { %4713 = vsyncadd (%p5834_p9), [#allocation21], 4294966256  ;;  %p613_p5 = scmp.lt.s32.totalorder %s4850_s17, 1  ;;  %v4749_v0 = vmov 0.0   ;;  %v625_v1 = vld [vmem:[#allocation5 + $0x38] sm:$0xff]  ;;  %v624_v2 = vld [vmem:[#allocation5 + $0x30] sm:$0xff]  ;;  %v628_v28 = vlaneseq }
  0xbc   : > { %706 = vmatprep.mubr.f32.mxu1 %v4749_v0  ;;  %944 = vmatprep.mubr.f32.mxu0 %v4749_v0  ;;  %v623_v3 = vld [vmem:[#allocation5 + $0x28] sm:$0xff]  ;;  %v622_v4 = vld [vmem:[#allocation5 + $0x20] sm:$0xff]  ;;  %v621_v5 = vld [vmem:[#allocation5 + $0x18] sm:$0xff]  ;;  %vm638_vm0 = vcmask 261120   ;;  %s4750_s19 = smov 32   ;;  %vm733_vm1 = vcmask 523264  }
  0xbd   : > { %s614_s15 = scalar_select %p613_p5, %s4850_s17, 1  ;;  %666 = vmatprep.subr.mxu1 %v625_v1  ;;  %v620_v6 = vld [vmem:[#allocation5 + $0x10] sm:$0xff]  ;;  %v5030_v7 = vld [vmem:[#allocation8 + $0x78] sm:$0xff]  ;;  %v619_v8 = vld [vmem:[#allocation5 + $0x8] sm:$0xff]  ;;  %v5120_v29 = vshrl.u32 %v628_v28, 7  ;;  %vm868_vm2 = vcmask 253952  }
  0xbe   : > { %667 = vmatpush1.msra.mxu1 %v624_v2  ;;  %v5032_v9 = vld [vmem:[#allocation8 + $0x70] sm:$0xff]  ;;  %896 = vmatprep.subr.mxu0 %v5030_v7  ;;  %v618_v10 = vld [vmem:[#allocation5] sm:$0xff]  ;;  %v5035_v11 = vld [vmem:[#allocation8 + $0x68] sm:$0xff]  ;;  %s4751_s24 = smov 64   ;;  %vm874_vm3 = vcmask 516352   ;;  %vm4752_vm4 = vmmov 0  }
  0xbf   : > { %s3753_s25 = sshll.u32 %s614_s15, 3  ;;  %668 = vmatprep.subr.mxu1 %v623_v3  ;;  %897 = vmatpush1.msra.mxu0 %v5032_v9  ;;  %v5038_v13 = vld [vmem:[#allocation8 + $0x60] sm:$0xff]  ;;  %v5041_v14 = vld [vmem:[#allocation8 + $0x58] sm:$0xff]  ;;  %v5052_v16 = vld [vmem:[#allocation8 + $0x50] sm:$0xff]  ;;  %v630_v30 = vsub.s32 0, %v5120_v29  ;;  %v634_v32 = vsub.s32 1, %v5120_v29 }
  0xc0   : > { %s616_s16 = scalar_lea.vmem %s5773_s0, %s3753_s25  ;;  %669 = vmatpush1.msra.mxu1 %v622_v4  ;;  %898 = vmatprep.subr.mxu0 %v5035_v11  ;;  %v5044_v15 = vld [vmem:[#allocation14] sm:$0x1]  ;;  %v5057_v17 = vld [vmem:[#allocation8 + $0x48] sm:$0xff]  ;;  %v5065_v19 = vld [vmem:[#allocation8 + $0x38] sm:$0xff]  ;;  %vm3212_vm5 = vcmask 64512   ;;  %s610_s27 = sand.u32 1, %s4724_s30  }
  0xc1   : > { %670 = vmatprep.subr.mxu1 %v621_v5  ;;  %v617_v12 = vld [vmem:[%s616_s16] sm:$0xff]  ;;  %899 = vmatpush1.msra.mxu0 %v5038_v13  ;;  %v5069_v20 = vld [vmem:[#allocation8 + $0x30] sm:$0xff]  ;;  %v5073_v21 = vld [vmem:[#allocation8 + $0x28] sm:$0xff]  ;;  %s3752_s22 = sshll.u32 %s610_s27, 3  ;;  %s3813_s21 = sshll.u32 %s4850_s17, 7 }
  0xc2   : > { %671 = vmatpush1.msra.mxu1 %v620_v6  ;;  %900 = vmatprep.subr.mxu0 %v5041_v14  ;;  %v5061_v18 = vld [vmem:[#allocation8 + $0x40] sm:$0xff]  ;;  %v5081_v23 = vld [vmem:[#allocation8 + $0x18] sm:$0xff]  ;;  %v5085_v24 = vld [vmem:[#allocation8 + $0x10] sm:$0xff]  ;;  %s612_s15 = scalar_lea.vmem [#allocation23], %s3752_s22  ;;  %s5738_s16 = scalar_lea.hbm %s5787_s14, %s3813_s21 }
  0xc3   : > { %672 = vmatprep.subr.mxu1 %v619_v8  ;;  %820 = vrot.lane.b32.xlu1 %v5044_v15, %s4750_s19  ;;  %v5077_v22 = vld [vmem:[#allocation8 + $0x20] sm:$0xff]  ;;  %v5089_v25 = vld [vmem:[#allocation8 + $0x8] sm:$0xff]  ;;  %s3560_s25 = sshll.u32 %s612_s15, 4  ;;  %p5835_p10 = scmp.ne.s32.totalorder %s5811_s23, 0  ;;  %s3561_s25 = int_to_ptr.vmem [resolvable:$true] %s3560_s25 }
  0xc4   : > { %673 = vmatpush1.msra.mxu1 %v618_v10  ;;  %901 = vmatpush1.msra.mxu0 %v5052_v16  ;;  %v5093_v26 = vld [vmem:[#allocation8] sm:$0xff]  ;;  %s4648_s20 = scalar_lea.vmem %s3561_s25, 128  ;;  %s4753_s2 = smov [#allocation23]  }
  0xc5   : > { %3754 = vmatmul.mubr.msk.f32.vlgmr.msra.gmra.mxu1 %vm638_vm0, %v617_v12  ;;  %753 = vmatprep.subr.mxu1 %v5030_v7  ;;  %v731_v27 = vld [vmem:[#allocation13] sm:$0x1]  ;;  %p4649_p6 = scmp.ne.s32.totalorder %s3561_s25, %s4648_s20  ;;  %s4652_s17 = sshll.u32 %s4753_s2, 4  ;;  %s4653_s17 = int_to_ptr.vmem [resolvable:$false] %s4652_s17 }
  0xc6   : > { %754 = vmatpush1.msra.mxu1 %v5032_v9  ;;  %801 = vmatprep.mubr.f32.mxu1 %v4749_v0  ;;  %v626_v31 = vld [vmem:[%s5776_s3] sm:$0x3]  ;;  %p4655_p0 = scmp.lt.s32.totalorder %s3561_s25, %s4653_s17 }
  0xc7   : > { %755 = vmatprep.subr.mxu1 %v5035_v11  ;;  %902 = vmatprep.subr.mxu0 %v5057_v17  ;;  %v631_v33 = vrot.slane %v626_v31, %v630_v30  ;;  %v635_v34 = vrot.slane %v626_v31, %v634_v32  ;;  %p4650_p13 = pnand %p4649_p6, %p5835_p10 }
  0xc8   : > { %756 = vmatpush1.msra.mxu1 %v5038_v13  ;;  %903 = vmatpush1.msra.mxu0 %v5061_v18 }
  0xc9   : > { %757 = vmatprep.subr.mxu1 %v5041_v14  ;;  %904 = vmatprep.subr.mxu0 %v5065_v19  ;;  %p4651_p11 = pneg %p4650_p13 }
  0xca   : > { %758 = vmatpush1.msra.mxu1 %v5052_v16  ;;  %905 = vmatpush1.msra.mxu0 %v5069_v20 }
  0xcb   : > { %759 = vmatprep.subr.mxu1 %v5057_v17  ;;  %906 = vmatprep.subr.mxu0 %v5073_v21 }
  0xcc   : > { %760 = vmatpush1.msra.mxu1 %v5061_v18  ;;  %907 = vmatpush1.msra.mxu0 %v5077_v22 }
  0xcd   : > { %761 = vmatprep.subr.mxu1 %v5065_v19  ;;  %908 = vmatprep.subr.mxu0 %v5081_v23 }
  0xce   : > { %762 = vmatpush1.msra.mxu1 %v5069_v20  ;;  %909 = vmatpush1.msra.mxu0 %v5085_v24 }
  0xcf   : > { %763 = vmatprep.subr.mxu1 %v5073_v21  ;;  %910 = vmatprep.subr.mxu0 %v5089_v25 }
  0xd0   : > { %764 = vmatpush1.msra.mxu1 %v5077_v22  ;;  %911 = vmatpush1.msra.mxu0 %v5093_v26 }
  0xd1   : > { %765 = vmatprep.subr.mxu1 %v5081_v23  ;;  %1170 = vmatprep.subr.mxu0 %v5030_v7 }
  0xd2   : > { %766 = vmatpush1.msra.mxu1 %v5085_v24 }
  0xd3   : > { %767 = vmatprep.subr.mxu1 %v5089_v25 }
  0xd4   : > { %768 = vmatpush1.msra.mxu1 %v5093_v26 }
  0xd5   : > { %3755 = vmatmul.mubr.msk.f32.vlgmr.msra.gmra.mxu1 %vm733_vm1, %v731_v27  ;;  %1033 = vmatprep.subr.mxu1 %v5030_v7 }
  0xd6   : > { %1034 = vmatpush1.msra.mxu1 %v5032_v9  ;;  %1081 = vmatprep.mubr.f32.mxu1 %v4749_v0 }
  0xd7   : > { %1035 = vmatprep.subr.mxu1 %v5035_v11 }
  0xd8   : > { %1036 = vmatpush1.msra.mxu1 %v5038_v13 }
  0xd9   : > { %1037 = vmatprep.subr.mxu1 %v5041_v14 }
  0xda   : > { %1038 = vmatpush1.msra.mxu1 %v5052_v16 }
  0xdb   : > { %1039 = vmatprep.subr.mxu1 %v5057_v17 }
  0xdc   : > { %1040 = vmatpush1.msra.mxu1 %v5061_v18 }
  0xdd   : > { %1041 = vmatprep.subr.mxu1 %v5065_v19 }
  0xde   : > { %1042 = vmatpush1.msra.mxu1 %v5069_v20 }
  0xdf   : > { %1043 = vmatprep.subr.mxu1 %v5073_v21 }
  0xe0   : > { %1044 = vmatpush1.msra.mxu1 %v5077_v22 }
  0xe1   : > { %1045 = vmatprep.subr.mxu1 %v5081_v23 }
  0xe2   : > { %1046 = vmatpush1.msra.mxu1 %v5085_v24 }
  0xe3   : > { %1047 = vmatprep.subr.mxu1 %v5089_v25 }
  0xe4   : > { %1048 = vmatpush1.msra.mxu1 %v5093_v26 }
  0xe5   : > { %1307 = vmatprep.subr.mxu1 %v5030_v7 }
 0x135   : > { %v821_v59 = vpop.permute.xlu1 %820 }
 0x185   : > { %v708_v35 = vpop.f32.mrf.mxu1 }
 0x186   : > { %v709_v36 = vadd.f32 %v708_v35, %v631_v33 }
 0x187   : > { %v710_v37 = vpop.f32.mrf.mxu1 }
 0x188   : > { %713 = vst [vmem:[#allocation2] sm:$0xff] %v709_v36  ;;  %v711_v38 = vadd.f32 %v710_v37, %v635_v34 }
 0x18a   : > { %714 = vst [vmem:[#allocation2 + $0x8] sm:$0xff] %v711_v38 }
 0x18f   : > { %v808_v40 = vld [vmem:[#allocation2] ss:$0 sm:$0xff]  ;;  %v951_v31 = vld [vmem:[#allocation2 + $0x1] ss:$0 sm:$0xff] }
 0x191   : > { %v810_v43 = vld [vmem:[#allocation2 + $0xf] ss:$0 sm:$0xff]  ;;  %v953_v35 = vld [vmem:[#allocation2 + $0xe] ss:$0 sm:$0xff] }
 0x195   : > { %v803_v39 = vpop.f32.mrf.mxu1 }
 0x196   : > { %v809_v41 = vadd.f32 %v808_v40, %v803_v39 }
 0x197   : > { %v805_v42 = vpop.f32.mrf.mxu1 }
 0x198   : > { %4100 = vtanh.f32 %v809_v41  ;;  %v811_v44 = vadd.f32 %v810_v43, %v805_v42  ;;  %v3756_v47 = vmul.f32 -1.442695, %v809_v41 }
 0x19a   : > { %4102 = vtanh.f32 %v811_v44  ;;  %v3757_v48 = vmul.f32 -1.442695, %v811_v44 }
 0x19b   : > { %4104 = vpow2.f32 %v3756_v47 }
 0x19c   : > { %4106 = vpow2.f32 %v3757_v48 }
 0x1a5   : > { %v4101_v45 = vpop.eup %4100 }
 0x1a6   : > { %825 = vrot.lane.b32.xlu0 %v4101_v45, %s4751_s24 }
 0x1a7   : > { %v4103_v46 = vpop.eup %4102 }
 0x1a8   : > { %v4105_v49 = vpop.eup %4104 }
 0x1a9   : > { %v815_v50 = vadd.f32 1.0, %v4105_v49  ;;  %v4107_v51 = vpop.eup %4106 }
 0x1aa   : > { %849 = vrot.lane.b32.xlu0 %v4103_v46, %s4751_s24  ;;  %v843_v52 = vadd.f32 1.0, %v4107_v51 }
 0x1ab   : > { %4108 = vrcp.f32 %v815_v50 }
 0x1ac   : > { %4110 = vrcp.f32 %v843_v52 }
 0x1b8   : > { %v4109_v53 = vpop.eup %4108 }
 0x1b9   : > { %v4111_v56 = vpop.eup %4110  ;;  %v823_v60 = vmul.f32 %v4109_v53, %v821_v59 }
 0x1ba   : > { %v847_v63 = vmul.f32 %v4111_v56, %v5044_v15 }
 0x218   : > { %v826_v54 = vpop.permute.xlu0 %825 }
 0x219   : > { %v828_v55 = vmul.f32 %v4109_v53, %v826_v54 }
 0x21b   : > { %830 = vrot.lane.b32.xlu1 %v828_v55, %s4750_s19 }
 0x21c   : > { %v850_v57 = vpop.permute.xlu0 %849 }
 0x21d   : > { %v852_v58 = vmul.f32 %v4111_v56, %v850_v57 }
 0x21f   : > { %854 = vrot.lane.b32.xlu0 %v852_v58, %s4750_s19 }
 0x28d   : > { %v831_v61 = vpop.permute.xlu1 %830 }
 0x28e   : > { %v5135_v62 = vadd.f32 %v831_v61, %v823_v60 }
 0x290   : > { %4112 = vtanh.f32 %v5135_v62 }
 0x291   : > { %v855_v1 = vpop.permute.xlu0 %854 }
 0x292   : > { %v5139_v2 = vadd.f32 %v855_v1, %v847_v63 }
 0x294   : > { %4114 = vtanh.f32 %v5139_v2 }
 0x29d   : > { %v4113_v3 = vpop.eup %4112 }
 0x29e   : > { %836 = vrot.lane.b32.xlu1 %v4113_v3, %s4751_s24 }
 0x2a1   : > { %v4115_v4 = vpop.eup %4114 }
 0x2a2   : > { %860 = vrot.lane.b32.xlu0 %v4115_v4, %s4751_s24  ;;  %v1088_v4 = vld [vmem:[#allocation2 + $0x2] ss:$0 sm:$0xff] }
 0x310   : > { %v837_v5 = vpop.permute.xlu1 %836 }
 0x311   : > { %v839_v6 = vmul.f32 %v4109_v53, %v837_v5 }
 0x313   : > { %865 = vrot.lane.b32.xlu1 %v839_v6, %s4750_s19 }
 0x314   : > { %v861_v8 = vpop.permute.xlu0 %860 }
 0x315   : > { %v863_v10 = vmul.f32 %v4111_v56, %v861_v8  ;;  %v1090_v8 = vld [vmem:[#allocation2 + $0xd] ss:$0 sm:$0xff] }
 0x317   : > { %871 = vrot.lane.b32.xlu0 %v863_v10, %s4751_s24 }
 0x385   : > { %v866_v12 = vpop.permute.xlu1 %865 }
 0x386   : > { %869 = vst.msk [vmem:[#allocation3] sm:$0x1] %vm868_vm2, %v866_v12 }
 0x389   : > { %v872_v15 = vpop.permute.xlu0 %871 }
 0x38a   : > { %875 = vst.msk [vmem:[#allocation3 + $0x7] sm:$0x1] %vm874_vm3, %v872_v15  ;;  %v876_v27 = vsel %vm638_vm0, %v866_v12, %v872_v15 }
 0x38b   : > { %3758 = vmatmul.mubr.msk.f32.vlgmr.msra.gmra.mxu0 %vm733_vm1, %v876_v27 }
 0x38c   : > { %1171 = vmatpush1.msra.mxu0 %v5032_v9  ;;  %1218 = vmatprep.mubr.f32.mxu0 %v4749_v0 }
 0x38d   : > { %1172 = vmatprep.subr.mxu0 %v5035_v11 }
 0x38e   : > { %1173 = vmatpush1.msra.mxu0 %v5038_v13 }
 0x38f   : > { %1174 = vmatprep.subr.mxu0 %v5041_v14 }
 0x390   : > { %1175 = vmatpush1.msra.mxu0 %v5052_v16 }
 0x391   : > { %1176 = vmatprep.subr.mxu0 %v5057_v17 }
 0x392   : > { %1177 = vmatpush1.msra.mxu0 %v5061_v18 }
 0x393   : > { %1178 = vmatprep.subr.mxu0 %v5065_v19 }
 0x394   : > { %1179 = vmatpush1.msra.mxu0 %v5069_v20 }
 0x395   : > { %1180 = vmatprep.subr.mxu0 %v5073_v21 }
 0x396   : > { %1181 = vmatpush1.msra.mxu0 %v5077_v22 }
 0x397   : > { %1182 = vmatprep.subr.mxu0 %v5081_v23 }
 0x398   : > { %1183 = vmatpush1.msra.mxu0 %v5085_v24 }
 0x399   : > { %1184 = vmatprep.subr.mxu0 %v5089_v25 }
 0x39a   : > { %1185 = vmatpush1.msra.mxu0 %v5093_v26 }
 0x39b   : > { %1444 = vmatprep.subr.mxu0 %v5030_v7 }
 0x44b   : > { %v946_v28 = vpop.f32.mrf.mxu0 }
 0x44c   : > { %v952_v33 = vadd.f32 %v951_v31, %v946_v28 }
 0x44d   : > { %v948_v34 = vpop.f32.mrf.mxu0 }
 0x44e   : > { %4116 = vtanh.f32 %v952_v33  ;;  %v954_v36 = vadd.f32 %v953_v35, %v948_v34  ;;  %v3759_v39 = vmul.f32 -1.442695, %v952_v33 }
 0x450   : > { %4118 = vtanh.f32 %v954_v36  ;;  %v3760_v40 = vmul.f32 -1.442695, %v954_v36 }
 0x451   : > { %4120 = vpow2.f32 %v3759_v39 }
 0x452   : > { %4122 = vpow2.f32 %v3760_v40 }
 0x45b   : > { %v4117_v37 = vpop.eup %4116 }
 0x45c   : > { %964 = vrot.lane.b32.xlu1 %v4117_v37, %s4751_s24 }
 0x45d   : > { %v4119_v38 = vpop.eup %4118 }
 0x45e   : > { %988 = vrot.lane.b32.xlu0 %v4119_v38, %s4751_s24  ;;  %v4121_v41 = vpop.eup %4120 }
 0x45f   : > { %v4123_v42 = vpop.eup %4122  ;;  %v958_v43 = vadd.f32 1.0, %v4121_v41 }
 0x460   : > { %v982_v44 = vadd.f32 1.0, %v4123_v42 }
 0x461   : > { %4124 = vrcp.f32 %v958_v43 }
 0x462   : > { %4126 = vrcp.f32 %v982_v44 }
 0x46e   : > { %v4125_v45 = vpop.eup %4124 }
 0x46f   : > { %v4127_v48 = vpop.eup %4126  ;;  %v962_v51 = vmul.f32 %v4125_v45, %v5135_v62 }
 0x470   : > { %v986_v54 = vmul.f32 %v4127_v48, %v5139_v2 }
 0x4ce   : > { %v965_v46 = vpop.permute.xlu1 %964 }
 0x4cf   : > { %v967_v47 = vmul.f32 %v4125_v45, %v965_v46 }
 0x4d0   : > { %v989_v49 = vpop.permute.xlu0 %988 }
 0x4d1   : > { %969 = vrot.lane.b32.xlu1 %v967_v47, %s4750_s19  ;;  %v991_v50 = vmul.f32 %v4127_v48, %v989_v49 }
 0x4d3   : > { %993 = vrot.lane.b32.xlu0 %v991_v50, %s4750_s19 }
 0x543   : > { %v970_v52 = vpop.permute.xlu1 %969 }
 0x544   : > { %v5172_v53 = vadd.f32 %v970_v52, %v962_v51 }
 0x545   : > { %v994_v55 = vpop.permute.xlu0 %993 }
 0x546   : > { %4128 = vtanh.f32 %v5172_v53  ;;  %v5176_v56 = vadd.f32 %v994_v55, %v986_v54 }
 0x548   : > { %4130 = vtanh.f32 %v5176_v56 }
 0x553   : > { %v4129_v57 = vpop.eup %4128 }
 0x554   : > { %975 = vrot.lane.b32.xlu1 %v4129_v57, %s4751_s24 }
 0x555   : > { %v4131_v58 = vpop.eup %4130 }
 0x556   : > { %999 = vrot.lane.b32.xlu0 %v4131_v58, %s4751_s24  ;;  %v1225_v58 = vld [vmem:[#allocation2 + $0x3] ss:$0 sm:$0xff] }
 0x5c6   : > { %v976_v59 = vpop.permute.xlu1 %975 }
 0x5c7   : > { %v978_v60 = vmul.f32 %v4125_v45, %v976_v59 }
 0x5c8   : > { %v1000_v61 = vpop.permute.xlu0 %999 }
 0x5c9   : > { %1004 = vrot.lane.b32.xlu1 %v978_v60, %s4750_s19  ;;  %v1002_v62 = vmul.f32 %v4127_v48, %v1000_v61  ;;  %v1227_v61 = vld [vmem:[#allocation2 + $0xc] ss:$0 sm:$0xff] }
 0x5cb   : > { %1009 = vrot.lane.b32.xlu0 %v1002_v62, %s4751_s24 }
 0x63b   : > { %v1005_v63 = vpop.permute.xlu1 %1004 }
 0x63c   : > { %1007 = vst.msk [vmem:[#allocation3 + $0x1] sm:$0x1] %vm868_vm2, %v1005_v63 }
 0x63d   : > { %v1010_v1 = vpop.permute.xlu0 %1009 }
 0x63e   : > { %1012 = vst.msk [vmem:[#allocation3 + $0x6] sm:$0x1] %vm874_vm3, %v1010_v1  ;;  %v1013_v2 = vsel %vm638_vm0, %v1005_v63, %v1010_v1 }
 0x63f   : > { %3761 = vmatmul.mubr.msk.f32.vlgmr.msra.gmra.mxu1 %vm733_vm1, %v1013_v2 }
 0x640   : > { %1308 = vmatpush1.msra.mxu1 %v5032_v9  ;;  %1355 = vmatprep.mubr.f32.mxu1 %v4749_v0 }
 0x641   : > { %1309 = vmatprep.subr.mxu1 %v5035_v11 }
 0x642   : > { %1310 = vmatpush1.msra.mxu1 %v5038_v13 }
 0x643   : > { %1311 = vmatprep.subr.mxu1 %v5041_v14 }
 0x644   : > { %1312 = vmatpush1.msra.mxu1 %v5052_v16 }
 0x645   : > { %1313 = vmatprep.subr.mxu1 %v5057_v17 }
 0x646   : > { %1314 = vmatpush1.msra.mxu1 %v5061_v18 }
 0x647   : > { %1315 = vmatprep.subr.mxu1 %v5065_v19 }
 0x648   : > { %1316 = vmatpush1.msra.mxu1 %v5069_v20 }
 0x649   : > { %1317 = vmatprep.subr.mxu1 %v5073_v21 }
 0x64a   : > { %1318 = vmatpush1.msra.mxu1 %v5077_v22 }
 0x64b   : > { %1319 = vmatprep.subr.mxu1 %v5081_v23 }
 0x64c   : > { %1320 = vmatpush1.msra.mxu1 %v5085_v24 }
 0x64d   : > { %1321 = vmatprep.subr.mxu1 %v5089_v25 }
 0x64e   : > { %1322 = vmatpush1.msra.mxu1 %v5093_v26 }
 0x64f   : > { %1581 = vmatprep.subr.mxu1 %v5030_v7 }
 0x6ff   : > { %v1083_v3 = vpop.f32.mrf.mxu1 }
 0x700   : > { %v1089_v5 = vadd.f32 %v1088_v4, %v1083_v3 }
 0x701   : > { %v1085_v6 = vpop.f32.mrf.mxu1 }
 0x702   : > { %4132 = vtanh.f32 %v1089_v5  ;;  %v1091_v10 = vadd.f32 %v1090_v8, %v1085_v6  ;;  %v3762_v27 = vmul.f32 -1.442695, %v1089_v5 }
 0x704   : > { %4134 = vtanh.f32 %v1091_v10  ;;  %v3763_v28 = vmul.f32 -1.442695, %v1091_v10 }
 0x705   : > { %4136 = vpow2.f32 %v3762_v27 }
 0x706   : > { %4138 = vpow2.f32 %v3763_v28 }
 0x70f   : > { %v4133_v12 = vpop.eup %4132 }
 0x710   : > { %1101 = vrot.lane.b32.xlu1 %v4133_v12, %s4751_s24 }
 0x711   : > { %v4135_v15 = vpop.eup %4134 }
 0x712   : > { %1125 = vrot.lane.b32.xlu0 %v4135_v15, %s4751_s24  ;;  %v4137_v31 = vpop.eup %4136 }
 0x713   : > { %v4139_v33 = vpop.eup %4138  ;;  %v1095_v34 = vadd.f32 1.0, %v4137_v31 }
 0x714   : > { %v1119_v35 = vadd.f32 1.0, %v4139_v33 }
 0x715   : > { %4140 = vrcp.f32 %v1095_v34 }
 0x716   : > { %4142 = vrcp.f32 %v1119_v35 }
 0x722   : > { %v4141_v36 = vpop.eup %4140 }
 0x723   : > { %v4143_v39 = vpop.eup %4142  ;;  %v1099_v42 = vmul.f32 %v4141_v36, %v5172_v53 }
 0x724   : > { %v1123_v45 = vmul.f32 %v4143_v39, %v5176_v56 }
 0x782   : > { %v1102_v37 = vpop.permute.xlu1 %1101 }
 0x783   : > { %v1104_v38 = vmul.f32 %v4141_v36, %v1102_v37 }
 0x784   : > { %v1126_v40 = vpop.permute.xlu0 %1125 }
 0x785   : > { %1106 = vrot.lane.b32.xlu1 %v1104_v38, %s4750_s19  ;;  %v1128_v41 = vmul.f32 %v4143_v39, %v1126_v40 }
 0x787   : > { %1130 = vrot.lane.b32.xlu0 %v1128_v41, %s4750_s19 }
 0x7f7   : > { %v1107_v43 = vpop.permute.xlu1 %1106 }
 0x7f8   : > { %v5209_v44 = vadd.f32 %v1107_v43, %v1099_v42 }
 0x7f9   : > { %v1131_v46 = vpop.permute.xlu0 %1130 }
 0x7fa   : > { %4144 = vtanh.f32 %v5209_v44  ;;  %v5213_v47 = vadd.f32 %v1131_v46, %v1123_v45 }
 0x7fc   : > { %4146 = vtanh.f32 %v5213_v47 }
 0x807   : > { %v4145_v48 = vpop.eup %4144 }
 0x808   : > { %1112 = vrot.lane.b32.xlu1 %v4145_v48, %s4751_s24  ;;  %v1362_v48 = vld [vmem:[#allocation2 + $0x4] ss:$0 sm:$0xff] }
 0x809   : > { %v4147_v49 = vpop.eup %4146 }
 0x80a   : > { %1136 = vrot.lane.b32.xlu0 %v4147_v49, %s4751_s24 }
 0x87a   : > { %v1113_v50 = vpop.permute.xlu1 %1112 }
 0x87b   : > { %v1115_v51 = vmul.f32 %v4141_v36, %v1113_v50 }
 0x87c   : > { %v1137_v52 = vpop.permute.xlu0 %1136 }
 0x87d   : > { %1141 = vrot.lane.b32.xlu1 %v1115_v51, %s4750_s19  ;;  %v1139_v53 = vmul.f32 %v4143_v39, %v1137_v52  ;;  %v1364_v51 = vld [vmem:[#allocation2 + $0xb] ss:$0 sm:$0xff] }
 0x87f   : > { %1146 = vrot.lane.b32.xlu0 %v1139_v53, %s4751_s24 }
 0x8ef   : > { %v1142_v54 = vpop.permute.xlu1 %1141 }
 0x8f0   : > { %1144 = vst.msk [vmem:[#allocation3 + $0x2] sm:$0x1] %vm868_vm2, %v1142_v54 }
 0x8f1   : > { %v1147_v55 = vpop.permute.xlu0 %1146 }
 0x8f2   : > { %1149 = vst.msk [vmem:[#allocation3 + $0x5] sm:$0x1] %vm874_vm3, %v1147_v55  ;;  %v1150_v56 = vsel %vm638_vm0, %v1142_v54, %v1147_v55 }
 0x8f3   : > { %3764 = vmatmul.mubr.msk.f32.vlgmr.msra.gmra.mxu0 %vm733_vm1, %v1150_v56 }
 0x8f4   : > { %1445 = vmatpush1.msra.mxu0 %v5032_v9  ;;  %1492 = vmatprep.mubr.f32.mxu0 %v4749_v0 }
 0x8f5   : > { %1446 = vmatprep.subr.mxu0 %v5035_v11 }
 0x8f6   : > { %1447 = vmatpush1.msra.mxu0 %v5038_v13 }
 0x8f7   : > { %1448 = vmatprep.subr.mxu0 %v5041_v14 }
 0x8f8   : > { %1449 = vmatpush1.msra.mxu0 %v5052_v16 }
 0x8f9   : > { %1450 = vmatprep.subr.mxu0 %v5057_v17 }
 0x8fa   : > { %1451 = vmatpush1.msra.mxu0 %v5061_v18 }
 0x8fb   : > { %1452 = vmatprep.subr.mxu0 %v5065_v19 }
 0x8fc   : > { %1453 = vmatpush1.msra.mxu0 %v5069_v20 }
 0x8fd   : > { %1454 = vmatprep.subr.mxu0 %v5073_v21 }
 0x8fe   : > { %1455 = vmatpush1.msra.mxu0 %v5077_v22 }
 0x8ff   : > { %1456 = vmatprep.subr.mxu0 %v5081_v23 }
 0x900   : > { %1457 = vmatpush1.msra.mxu0 %v5085_v24 }
 0x901   : > { %1458 = vmatprep.subr.mxu0 %v5089_v25 }
 0x902   : > { %1459 = vmatpush1.msra.mxu0 %v5093_v26 }
 0x903   : > { %1718 = vmatprep.subr.mxu0 %v5030_v7 }
 0x9b3   : > { %v1220_v57 = vpop.f32.mrf.mxu0 }
 0x9b4   : > { %v1226_v59 = vadd.f32 %v1225_v58, %v1220_v57 }
 0x9b5   : > { %v1222_v60 = vpop.f32.mrf.mxu0 }
 0x9b6   : > { %4148 = vtanh.f32 %v1226_v59  ;;  %v1228_v62 = vadd.f32 %v1227_v61, %v1222_v60  ;;  %v3765_v2 = vmul.f32 -1.442695, %v1226_v59 }
 0x9b8   : > { %4150 = vtanh.f32 %v1228_v62  ;;  %v3766_v3 = vmul.f32 -1.442695, %v1228_v62 }
 0x9b9   : > { %4152 = vpow2.f32 %v3765_v2 }
 0x9ba   : > { %4154 = vpow2.f32 %v3766_v3 }
 0x9c3   : > { %v4149_v63 = vpop.eup %4148 }
 0x9c4   : > { %1238 = vrot.lane.b32.xlu1 %v4149_v63, %s4751_s24 }
 0x9c5   : > { %v4151_v1 = vpop.eup %4150 }
 0x9c6   : > { %1262 = vrot.lane.b32.xlu0 %v4151_v1, %s4751_s24  ;;  %v4153_v4 = vpop.eup %4152 }
 0x9c7   : > { %v4155_v7 = vpop.eup %4154  ;;  %v1232_v5 = vadd.f32 1.0, %v4153_v4 }
 0x9c8   : > { %v1256_v6 = vadd.f32 1.0, %v4155_v7 }
 0x9c9   : > { %4156 = vrcp.f32 %v1232_v5 }
 0x9ca   : > { %4158 = vrcp.f32 %v1256_v6 }
 0x9d6   : > { %v4157_v8 = vpop.eup %4156 }
 0x9d7   : > { %v4159_v15 = vpop.eup %4158  ;;  %v1236_v31 = vmul.f32 %v4157_v8, %v5209_v44 }
 0x9d8   : > { %v1260_v35 = vmul.f32 %v4159_v15, %v5213_v47 }
 0xa36   : > { %v1239_v10 = vpop.permute.xlu1 %1238 }
 0xa37   : > { %v1241_v12 = vmul.f32 %v4157_v8, %v1239_v10 }
 0xa38   : > { %v1263_v27 = vpop.permute.xlu0 %1262 }
 0xa39   : > { %1243 = vrot.lane.b32.xlu1 %v1241_v12, %s4750_s19  ;;  %v1265_v28 = vmul.f32 %v4159_v15, %v1263_v27 }
 0xa3b   : > { %1267 = vrot.lane.b32.xlu0 %v1265_v28, %s4750_s19 }
 0xaab   : > { %v1244_v33 = vpop.permute.xlu1 %1243 }
 0xaac   : > { %v5246_v34 = vadd.f32 %v1244_v33, %v1236_v31 }
 0xaad   : > { %v1268_v36 = vpop.permute.xlu0 %1267 }
 0xaae   : > { %4160 = vtanh.f32 %v5246_v34  ;;  %v5250_v37 = vadd.f32 %v1268_v36, %v1260_v35 }
 0xab0   : > { %4162 = vtanh.f32 %v5250_v37 }
 0xabb   : > { %v4161_v38 = vpop.eup %4160 }
 0xabc   : > { %1249 = vrot.lane.b32.xlu1 %v4161_v38, %s4751_s24 }
 0xabd   : > { %v4163_v39 = vpop.eup %4162 }
 0xabe   : > { %1273 = vrot.lane.b32.xlu0 %v4163_v39, %s4751_s24 }
 0xb2e   : > { %v1250_v40 = vpop.permute.xlu1 %1249 }
 0xb2f   : > { %v1252_v41 = vmul.f32 %v4157_v8, %v1250_v40 }
 0xb30   : > { %v1274_v42 = vpop.permute.xlu0 %1273 }
 0xb31   : > { %1278 = vrot.lane.b32.xlu1 %v1252_v41, %s4750_s19  ;;  %v1276_v43 = vmul.f32 %v4159_v15, %v1274_v42 }
 0xb33   : > { %1283 = vrot.lane.b32.xlu0 %v1276_v43, %s4751_s24 }
 0xba3   : > { %v1279_v44 = vpop.permute.xlu1 %1278 }
 0xba4   : > { %1281 = vst.msk [vmem:[#allocation3 + $0x3] sm:$0x1] %vm868_vm2, %v1279_v44 }
 0xba5   : > { %v1284_v45 = vpop.permute.xlu0 %1283 }
 0xba6   : > { %1286 = vst.msk [vmem:[#allocation3 + $0x4] sm:$0x1] %vm874_vm3, %v1284_v45  ;;  %v1287_v46 = vsel %vm638_vm0, %v1279_v44, %v1284_v45 }
 0xba7   : > { %3767 = vmatmul.mubr.msk.f32.vlgmr.msra.gmra.mxu1 %vm733_vm1, %v1287_v46 }
 0xba8   : > { %1582 = vmatpush1.msra.mxu1 %v5032_v9  ;;  %1629 = vmatprep.mubr.f32.mxu1 %v4749_v0 }
 0xba9   : > { %1583 = vmatprep.subr.mxu1 %v5035_v11 }
 0xbaa   : > { %1584 = vmatpush1.msra.mxu1 %v5038_v13 }
 0xbab   : > { %1585 = vmatprep.subr.mxu1 %v5041_v14 }
 0xbac   : > { %1586 = vmatpush1.msra.mxu1 %v5052_v16 }
 0xbad   : > { %1587 = vmatprep.subr.mxu1 %v5057_v17 }
 0xbae   : > { %1588 = vmatpush1.msra.mxu1 %v5061_v18 }
 0xbaf   : > { %1589 = vmatprep.subr.mxu1 %v5065_v19 }
 0xbb0   : > { %1590 = vmatpush1.msra.mxu1 %v5069_v20 }
 0xbb1   : > { %1591 = vmatprep.subr.mxu1 %v5073_v21 }
 0xbb2   : > { %1592 = vmatpush1.msra.mxu1 %v5077_v22 }
 0xbb3   : > { %1593 = vmatprep.subr.mxu1 %v5081_v23 }
 0xbb4   : > { %1594 = vmatpush1.msra.mxu1 %v5085_v24 }
 0xbb5   : > { %1595 = vmatprep.subr.mxu1 %v5089_v25 }
 0xbb6   : > { %1596 = vmatpush1.msra.mxu1 %v5093_v26 }
 0xc67   : > { %v1357_v47 = vpop.f32.mrf.mxu1 }
 0xc68   : > { %v1363_v49 = vadd.f32 %v1362_v48, %v1357_v47 }
 0xc69   : > { %v1359_v50 = vpop.f32.mrf.mxu1 }
 0xc6a   : > { %4164 = vtanh.f32 %v1363_v49  ;;  %v1365_v52 = vadd.f32 %v1364_v51, %v1359_v50  ;;  %v3768_v55 = vmul.f32 -1.442695, %v1363_v49 }
 0xc6c   : > { %4166 = vtanh.f32 %v1365_v52  ;;  %v3769_v56 = vmul.f32 -1.442695, %v1365_v52 }
 0xc6d   : > { %4168 = vpow2.f32 %v3768_v55 }
 0xc6e   : > { %4170 = vpow2.f32 %v3769_v56 }
 0xc77   : > { %v4165_v53 = vpop.eup %4164 }
 0xc78   : > { %1375 = vrot.lane.b32.xlu1 %v4165_v53, %s4751_s24 }
 0xc79   : > { %v4167_v54 = vpop.eup %4166 }
 0xc7a   : > { %1399 = vrot.lane.b32.xlu0 %v4167_v54, %s4751_s24  ;;  %v4169_v57 = vpop.eup %4168 }
 0xc7b   : > { %v4171_v58 = vpop.eup %4170  ;;  %v1369_v59 = vadd.f32 1.0, %v4169_v57 }
 0xc7c   : > { %v1393_v60 = vadd.f32 1.0, %v4171_v58  ;;  %v1636_v58 = vld [vmem:[#allocation2 + $0x6] ss:$0 sm:$0xff] }
 0xc7d   : > { %4172 = vrcp.f32 %v1369_v59 }
 0xc7e   : > { %4174 = vrcp.f32 %v1393_v60 }
 0xc8a   : > { %v4173_v61 = vpop.eup %4172 }
 0xc8b   : > { %v4175_v1 = vpop.eup %4174  ;;  %v1373_v4 = vmul.f32 %v4173_v61, %v5246_v34 }
 0xc8c   : > { %v1397_v6 = vmul.f32 %v4175_v1, %v5250_v37 }
 0xcea   : > { %v1376_v62 = vpop.permute.xlu1 %1375 }
 0xceb   : > { %v1378_v63 = vmul.f32 %v4173_v61, %v1376_v62 }
 0xcec   : > { %v1400_v2 = vpop.permute.xlu0 %1399 }
 0xced   : > { %1380 = vrot.lane.b32.xlu1 %v1378_v63, %s4750_s19  ;;  %v1402_v3 = vmul.f32 %v4175_v1, %v1400_v2 }
 0xcef   : > { %1404 = vrot.lane.b32.xlu0 %v1402_v3, %s4750_s19 }
 0xd5f   : > { %v1381_v7 = vpop.permute.xlu1 %1380 }
 0xd60   : > { %v5282_v5 = vadd.f32 %v1381_v7, %v1373_v4 }
 0xd61   : > { %v1405_v8 = vpop.permute.xlu0 %1404 }
 0xd62   : > { %4176 = vtanh.f32 %v5282_v5  ;;  %v5286_v10 = vadd.f32 %v1405_v8, %v1397_v6 }
 0xd64   : > { %4178 = vtanh.f32 %v5286_v10 }
 0xd6f   : > { %v4177_v12 = vpop.eup %4176 }
 0xd70   : > { %1386 = vrot.lane.b32.xlu1 %v4177_v12, %s4751_s24 }
 0xd71   : > { %v4179_v15 = vpop.eup %4178 }
 0xd72   : > { %1410 = vrot.lane.b32.xlu0 %v4179_v15, %s4751_s24 }
 0xde2   : > { %v1387_v27 = vpop.permute.xlu1 %1386 }
 0xde3   : > { %v1389_v28 = vmul.f32 %v4173_v61, %v1387_v27  ;;  %v1638_v61 = vld [vmem:[#allocation2 + $0x9] ss:$0 sm:$0xff] }
 0xde4   : > { %v1411_v31 = vpop.permute.xlu0 %1410 }
 0xde5   : > { %1415 = vrot.lane.b32.xlu1 %v1389_v28, %s4750_s19  ;;  %v1413_v33 = vmul.f32 %v4175_v1, %v1411_v31 }
 0xde7   : > { %1420 = vrot.lane.b32.xlu0 %v1413_v33, %s4751_s24 }
 0xe57   : > { %v1416_v34 = vpop.permute.xlu1 %1415 }
 0xe58   : > { %1418 = vst.msk [vmem:[#allocation3 + $0x4] sm:$0x1] %vm868_vm2, %v1416_v34 }
 0xe59   : > { %v1421_v35 = vpop.permute.xlu0 %1420 }
 0xe5a   : > { %1423 = vst.msk [vmem:[#allocation3 + $0x3] sm:$0x1] %vm874_vm3, %v1421_v35  ;;  %v1424_v36 = vsel %vm638_vm0, %v1416_v34, %v1421_v35 }
 0xe5b   : > { %3770 = vmatmul.mubr.msk.f32.vlgmr.msra.gmra.mxu0 %vm733_vm1, %v1424_v36 }
 0xe5c   : > { %1719 = vmatpush1.msra.mxu0 %v5032_v9  ;;  %1766 = vmatprep.mubr.f32.mxu0 %v4749_v0 }
 0xe5d   : > { %1720 = vmatprep.subr.mxu0 %v5035_v11  ;;  %v1499_v11 = vld [vmem:[#allocation2 + $0x5] ss:$0 sm:$0xff] }
 0xe5e   : > { %1721 = vmatpush1.msra.mxu0 %v5038_v13 }
 0xe5f   : > { %1722 = vmatprep.subr.mxu0 %v5041_v14 }
 0xe60   : > { %1723 = vmatpush1.msra.mxu0 %v5052_v16  ;;  %v1501_v16 = vld [vmem:[#allocation2 + $0xa] ss:$0 sm:$0xff] }
 0xe61   : > { %1724 = vmatprep.subr.mxu0 %v5057_v17 }
 0xe62   : > { %1725 = vmatpush1.msra.mxu0 %v5061_v18 }
 0xe63   : > { %1726 = vmatprep.subr.mxu0 %v5065_v19 }
 0xe64   : > { %1727 = vmatpush1.msra.mxu0 %v5069_v20 }
 0xe65   : > { %1728 = vmatprep.subr.mxu0 %v5073_v21 }
 0xe66   : > { %1729 = vmatpush1.msra.mxu0 %v5077_v22 }
 0xe67   : > { %1730 = vmatprep.subr.mxu0 %v5081_v23 }
 0xe68   : > { %1731 = vmatpush1.msra.mxu0 %v5085_v24 }
 0xe69   : > { %1732 = vmatprep.subr.mxu0 %v5089_v25 }
 0xe6a   : > { %1733 = vmatpush1.msra.mxu0 %v5093_v26 }
 0xf1b   : > { %v1494_v9 = vpop.f32.mrf.mxu0 }
 0xf1c   : > { %v1500_v13 = vadd.f32 %v1499_v11, %v1494_v9 }
 0xf1d   : > { %v1496_v14 = vpop.f32.mrf.mxu0 }
 0xf1e   : > { %4180 = vtanh.f32 %v1500_v13  ;;  %v1502_v17 = vadd.f32 %v1501_v16, %v1496_v14  ;;  %v3771_v20 = vmul.f32 -1.442695, %v1500_v13 }
 0xf20   : > { %4182 = vtanh.f32 %v1502_v17  ;;  %v3772_v21 = vmul.f32 -1.442695, %v1502_v17 }
 0xf21   : > { %4184 = vpow2.f32 %v3771_v20 }
 0xf22   : > { %4186 = vpow2.f32 %v3772_v21 }
 0xf2b   : > { %v4181_v18 = vpop.eup %4180 }
 0xf2c   : > { %1512 = vrot.lane.b32.xlu1 %v4181_v18, %s4751_s24 }
 0xf2d   : > { %v4183_v19 = vpop.eup %4182 }
 0xf2e   : > { %1536 = vrot.lane.b32.xlu0 %v4183_v19, %s4751_s24  ;;  %v4185_v22 = vpop.eup %4184 }
 0xf2f   : > { %v4187_v23 = vpop.eup %4186  ;;  %v1506_v24 = vadd.f32 1.0, %v4185_v22 }
 0xf30   : > { %v1530_v25 = vadd.f32 1.0, %v4187_v23  ;;  %v1773_v23 = vld [vmem:[#allocation2 + $0x7] ss:$0 sm:$0xff] }
 0xf31   : > { %4188 = vrcp.f32 %v1506_v24 }
 0xf32   : > { %4190 = vrcp.f32 %v1530_v25 }
 0xf3e   : > { %v4189_v26 = vpop.eup %4188 }
 0xf3f   : > { %v4191_v39 = vpop.eup %4190  ;;  %v1510_v42 = vmul.f32 %v4189_v26, %v5282_v5 }
 0xf40   : > { %v1534_v45 = vmul.f32 %v4191_v39, %v5286_v10 }
 0xf9e   : > { %v1513_v37 = vpop.permute.xlu1 %1512 }
 0xf9f   : > { %v1515_v38 = vmul.f32 %v4189_v26, %v1513_v37 }
 0xfa0   : > { %v1537_v40 = vpop.permute.xlu0 %1536 }
 0xfa1   : > { %1517 = vrot.lane.b32.xlu1 %v1515_v38, %s4750_s19  ;;  %v1539_v41 = vmul.f32 %v4191_v39, %v1537_v40 }
 0xfa3   : > { %1541 = vrot.lane.b32.xlu0 %v1539_v41, %s4750_s19 }
0x1013   : > { %v1518_v43 = vpop.permute.xlu1 %1517 }
0x1014   : > { %v1520_v44 = vadd.f32 %v1518_v43, %v1510_v42 }
0x1015   : > { %v1542_v46 = vpop.permute.xlu0 %1541 }
0x1016   : > { %4192 = vtanh.f32 %v1520_v44  ;;  %v1544_v47 = vadd.f32 %v1542_v46, %v1534_v45 }
0x1018   : > { %4194 = vtanh.f32 %v1544_v47 }
0x1023   : > { %v4193_v48 = vpop.eup %4192 }
0x1024   : > { %1523 = vrot.lane.b32.xlu1 %v4193_v48, %s4751_s24 }
0x1025   : > { %v4195_v49 = vpop.eup %4194 }
0x1026   : > { %1547 = vrot.lane.b32.xlu0 %v4195_v49, %s4751_s24 }
0x1096   : > { %v1524_v50 = vpop.permute.xlu1 %1523 }
0x1097   : > { %v1526_v51 = vmul.f32 %v4189_v26, %v1524_v50  ;;  %v1775_v26 = vld [vmem:[#allocation2 + $0x8] ss:$0 sm:$0xff] }
0x1098   : > { %v1548_v52 = vpop.permute.xlu0 %1547 }
0x1099   : > { %1552 = vrot.lane.b32.xlu1 %v1526_v51, %s4750_s19  ;;  %v1550_v53 = vmul.f32 %v4191_v39, %v1548_v52 }
0x109b   : > { %1557 = vrot.lane.b32.xlu0 %v1550_v53, %s4751_s24 }
0x110b   : > { %v1553_v54 = vpop.permute.xlu1 %1552 }
0x110c   : > { %1555 = vst.msk [vmem:[#allocation3 + $0x5] sm:$0x1] %vm868_vm2, %v1553_v54 }
0x110d   : > { %v1558_v55 = vpop.permute.xlu0 %1557 }
0x110e   : > { %1560 = vst.msk [vmem:[#allocation3 + $0x2] sm:$0x1] %vm874_vm3, %v1558_v55  ;;  %v1561_v56 = vsel %vm638_vm0, %v1553_v54, %v1558_v55 }
0x110f   : > { %3773 = vmatmul.mubr.msk.f32.vlgmr.msra.gmra.mxu1 %vm733_vm1, %v1561_v56 }
0x1110   : > { %1931 = vmatprep.mubr.f32.mxu1 %v4749_v0 }
0x11cf   : > { %v1631_v57 = vpop.f32.mrf.mxu1 }
0x11d0   : > { %v1637_v59 = vadd.f32 %v1636_v58, %v1631_v57  ;;  %v1851_v58 = vld [vmem:[#allocation10 + $0x78] sm:$0xff] }
0x11d1   : > { %v1633_v60 = vpop.f32.mrf.mxu1  ;;  %1883 = vmatprep.subr.mxu1 %v1851_v58 }
0x11d2   : > { %4196 = vtanh.f32 %v1637_v59  ;;  %v1639_v62 = vadd.f32 %v1638_v61, %v1633_v60  ;;  %v3774_v2 = vmul.f32 -1.442695, %v1637_v59  ;;  %v1850_v59 = vld [vmem:[#allocation10 + $0x70] sm:$0xff]  ;;  %v1849_v60 = vld [vmem:[#allocation10 + $0x68] sm:$0xff]  ;;  %v1848_v61 = vld [vmem:[#allocation10 + $0x60] sm:$0xff] }
0x11d3   : > { %1884 = vmatpush1.msra.mxu1 %v1850_v59 }
0x11d4   : > { %4198 = vtanh.f32 %v1639_v62  ;;  %v3775_v3 = vmul.f32 -1.442695, %v1639_v62  ;;  %v1847_v62 = vld [vmem:[#allocation10 + $0x58] sm:$0xff]  ;;  %1885 = vmatprep.subr.mxu1 %v1849_v60 }
0x11d5   : > { %4200 = vpow2.f32 %v3774_v2  ;;  %1886 = vmatpush1.msra.mxu1 %v1848_v61 }
0x11d6   : > { %4202 = vpow2.f32 %v3775_v3  ;;  %1887 = vmatprep.subr.mxu1 %v1847_v62  ;;  %v1845_v3 = vld [vmem:[#allocation10 + $0x48] sm:$0xff] }
0x11df   : > { %v4197_v63 = vpop.eup %4196 }
0x11e0   : > { %1649 = vrot.lane.b32.xlu1 %v4197_v63, %s4751_s24  ;;  %v1846_v63 = vld [vmem:[#allocation10 + $0x50] sm:$0xff] }
0x11e1   : > { %v4199_v1 = vpop.eup %4198  ;;  %1888 = vmatpush1.msra.mxu1 %v1846_v63 }
0x11e2   : > { %1673 = vrot.lane.b32.xlu0 %v4199_v1, %s4751_s24  ;;  %v4201_v4 = vpop.eup %4200  ;;  %1889 = vmatprep.subr.mxu1 %v1845_v3 }
0x11e3   : > { %v4203_v7 = vpop.eup %4202  ;;  %v1643_v5 = vadd.f32 1.0, %v4201_v4  ;;  %v1844_v4 = vld [vmem:[#allocation10 + $0x40] sm:$0xff] }
0x11e4   : > { %v1667_v6 = vadd.f32 1.0, %v4203_v7  ;;  %1890 = vmatpush1.msra.mxu1 %v1844_v4  ;;  %v1843_v7 = vld [vmem:[#allocation10 + $0x38] sm:$0xff] }
0x11e5   : > { %4204 = vrcp.f32 %v1643_v5  ;;  %v5355_v5 = vld [vmem:[#allocation11 + $0x78] sm:$0xff]  ;;  %1891 = vmatprep.subr.mxu1 %v1843_v7 }
0x11e6   : > { %4206 = vrcp.f32 %v1667_v6  ;;  %1977 = vmatprep.subr.mxu0 %v5355_v5  ;;  %v1842_v6 = vld [vmem:[#allocation10 + $0x30] sm:$0xff] }
0x11e7   : > { %1892 = vmatpush1.msra.mxu1 %v1842_v6 }
0x11f2   : > { %v4205_v8 = vpop.eup %4204 }
0x11f3   : > { %v4207_v15 = vpop.eup %4206  ;;  %v1647_v31 = vmul.f32 %v4205_v8, %v1520_v44 }
0x11f4   : > { %v1671_v35 = vmul.f32 %v4207_v15, %v1544_v47 }
0x1252   : > { %v1650_v10 = vpop.permute.xlu1 %1649 }
0x1253   : > { %v1652_v12 = vmul.f32 %v4205_v8, %v1650_v10  ;;  %v1841_v10 = vld [vmem:[#allocation10 + $0x28] sm:$0xff] }
0x1254   : > { %v1674_v27 = vpop.permute.xlu0 %1673  ;;  %1893 = vmatprep.subr.mxu1 %v1841_v10 }
0x1255   : > { %1654 = vrot.lane.b32.xlu1 %v1652_v12, %s4750_s19  ;;  %v1676_v28 = vmul.f32 %v4207_v15, %v1674_v27  ;;  %v5361_v12 = vld [vmem:[#allocation11 + $0x68] sm:$0xff]  ;;  %v5363_v27 = vld [vmem:[#allocation11 + $0x60] sm:$0xff] }
0x1257   : > { %1678 = vrot.lane.b32.xlu0 %v1676_v28, %s4750_s19  ;;  %v1839_v28 = vld [vmem:[#allocation10 + $0x18] sm:$0xff] }
0x12c7   : > { %v1655_v33 = vpop.permute.xlu1 %1654 }
0x12c8   : > { %v1657_v34 = vadd.f32 %v1655_v33, %v1647_v31  ;;  %v5366_v31 = vld [vmem:[#allocation11 + $0x58] sm:$0xff]  ;;  %v1838_v33 = vld [vmem:[#allocation10 + $0x10] sm:$0xff] }
0x12c9   : > { %v1679_v36 = vpop.permute.xlu0 %1678 }
0x12ca   : > { %4208 = vtanh.f32 %v1657_v34  ;;  %v1681_v9 = vadd.f32 %v1679_v36, %v1671_v35  ;;  %v1837_v35 = vld [vmem:[#allocation10 + $0x8] sm:$0xff] }
0x12cb   : > { %v5371_v36 = vld [vmem:[#allocation11 + $0x48] sm:$0xff] }
0x12cc   : > { %4210 = vtanh.f32 %v1681_v9 }
0x12d7   : > { %v4209_v11 = vpop.eup %4208 }
0x12d8   : > { %1660 = vrot.lane.b32.xlu1 %v4209_v11, %s4751_s24  ;;  %v5374_v11 = vld [vmem:[#allocation11 + $0x40] sm:$0xff] }
0x12d9   : > { %v4211_v13 = vpop.eup %4210 }
0x12da   : > { %1684 = vrot.lane.b32.xlu0 %v4211_v13, %s4751_s24 }
0x134a   : > { %v1661_v14 = vpop.permute.xlu1 %1660 }
0x134b   : > { %v1663_v16 = vmul.f32 %v4205_v8, %v1661_v14  ;;  %v5358_v8 = vld [vmem:[#allocation11 + $0x70] sm:$0xff]  ;;  %v5379_v14 = vld [vmem:[#allocation11 + $0x38] sm:$0xff] }
0x134c   : > { %v1685_v17 = vpop.permute.xlu0 %1684 }
0x134d   : > { %1689 = vrot.lane.b32.xlu1 %v1663_v16, %s4750_s19  ;;  %v1687_v18 = vmul.f32 %v4207_v15, %v1685_v17  ;;  %v1840_v15 = vld [vmem:[#allocation10 + $0x20] sm:$0xff]  ;;  %v5383_v17 = vld [vmem:[#allocation11 + $0x30] sm:$0xff] }
0x134e   : > { %1894 = vmatpush1.msra.mxu1 %v1840_v15 }
0x134f   : > { %1694 = vrot.lane.b32.xlu0 %v1687_v18, %s4751_s24  ;;  %1895 = vmatprep.subr.mxu1 %v1839_v28  ;;  %v5385_v18 = vld [vmem:[#allocation11 + $0x28] sm:$0xff] }
0x1350   : > { %1896 = vmatpush1.msra.mxu1 %v1838_v33 }
0x1351   : > { %1897 = vmatprep.subr.mxu1 %v1837_v35 }
0x13bf   : > { %v1690_v19 = vpop.permute.xlu1 %1689 }
0x13c0   : > { %1692 = vst.msk [vmem:[#allocation3 + $0x6] sm:$0x1] %vm868_vm2, %v1690_v19 }
0x13c1   : > { %v1695_v20 = vpop.permute.xlu0 %1694 }
0x13c2   : > { %1697 = vst.msk [vmem:[#allocation3 + $0x1] sm:$0x1] %vm874_vm3, %v1695_v20  ;;  %v1698_v21 = vsel %vm638_vm0, %v1690_v19, %v1695_v20  ;;  %v5387_v19 = vld [vmem:[#allocation11 + $0x20] sm:$0xff]  ;;  %v5391_v20 = vld [vmem:[#allocation11 + $0x18] sm:$0xff] }
0x13c3   : > { %3776 = vmatmul.mubr.msk.f32.vlgmr.msra.gmra.mxu0 %vm733_vm1, %v1698_v21 }
0x13c4   : > { %2025 = vmatprep.mubr.f32.mxu0 %v4749_v0  ;;  %1978 = vmatpush1.msra.mxu0 %v5358_v8 }
0x13c5   : > { %1979 = vmatprep.subr.mxu0 %v5361_v12 }
0x13c6   : > { %1980 = vmatpush1.msra.mxu0 %v5363_v27 }
0x13c7   : > { %1981 = vmatprep.subr.mxu0 %v5366_v31 }
0x1483   : > { %v1768_v22 = vpop.f32.mrf.mxu0 }
0x1484   : > { %v1774_v24 = vadd.f32 %v1773_v23, %v1768_v22  ;;  %v5395_v22 = vld [vmem:[#allocation11 + $0x10] sm:$0xff] }
0x1485   : > { %v1770_v25 = vpop.f32.mrf.mxu0 }
0x1486   : > { %4212 = vtanh.f32 %v1774_v24  ;;  %v1776_v37 = vadd.f32 %v1775_v26, %v1770_v25  ;;  %v3777_v40 = vmul.f32 -1.442695, %v1774_v24  ;;  %v5399_v24 = vld [vmem:[#allocation11 + $0x8] sm:$0xff]  ;;  %v5402_v25 = vld [vmem:[#allocation11] sm:$0xff] }
0x1487   : > { %v1956_v26 = vld [vmem:[#allocation13 + $0x1] sm:$0x1] }
0x1488   : > { %4214 = vtanh.f32 %v1776_v37  ;;  %v3778_v41 = vmul.f32 -1.442695, %v1776_v37 }
0x1489   : > { %4216 = vpow2.f32 %v3777_v40  ;;  %v1852_v40 = vld [vmem:[%s5779_s6] sm:$0x3] }
0x148a   : > { %4218 = vpow2.f32 %v3778_v41  ;;  %v1857_v41 = vrot.slane %v1852_v40, %v630_v30  ;;  %v1957_v30 = vld [vmem:[#allocation14 + $0x1] sm:$0x1] }
0x1493   : > { %v4213_v38 = vpop.eup %4212 }
0x1494   : > { %1786 = vrot.lane.b32.xlu1 %v4213_v38, %s4751_s24 }
0x1495   : > { %v4215_v39 = vpop.eup %4214 }
0x1496   : > { %1810 = vrot.lane.b32.xlu0 %v4215_v39, %s4751_s24  ;;  %v4217_v42 = vpop.eup %4216 }
0x1497   : > { %v4219_v43 = vpop.eup %4218  ;;  %v1780_v44 = vadd.f32 1.0, %v4217_v42  ;;  %v1861_v42 = vrot.slane %v1852_v40, %v634_v32 }
0x1498   : > { %v1804_v45 = vadd.f32 1.0, %v4219_v43 }
0x1499   : > { %4220 = vrcp.f32 %v1780_v44 }
0x149a   : > { %4222 = vrcp.f32 %v1804_v45 }
0x14a6   : > { %v5343_v46 = vpop.eup %4220 }
0x14a7   : > { %v5346_v49 = vpop.eup %4222  ;;  %v1784_v52 = vmul.f32 %v5343_v46, %v1657_v34  ;;  %v5369_v34 = vld [vmem:[#allocation11 + $0x50] sm:$0xff] }
0x14a8   : > { %v1808_v55 = vmul.f32 %v5346_v49, %v1681_v9  ;;  %v1836_v9 = vld [vmem:[#allocation10] sm:$0xff]  ;;  %1982 = vmatpush1.msra.mxu0 %v5369_v34 }
0x14a9   : > { %1983 = vmatprep.subr.mxu0 %v5371_v36  ;;  %1898 = vmatpush1.msra.mxu1 %v1836_v9 }
0x14aa   : > { %1984 = vmatpush1.msra.mxu0 %v5374_v11  ;;  %2118 = vmatprep.subr.mxu1 %v5355_v5 }
0x14ab   : > { %1985 = vmatprep.subr.mxu0 %v5379_v14 }
0x14ac   : > { %1986 = vmatpush1.msra.mxu0 %v5383_v17 }
0x14ad   : > { %1987 = vmatprep.subr.mxu0 %v5385_v18 }
0x14ae   : > { %1988 = vmatpush1.msra.mxu0 %v5387_v19 }
0x14af   : > { %1989 = vmatprep.subr.mxu0 %v5391_v20 }
0x14b0   : > { %1990 = vmatpush1.msra.mxu0 %v5395_v22 }
0x14b1   : > { %1991 = vmatprep.subr.mxu0 %v5399_v24 }
0x14b2   : > { %1992 = vmatpush1.msra.mxu0 %v5402_v25 }
0x14b3   : > { %3780 = vmatmul.mubr.msk.f32.vlgmr.msra.gmra.mxu0 %vm733_vm1, %v1956_v26  ;;  %2255 = vmatprep.subr.mxu0 %v5355_v5 }
0x14b4   : > { %2256 = vmatpush1.msra.mxu0 %v5358_v8  ;;  %2303 = vmatprep.mubr.f32.mxu0 %v4749_v0 }
0x14b5   : > { %2257 = vmatprep.subr.mxu0 %v5361_v12 }
0x14b6   : > { %2258 = vmatpush1.msra.mxu0 %v5363_v27 }
0x14b7   : > { %2259 = vmatprep.subr.mxu0 %v5366_v31 }
0x14b8   : > { %2260 = vmatpush1.msra.mxu0 %v5369_v34 }
0x14b9   : > { %2261 = vmatprep.subr.mxu0 %v5371_v36 }
0x14ba   : > { %2262 = vmatpush1.msra.mxu0 %v5374_v11 }
0x14bb   : > { %2263 = vmatprep.subr.mxu0 %v5379_v14 }
0x14bc   : > { %2264 = vmatpush1.msra.mxu0 %v5383_v17 }
0x14bd   : > { %2265 = vmatprep.subr.mxu0 %v5385_v18 }
0x14be   : > { %2266 = vmatpush1.msra.mxu0 %v5387_v19 }
0x14bf   : > { %2267 = vmatprep.subr.mxu0 %v5391_v20 }
0x14c0   : > { %2268 = vmatpush1.msra.mxu0 %v5395_v22 }
0x14c1   : > { %2269 = vmatprep.subr.mxu0 %v5399_v24 }
0x14c2   : > { %2270 = vmatpush1.msra.mxu0 %v5402_v25 }
0x14c3   : > { %2529 = vmatprep.subr.mxu0 %v5355_v5 }
0x1506   : > { %v1787_v47 = vpop.permute.xlu1 %1786 }
0x1507   : > { %v1789_v48 = vmul.f32 %v5343_v46, %v1787_v47 }
0x1508   : > { %v1811_v50 = vpop.permute.xlu0 %1810 }
0x1509   : > { %1791 = vrot.lane.b32.xlu1 %v1789_v48, %s4750_s19  ;;  %v1813_v51 = vmul.f32 %v5346_v49, %v1811_v50 }
0x150b   : > { %1815 = vrot.lane.b32.xlu0 %v1813_v51, %s4750_s19 }
0x1573   : > { %v2027_v47 = vpop.f32.mrf.mxu0 }
0x1575   : > { %v2029_v50 = vpop.f32.mrf.mxu0 }
0x157b   : > { %v1792_v53 = vpop.permute.xlu1 %1791 }
0x157c   : > { %v1794_v54 = vadd.f32 %v1792_v53, %v1784_v52 }
0x157d   : > { %v1816_v56 = vpop.permute.xlu0 %1815 }
0x157e   : > { %4224 = vtanh.f32 %v1794_v54  ;;  %v1818_v57 = vadd.f32 %v1816_v56, %v1808_v55 }
0x1580   : > { %4226 = vtanh.f32 %v1818_v57 }
0x158b   : > { %v4225_v1 = vpop.eup %4224 }
0x158c   : > { %1797 = vrot.lane.b32.xlu1 %v4225_v1, %s4751_s24 }
0x158d   : > { %v4227_v2 = vpop.eup %4226 }
0x158e   : > { %1821 = vrot.lane.b32.xlu0 %v4227_v2, %s4751_s24 }
0x15fe   : > { %v1798_v13 = vpop.permute.xlu1 %1797 }
0x15ff   : > { %v1800_v16 = vmul.f32 %v5343_v46, %v1798_v13 }
0x1600   : > { %v1822_v21 = vpop.permute.xlu0 %1821 }
0x1601   : > { %1826 = vrot.lane.b32.xlu1 %v1800_v16, %s4750_s19  ;;  %v1824_v23 = vmul.f32 %v5346_v49, %v1822_v21 }
0x1603   : > { %1831 = vrot.lane.b32.xlu0 %v1824_v23, %s4751_s24 }
0x1673   : > { %v1827_v37 = vpop.permute.xlu1 %1826 }
0x1674   : > { %1829 = vst.msk [vmem:[#allocation3 + $0x7] sm:$0x1] %vm868_vm2, %v1827_v37 }
0x1675   : > { %v1832_v38 = vpop.permute.xlu0 %1831 }
0x1676   : > { %1834 = vst.msk [vmem:[#allocation3] sm:$0x1] %vm874_vm3, %v1832_v38 }
0x167d   : > { %v1835_v39 = vld [vmem:[#allocation3] sm:$0xff] }
0x167e   : > { %3779 = vmatmul.mubr.msk.f32.vlgmr.msra.gmra.mxu1 %vm733_vm1, %v1835_v39 }
0x167f   : > { %2119 = vmatpush1.msra.mxu1 %v5358_v8  ;;  %2166 = vmatprep.mubr.f32.mxu1 %v4749_v0 }
0x1680   : > { %2120 = vmatprep.subr.mxu1 %v5361_v12 }
0x1681   : > { %2121 = vmatpush1.msra.mxu1 %v5363_v27 }
0x1682   : > { %2122 = vmatprep.subr.mxu1 %v5366_v31 }
0x1683   : > { %2123 = vmatpush1.msra.mxu1 %v5369_v34 }
0x1684   : > { %2124 = vmatprep.subr.mxu1 %v5371_v36 }
0x1685   : > { %2125 = vmatpush1.msra.mxu1 %v5374_v11 }
0x1686   : > { %2126 = vmatprep.subr.mxu1 %v5379_v14 }
0x1687   : > { %2127 = vmatpush1.msra.mxu1 %v5383_v17 }
0x1688   : > { %2128 = vmatprep.subr.mxu1 %v5385_v18 }
0x1689   : > { %2129 = vmatpush1.msra.mxu1 %v5387_v19 }
0x168a   : > { %2130 = vmatprep.subr.mxu1 %v5391_v20 }
0x168b   : > { %2131 = vmatpush1.msra.mxu1 %v5395_v22 }
0x168c   : > { %2132 = vmatprep.subr.mxu1 %v5399_v24 }
0x168d   : > { %2133 = vmatpush1.msra.mxu1 %v5402_v25 }
0x168e   : > { %2392 = vmatprep.subr.mxu1 %v5355_v5 }
0x173e   : > { %v1933_v43 = vpop.f32.mrf.mxu1 }
0x173f   : > { %v1934_v44 = vadd.f32 %v1933_v43, %v1857_v41 }
0x1740   : > { %v1935_v45 = vpop.f32.mrf.mxu1 }
0x1741   : > { %1938 = vst [vmem:[#allocation2] sm:$0xff] %v1934_v44  ;;  %v1936_v46 = vadd.f32 %v1935_v45, %v1861_v42 }
0x1743   : > { %1939 = vst [vmem:[#allocation2 + $0x8] sm:$0xff] %v1936_v46 }
0x1748   : > { %v2032_v48 = vld [vmem:[#allocation2] ss:$0 sm:$0xff]  ;;  %v2173_v38 = vld [vmem:[#allocation2 + $0x1] ss:$0 sm:$0xff] }
0x1749   : > { %v2033_v49 = vadd.f32 %v2032_v48, %v2027_v47 }
0x174a   : > { %v2034_v51 = vld [vmem:[#allocation2 + $0xf] ss:$0 sm:$0xff]  ;;  %v2175_v41 = vld [vmem:[#allocation2 + $0xe] ss:$0 sm:$0xff] }
0x174b   : > { %4228 = vtanh.f32 %v2033_v49  ;;  %v2035_v52 = vadd.f32 %v2034_v51, %v2029_v50  ;;  %v3781_v32 = vmul.f32 -1.442695, %v2033_v49 }
0x174d   : > { %4230 = vtanh.f32 %v2035_v52  ;;  %v3782_v54 = vmul.f32 -1.442695, %v2035_v52 }
0x174e   : > { %4232 = vpow2.f32 %v3781_v32 }
0x174f   : > { %4234 = vpow2.f32 %v3782_v54 }
0x1758   : > { %v4229_v53 = vpop.eup %4228 }
0x1759   : > { %2049 = vrot.lane.b32.xlu1 %v4229_v53, %s4751_s24 }
0x175a   : > { %v4231_v29 = vpop.eup %4230 }
0x175b   : > { %2073 = vrot.lane.b32.xlu0 %v4231_v29, %s4751_s24  ;;  %v4233_v55 = vpop.eup %4232 }
0x175c   : > { %v4235_v56 = vpop.eup %4234  ;;  %v2039_v57 = vadd.f32 1.0, %v4233_v55 }
0x175d   : > { %2044 = vrot.lane.b32.xlu1 %v1957_v30, %s4750_s19  ;;  %v2067_v58 = vadd.f32 1.0, %v4235_v56 }
0x175e   : > { %4236 = vrcp.f32 %v2039_v57 }
0x175f   : > { %4238 = vrcp.f32 %v2067_v58 }
0x176b   : > { %v4237_v59 = vpop.eup %4236 }
0x176c   : > { %v4239_v62 = vpop.eup %4238 }
0x176d   : > { %v2071_v6 = vmul.f32 %v4239_v62, %v1957_v30 }
0x17cb   : > { %v2050_v60 = vpop.permute.xlu1 %2049 }
0x17cc   : > { %v2052_v61 = vmul.f32 %v4237_v59, %v2050_v60 }
0x17cd   : > { %v2074_v63 = vpop.permute.xlu0 %2073 }
0x17ce   : > { %2054 = vrot.lane.b32.xlu0 %v2052_v61, %s4750_s19  ;;  %v2076_v1 = vmul.f32 %v4239_v62, %v2074_v63 }
0x17cf   : > { %v2045_v2 = vpop.permute.xlu1 %2044 }
0x17d0   : > { %2078 = vrot.lane.b32.xlu1 %v2076_v1, %s4750_s19  ;;  %v2047_v3 = vmul.f32 %v4237_v59, %v2045_v2 }
0x1840   : > { %v2055_v4 = vpop.permute.xlu0 %2054 }
0x1841   : > { %v5459_v7 = vadd.f32 %v2055_v4, %v2047_v3 }
0x1842   : > { %v2079_v10 = vpop.permute.xlu1 %2078 }
0x1843   : > { %4240 = vtanh.f32 %v5459_v7  ;;  %v5462_v15 = vadd.f32 %v2079_v10, %v2071_v6  ;;  %v2310_v10 = vld [vmem:[#allocation2 + $0x2] ss:$0 sm:$0xff] }
0x1845   : > { %4242 = vtanh.f32 %v5462_v15 }
0x1850   : > { %v4241_v28 = vpop.eup %4240 }
0x1851   : > { %2060 = vrot.lane.b32.xlu0 %v4241_v28, %s4751_s24 }
0x1852   : > { %v4243_v33 = vpop.eup %4242 }
0x1853   : > { %2084 = vrot.lane.b32.xlu1 %v4243_v33, %s4751_s24  ;;  %v2312_v33 = vld [vmem:[#allocation2 + $0xd] ss:$0 sm:$0xff] }
0x18c3   : > { %v2061_v35 = vpop.permute.xlu0 %2060 }
0x18c4   : > { %v2063_v9 = vmul.f32 %v4237_v59, %v2061_v35 }
0x18c5   : > { %v2085_v13 = vpop.permute.xlu1 %2084 }
0x18c6   : > { %2089 = vrot.lane.b32.xlu0 %v2063_v9, %s4750_s19  ;;  %v2087_v16 = vmul.f32 %v4239_v62, %v2085_v13 }
0x18c8   : > { %2094 = vrot.lane.b32.xlu1 %v2087_v16, %s4751_s24 }
0x1938   : > { %v2090_v21 = vpop.permute.xlu0 %2089 }
0x1939   : > { %2092 = vst.msk [vmem:[#allocation4] sm:$0x1] %vm868_vm2, %v2090_v21 }
0x193a   : > { %v2095_v23 = vpop.permute.xlu1 %2094 }
0x193b   : > { %2097 = vst.msk [vmem:[#allocation4 + $0x7] sm:$0x1] %vm874_vm3, %v2095_v23  ;;  %v2098_v26 = vsel %vm638_vm0, %v2090_v21, %v2095_v23 }
0x193c   : > { %3783 = vmatmul.mubr.msk.f32.vlgmr.msra.gmra.mxu1 %vm733_vm1, %v2098_v26 }
0x193d   : > { %2393 = vmatpush1.msra.mxu1 %v5358_v8  ;;  %2440 = vmatprep.mubr.f32.mxu1 %v4749_v0 }
0x193e   : > { %2394 = vmatprep.subr.mxu1 %v5361_v12 }
0x193f   : > { %2395 = vmatpush1.msra.mxu1 %v5363_v27 }
0x1940   : > { %2396 = vmatprep.subr.mxu1 %v5366_v31 }
0x1941   : > { %2397 = vmatpush1.msra.mxu1 %v5369_v34 }
0x1942   : > { %2398 = vmatprep.subr.mxu1 %v5371_v36 }
0x1943   : > { %2399 = vmatpush1.msra.mxu1 %v5374_v11 }
0x1944   : > { %2400 = vmatprep.subr.mxu1 %v5379_v14 }
0x1945   : > { %2401 = vmatpush1.msra.mxu1 %v5383_v17 }
0x1946   : > { %2402 = vmatprep.subr.mxu1 %v5385_v18 }
0x1947   : > { %2403 = vmatpush1.msra.mxu1 %v5387_v19 }
0x1948   : > { %2404 = vmatprep.subr.mxu1 %v5391_v20 }
0x1949   : > { %2405 = vmatpush1.msra.mxu1 %v5395_v22 }
0x194a   : > { %2406 = vmatprep.subr.mxu1 %v5399_v24 }
0x194b   : > { %2407 = vmatpush1.msra.mxu1 %v5402_v25 }
0x194c   : > { %2666 = vmatprep.subr.mxu1 %v5355_v5 }
0x19fc   : > { %v2168_v37 = vpop.f32.mrf.mxu1 }
0x19fd   : > { %v2174_v39 = vadd.f32 %v2173_v38, %v2168_v37 }
0x19fe   : > { %v2170_v40 = vpop.f32.mrf.mxu1 }
0x19ff   : > { %4244 = vtanh.f32 %v2174_v39  ;;  %v2176_v42 = vadd.f32 %v2175_v41, %v2170_v40  ;;  %v3784_v45 = vmul.f32 -1.442695, %v2174_v39 }
0x1a01   : > { %4246 = vtanh.f32 %v2176_v42  ;;  %v3785_v46 = vmul.f32 -1.442695, %v2176_v42 }
0x1a02   : > { %4248 = vpow2.f32 %v3784_v45 }
0x1a03   : > { %4250 = vpow2.f32 %v3785_v46 }
0x1a0c   : > { %v4245_v43 = vpop.eup %4244 }
0x1a0d   : > { %2186 = vrot.lane.b32.xlu0 %v4245_v43, %s4751_s24 }
0x1a0e   : > { %v4247_v44 = vpop.eup %4246 }
0x1a0f   : > { %2210 = vrot.lane.b32.xlu1 %v4247_v44, %s4751_s24  ;;  %v4249_v47 = vpop.eup %4248 }
0x1a10   : > { %v4251_v48 = vpop.eup %4250  ;;  %v2180_v49 = vadd.f32 1.0, %v4249_v47 }
0x1a11   : > { %v2204_v50 = vadd.f32 1.0, %v4251_v48 }
0x1a12   : > { %4252 = vrcp.f32 %v2180_v49 }
0x1a13   : > { %4254 = vrcp.f32 %v2204_v50 }
0x1a1f   : > { %v4253_v51 = vpop.eup %4252 }
0x1a20   : > { %v4255_v30 = vpop.eup %4254  ;;  %v2184_v54 = vmul.f32 %v4253_v51, %v5459_v7 }
0x1a21   : > { %v2208_v57 = vmul.f32 %v4255_v30, %v5462_v15 }
0x1a7f   : > { %v2187_v52 = vpop.permute.xlu0 %2186 }
0x1a80   : > { %v2189_v53 = vmul.f32 %v4253_v51, %v2187_v52 }
0x1a81   : > { %v2211_v29 = vpop.permute.xlu1 %2210 }
0x1a82   : > { %2191 = vrot.lane.b32.xlu0 %v2189_v53, %s4750_s19  ;;  %v2213_v32 = vmul.f32 %v4255_v30, %v2211_v29 }
0x1a84   : > { %2215 = vrot.lane.b32.xlu1 %v2213_v32, %s4750_s19 }
0x1af4   : > { %v2192_v55 = vpop.permute.xlu0 %2191 }
0x1af5   : > { %v5495_v56 = vadd.f32 %v2192_v55, %v2184_v54 }
0x1af6   : > { %v2216_v58 = vpop.permute.xlu1 %2215 }
0x1af7   : > { %4256 = vtanh.f32 %v5495_v56  ;;  %v5499_v59 = vadd.f32 %v2216_v58, %v2208_v57  ;;  %v2447_v58 = vld [vmem:[#allocation2 + $0x3] ss:$0 sm:$0xff] }
0x1af9   : > { %4258 = vtanh.f32 %v5499_v59 }
0x1b04   : > { %v4257_v60 = vpop.eup %4256 }
0x1b05   : > { %2197 = vrot.lane.b32.xlu0 %v4257_v60, %s4751_s24 }
0x1b06   : > { %v4259_v61 = vpop.eup %4258 }
0x1b07   : > { %2221 = vrot.lane.b32.xlu1 %v4259_v61, %s4751_s24  ;;  %v2449_v61 = vld [vmem:[#allocation2 + $0xc] ss:$0 sm:$0xff] }
0x1b77   : > { %v2198_v62 = vpop.permute.xlu0 %2197 }
0x1b78   : > { %v2200_v63 = vmul.f32 %v4253_v51, %v2198_v62 }
0x1b79   : > { %v2222_v1 = vpop.permute.xlu1 %2221 }
0x1b7a   : > { %2226 = vrot.lane.b32.xlu0 %v2200_v63, %s4750_s19  ;;  %v2224_v2 = vmul.f32 %v4255_v30, %v2222_v1 }
0x1b7c   : > { %2231 = vrot.lane.b32.xlu1 %v2224_v2, %s4751_s24 }
0x1bec   : > { %v2227_v3 = vpop.permute.xlu0 %2226 }
0x1bed   : > { %2229 = vst.msk [vmem:[#allocation4 + $0x1] sm:$0x1] %vm868_vm2, %v2227_v3 }
0x1bee   : > { %v2232_v4 = vpop.permute.xlu1 %2231 }
0x1bef   : > { %2234 = vst.msk [vmem:[#allocation4 + $0x6] sm:$0x1] %vm874_vm3, %v2232_v4  ;;  %v2235_v7 = vsel %vm638_vm0, %v2227_v3, %v2232_v4 }
0x1bf0   : > { %3786 = vmatmul.mubr.msk.f32.vlgmr.msra.gmra.mxu0 %vm733_vm1, %v2235_v7 }
0x1bf1   : > { %2530 = vmatpush1.msra.mxu0 %v5358_v8  ;;  %2577 = vmatprep.mubr.f32.mxu0 %v4749_v0 }
0x1bf2   : > { %2531 = vmatprep.subr.mxu0 %v5361_v12 }
0x1bf3   : > { %2532 = vmatpush1.msra.mxu0 %v5363_v27 }
0x1bf4   : > { %2533 = vmatprep.subr.mxu0 %v5366_v31 }
0x1bf5   : > { %2534 = vmatpush1.msra.mxu0 %v5369_v34 }
0x1bf6   : > { %2535 = vmatprep.subr.mxu0 %v5371_v36 }
0x1bf7   : > { %2536 = vmatpush1.msra.mxu0 %v5374_v11 }
0x1bf8   : > { %2537 = vmatprep.subr.mxu0 %v5379_v14 }
0x1bf9   : > { %2538 = vmatpush1.msra.mxu0 %v5383_v17 }
0x1bfa   : > { %2539 = vmatprep.subr.mxu0 %v5385_v18 }
0x1bfb   : > { %2540 = vmatpush1.msra.mxu0 %v5387_v19 }
0x1bfc   : > { %2541 = vmatprep.subr.mxu0 %v5391_v20 }
0x1bfd   : > { %2542 = vmatpush1.msra.mxu0 %v5395_v22 }
0x1bfe   : > { %2543 = vmatprep.subr.mxu0 %v5399_v24 }
0x1bff   : > { %2544 = vmatpush1.msra.mxu0 %v5402_v25 }
0x1c00   : > { %2803 = vmatprep.subr.mxu0 %v5355_v5 }
0x1cb0   : > { %v2305_v6 = vpop.f32.mrf.mxu0 }
0x1cb1   : > { %v2311_v15 = vadd.f32 %v2310_v10, %v2305_v6 }
0x1cb2   : > { %v2307_v28 = vpop.f32.mrf.mxu0 }
0x1cb3   : > { %4260 = vtanh.f32 %v2311_v15  ;;  %v2313_v35 = vadd.f32 %v2312_v33, %v2307_v28  ;;  %v3787_v16 = vmul.f32 -1.442695, %v2311_v15 }
0x1cb5   : > { %4262 = vtanh.f32 %v2313_v35  ;;  %v3788_v21 = vmul.f32 -1.442695, %v2313_v35 }
0x1cb6   : > { %4264 = vpow2.f32 %v3787_v16 }
0x1cb7   : > { %4266 = vpow2.f32 %v3788_v21 }
0x1cc0   : > { %v4261_v9 = vpop.eup %4260 }
0x1cc1   : > { %2323 = vrot.lane.b32.xlu0 %v4261_v9, %s4751_s24 }
0x1cc2   : > { %v4263_v13 = vpop.eup %4262 }
0x1cc3   : > { %2347 = vrot.lane.b32.xlu1 %v4263_v13, %s4751_s24  ;;  %v4265_v23 = vpop.eup %4264 }
0x1cc4   : > { %v4267_v26 = vpop.eup %4266  ;;  %v2317_v37 = vadd.f32 1.0, %v4265_v23 }
0x1cc5   : > { %v2341_v38 = vadd.f32 1.0, %v4267_v26 }
0x1cc6   : > { %4268 = vrcp.f32 %v2317_v37 }
0x1cc7   : > { %4270 = vrcp.f32 %v2341_v38 }
0x1cd3   : > { %v4269_v39 = vpop.eup %4268 }
0x1cd4   : > { %v4271_v42 = vpop.eup %4270  ;;  %v2321_v45 = vmul.f32 %v4269_v39, %v5495_v56 }
0x1cd5   : > { %v2345_v48 = vmul.f32 %v4271_v42, %v5499_v59 }
0x1d33   : > { %v2324_v40 = vpop.permute.xlu0 %2323 }
0x1d34   : > { %v2326_v41 = vmul.f32 %v4269_v39, %v2324_v40 }
0x1d35   : > { %v2348_v43 = vpop.permute.xlu1 %2347 }
0x1d36   : > { %2328 = vrot.lane.b32.xlu0 %v2326_v41, %s4750_s19  ;;  %v2350_v44 = vmul.f32 %v4271_v42, %v2348_v43 }
0x1d38   : > { %2352 = vrot.lane.b32.xlu1 %v2350_v44, %s4750_s19 }
0x1da8   : > { %v2329_v46 = vpop.permute.xlu0 %2328 }
0x1da9   : > { %v5532_v47 = vadd.f32 %v2329_v46, %v2321_v45 }
0x1daa   : > { %v2353_v49 = vpop.permute.xlu1 %2352 }
0x1dab   : > { %4272 = vtanh.f32 %v5532_v47  ;;  %v5536_v50 = vadd.f32 %v2353_v49, %v2345_v48  ;;  %v2584_v48 = vld [vmem:[#allocation2 + $0x4] ss:$0 sm:$0xff] }
0x1dad   : > { %4274 = vtanh.f32 %v5536_v50 }
0x1db8   : > { %v4273_v51 = vpop.eup %4272 }
0x1db9   : > { %2334 = vrot.lane.b32.xlu0 %v4273_v51, %s4751_s24  ;;  %v2586_v51 = vld [vmem:[#allocation2 + $0xb] ss:$0 sm:$0xff] }
0x1dba   : > { %v4275_v52 = vpop.eup %4274 }
0x1dbb   : > { %2358 = vrot.lane.b32.xlu1 %v4275_v52, %s4751_s24 }
0x1e2b   : > { %v2335_v53 = vpop.permute.xlu0 %2334 }
0x1e2c   : > { %v2337_v30 = vmul.f32 %v4269_v39, %v2335_v53 }
0x1e2d   : > { %v2359_v29 = vpop.permute.xlu1 %2358 }
0x1e2e   : > { %2363 = vrot.lane.b32.xlu0 %v2337_v30, %s4750_s19  ;;  %v2361_v32 = vmul.f32 %v4271_v42, %v2359_v29 }
0x1e30   : > { %2368 = vrot.lane.b32.xlu1 %v2361_v32, %s4751_s24 }
0x1ea0   : > { %v2364_v54 = vpop.permute.xlu0 %2363 }
0x1ea1   : > { %2366 = vst.msk [vmem:[#allocation4 + $0x2] sm:$0x1] %vm868_vm2, %v2364_v54 }
0x1ea2   : > { %v2369_v55 = vpop.permute.xlu1 %2368 }
0x1ea3   : > { %2371 = vst.msk [vmem:[#allocation4 + $0x5] sm:$0x1] %vm874_vm3, %v2369_v55  ;;  %v2372_v56 = vsel %vm638_vm0, %v2364_v54, %v2369_v55 }
0x1ea4   : > { %3789 = vmatmul.mubr.msk.f32.vlgmr.msra.gmra.mxu1 %vm733_vm1, %v2372_v56 }
0x1ea5   : > { %2667 = vmatpush1.msra.mxu1 %v5358_v8  ;;  %2714 = vmatprep.mubr.f32.mxu1 %v4749_v0 }
0x1ea6   : > { %2668 = vmatprep.subr.mxu1 %v5361_v12 }
0x1ea7   : > { %2669 = vmatpush1.msra.mxu1 %v5363_v27 }
0x1ea8   : > { %2670 = vmatprep.subr.mxu1 %v5366_v31 }
0x1ea9   : > { %2671 = vmatpush1.msra.mxu1 %v5369_v34 }
0x1eaa   : > { %2672 = vmatprep.subr.mxu1 %v5371_v36 }
0x1eab   : > { %2673 = vmatpush1.msra.mxu1 %v5374_v11 }
0x1eac   : > { %2674 = vmatprep.subr.mxu1 %v5379_v14 }
0x1ead   : > { %2675 = vmatpush1.msra.mxu1 %v5383_v17 }
0x1eae   : > { %2676 = vmatprep.subr.mxu1 %v5385_v18 }
0x1eaf   : > { %2677 = vmatpush1.msra.mxu1 %v5387_v19 }
0x1eb0   : > { %2678 = vmatprep.subr.mxu1 %v5391_v20 }
0x1eb1   : > { %2679 = vmatpush1.msra.mxu1 %v5395_v22 }
0x1eb2   : > { %2680 = vmatprep.subr.mxu1 %v5399_v24 }
0x1eb3   : > { %2681 = vmatpush1.msra.mxu1 %v5402_v25 }
0x1eb4   : > { %2940 = vmatprep.subr.mxu1 %v5355_v5 }
0x1f64   : > { %v2442_v57 = vpop.f32.mrf.mxu1 }
0x1f65   : > { %v2448_v59 = vadd.f32 %v2447_v58, %v2442_v57 }
0x1f66   : > { %v2444_v60 = vpop.f32.mrf.mxu1 }
0x1f67   : > { %4276 = vtanh.f32 %v2448_v59  ;;  %v2450_v62 = vadd.f32 %v2449_v61, %v2444_v60  ;;  %v3790_v2 = vmul.f32 -1.442695, %v2448_v59 }
0x1f69   : > { %4278 = vtanh.f32 %v2450_v62  ;;  %v3791_v3 = vmul.f32 -1.442695, %v2450_v62 }
0x1f6a   : > { %4280 = vpow2.f32 %v3790_v2 }
0x1f6b   : > { %4282 = vpow2.f32 %v3791_v3 }
0x1f74   : > { %v4277_v63 = vpop.eup %4276 }
0x1f75   : > { %2460 = vrot.lane.b32.xlu0 %v4277_v63, %s4751_s24 }
0x1f76   : > { %v4279_v1 = vpop.eup %4278 }
0x1f77   : > { %2484 = vrot.lane.b32.xlu1 %v4279_v1, %s4751_s24  ;;  %v4281_v4 = vpop.eup %4280 }
0x1f78   : > { %v4283_v5 = vpop.eup %4282  ;;  %v2454_v7 = vadd.f32 1.0, %v4281_v4 }
0x1f79   : > { %v2478_v6 = vadd.f32 1.0, %v4283_v5 }
0x1f7a   : > { %4284 = vrcp.f32 %v2454_v7 }
0x1f7b   : > { %4286 = vrcp.f32 %v2478_v6 }
0x1f87   : > { %v4285_v10 = vpop.eup %4284 }
0x1f88   : > { %v4287_v33 = vpop.eup %4286  ;;  %v2458_v13 = vmul.f32 %v4285_v10, %v5532_v47 }
0x1f89   : > { %v2482_v23 = vmul.f32 %v4287_v33, %v5536_v50 }
0x1fe7   : > { %v2461_v15 = vpop.permute.xlu0 %2460 }
0x1fe8   : > { %v2463_v28 = vmul.f32 %v4285_v10, %v2461_v15 }
0x1fe9   : > { %v2485_v35 = vpop.permute.xlu1 %2484 }
0x1fea   : > { %2465 = vrot.lane.b32.xlu0 %v2463_v28, %s4750_s19  ;;  %v2487_v9 = vmul.f32 %v4287_v33, %v2485_v35 }
0x1fec   : > { %2489 = vrot.lane.b32.xlu1 %v2487_v9, %s4750_s19 }
0x205c   : > { %v2466_v16 = vpop.permute.xlu0 %2465 }
0x205d   : > { %v5569_v21 = vadd.f32 %v2466_v16, %v2458_v13 }
0x205e   : > { %v2490_v26 = vpop.permute.xlu1 %2489 }
0x205f   : > { %4288 = vtanh.f32 %v5569_v21  ;;  %v5573_v37 = vadd.f32 %v2490_v26, %v2482_v23 }
0x2061   : > { %4290 = vtanh.f32 %v5573_v37 }
0x206c   : > { %v4289_v38 = vpop.eup %4288 }
0x206d   : > { %2471 = vrot.lane.b32.xlu0 %v4289_v38, %s4751_s24 }
0x206e   : > { %v4291_v39 = vpop.eup %4290 }
0x206f   : > { %2495 = vrot.lane.b32.xlu1 %v4291_v39, %s4751_s24 }
0x20df   : > { %v2472_v40 = vpop.permute.xlu0 %2471 }
0x20e0   : > { %v2474_v41 = vmul.f32 %v4285_v10, %v2472_v40 }
0x20e1   : > { %v2496_v42 = vpop.permute.xlu1 %2495 }
0x20e2   : > { %2500 = vrot.lane.b32.xlu0 %v2474_v41, %s4750_s19  ;;  %v2498_v43 = vmul.f32 %v4287_v33, %v2496_v42 }
0x20e4   : > { %2505 = vrot.lane.b32.xlu1 %v2498_v43, %s4751_s24 }
0x2154   : > { %v2501_v44 = vpop.permute.xlu0 %2500 }
0x2155   : > { %2503 = vst.msk [vmem:[#allocation4 + $0x3] sm:$0x1] %vm868_vm2, %v2501_v44 }
0x2156   : > { %v2506_v45 = vpop.permute.xlu1 %2505 }
0x2157   : > { %2508 = vst.msk [vmem:[#allocation4 + $0x4] sm:$0x1] %vm874_vm3, %v2506_v45  ;;  %v2509_v46 = vsel %vm638_vm0, %v2501_v44, %v2506_v45 }
0x2158   : > { %3792 = vmatmul.mubr.msk.f32.vlgmr.msra.gmra.mxu0 %vm733_vm1, %v2509_v46 }
0x2159   : > { %2804 = vmatpush1.msra.mxu0 %v5358_v8  ;;  %2851 = vmatprep.mubr.f32.mxu0 %v4749_v0 }
0x215a   : > { %2805 = vmatprep.subr.mxu0 %v5361_v12 }
0x215b   : > { %2806 = vmatpush1.msra.mxu0 %v5363_v27 }
0x215c   : > { %2807 = vmatprep.subr.mxu0 %v5366_v31 }
0x215d   : > { %2808 = vmatpush1.msra.mxu0 %v5369_v34 }
0x215e   : > { %2809 = vmatprep.subr.mxu0 %v5371_v36 }
0x215f   : > { %2810 = vmatpush1.msra.mxu0 %v5374_v11 }
0x2160   : > { %2811 = vmatprep.subr.mxu0 %v5379_v14 }
0x2161   : > { %2812 = vmatpush1.msra.mxu0 %v5383_v17 }
0x2162   : > { %2813 = vmatprep.subr.mxu0 %v5385_v18 }
0x2163   : > { %2814 = vmatpush1.msra.mxu0 %v5387_v19 }
0x2164   : > { %2815 = vmatprep.subr.mxu0 %v5391_v20 }
0x2165   : > { %2816 = vmatpush1.msra.mxu0 %v5395_v22 }
0x2166   : > { %2817 = vmatprep.subr.mxu0 %v5399_v24 }
0x2167   : > { %2818 = vmatpush1.msra.mxu0 %v5402_v25 }
0x2168   : > { %3856 = vmatprep.subr.mxu0 %v4749_v0 }
0x2218   : > { %v2579_v47 = vpop.f32.mrf.mxu0 }
0x2219   : > { %v2585_v49 = vadd.f32 %v2584_v48, %v2579_v47 }
0x221a   : > { %v2581_v50 = vpop.f32.mrf.mxu0 }
0x221b   : > { %4292 = vtanh.f32 %v2585_v49  ;;  %v2587_v52 = vadd.f32 %v2586_v51, %v2581_v50  ;;  %v3793_v29 = vmul.f32 -1.442695, %v2585_v49 }
0x221d   : > { %4294 = vtanh.f32 %v2587_v52  ;;  %v3794_v32 = vmul.f32 -1.442695, %v2587_v52 }
0x221e   : > { %4296 = vpow2.f32 %v3793_v29  ;;  %v2858_v29 = vld [vmem:[#allocation2 + $0x6] ss:$0 sm:$0xff] }
0x221f   : > { %4298 = vpow2.f32 %v3794_v32 }
0x2228   : > { %v4293_v53 = vpop.eup %4292 }
0x2229   : > { %2597 = vrot.lane.b32.xlu0 %v4293_v53, %s4751_s24 }
0x222a   : > { %v4295_v30 = vpop.eup %4294 }
0x222b   : > { %2621 = vrot.lane.b32.xlu1 %v4295_v30, %s4751_s24  ;;  %v4297_v54 = vpop.eup %4296 }
0x222c   : > { %v4299_v55 = vpop.eup %4298  ;;  %v2591_v56 = vadd.f32 1.0, %v4297_v54 }
0x222d   : > { %v2615_v57 = vadd.f32 1.0, %v4299_v55  ;;  %v2860_v55 = vld [vmem:[#allocation2 + $0x9] ss:$0 sm:$0xff] }
0x222e   : > { %4300 = vrcp.f32 %v2591_v56 }
0x222f   : > { %4302 = vrcp.f32 %v2615_v57 }
0x223b   : > { %v4301_v58 = vpop.eup %4300 }
0x223c   : > { %v4303_v61 = vpop.eup %4302  ;;  %v2595_v1 = vmul.f32 %v4301_v58, %v5569_v21 }
0x223d   : > { %v2619_v4 = vmul.f32 %v4303_v61, %v5573_v37 }
0x229b   : > { %v2598_v59 = vpop.permute.xlu0 %2597 }
0x229c   : > { %v2600_v60 = vmul.f32 %v4301_v58, %v2598_v59 }
0x229d   : > { %v2622_v62 = vpop.permute.xlu1 %2621 }
0x229e   : > { %2602 = vrot.lane.b32.xlu0 %v2600_v60, %s4750_s19  ;;  %v2624_v63 = vmul.f32 %v4303_v61, %v2622_v62 }
0x22a0   : > { %2626 = vrot.lane.b32.xlu1 %v2624_v63, %s4750_s19 }
0x2310   : > { %v2603_v2 = vpop.permute.xlu0 %2602 }
0x2311   : > { %v5606_v3 = vadd.f32 %v2603_v2, %v2595_v1 }
0x2312   : > { %v2627_v5 = vpop.permute.xlu1 %2626 }
0x2313   : > { %4304 = vtanh.f32 %v5606_v3  ;;  %v5610_v7 = vadd.f32 %v2627_v5, %v2619_v4 }
0x2315   : > { %4306 = vtanh.f32 %v5610_v7 }
0x2320   : > { %v4305_v6 = vpop.eup %4304 }
0x2321   : > { %2608 = vrot.lane.b32.xlu0 %v4305_v6, %s4751_s24 }
0x2322   : > { %v4307_v10 = vpop.eup %4306 }
0x2323   : > { %2632 = vrot.lane.b32.xlu1 %v4307_v10, %s4751_s24 }
0x2393   : > { %v2609_v15 = vpop.permute.xlu0 %2608 }
0x2394   : > { %v2611_v28 = vmul.f32 %v4301_v58, %v2609_v15 }
0x2395   : > { %v2633_v33 = vpop.permute.xlu1 %2632 }
0x2396   : > { %2637 = vrot.lane.b32.xlu0 %v2611_v28, %s4750_s19  ;;  %v2635_v35 = vmul.f32 %v4303_v61, %v2633_v33 }
0x2398   : > { %2642 = vrot.lane.b32.xlu1 %v2635_v35, %s4751_s24 }
0x2408   : > { %v2638_v9 = vpop.permute.xlu0 %2637 }
0x2409   : > { %2640 = vst.msk [vmem:[#allocation4 + $0x4] sm:$0x1] %vm868_vm2, %v2638_v9 }
0x240a   : > { %v2643_v13 = vpop.permute.xlu1 %2642 }
0x240b   : > { %2645 = vst.msk [vmem:[#allocation4 + $0x3] sm:$0x1] %vm874_vm3, %v2643_v13  ;;  %v2646_v16 = vsel %vm638_vm0, %v2638_v9, %v2643_v13 }
0x240c   : > { %3795 = vmatmul.mubr.msk.f32.vlgmr.msra.gmra.mxu1 %vm733_vm1, %v2646_v16 }
0x240d   : > { %2941 = vmatpush1.msra.mxu1 %v5358_v8  ;;  %2988 = vmatprep.mubr.f32.mxu1 %v4749_v0 }
0x240e   : > { %2942 = vmatprep.subr.mxu1 %v5361_v12  ;;  %v2721_v12 = vld [vmem:[#allocation2 + $0x5] ss:$0 sm:$0xff] }
0x240f   : > { %2943 = vmatpush1.msra.mxu1 %v5363_v27 }
0x2410   : > { %2944 = vmatprep.subr.mxu1 %v5366_v31 }
0x2411   : > { %2945 = vmatpush1.msra.mxu1 %v5369_v34  ;;  %v2723_v34 = vld [vmem:[#allocation2 + $0xa] ss:$0 sm:$0xff] }
0x2412   : > { %2946 = vmatprep.subr.mxu1 %v5371_v36 }
0x2413   : > { %2947 = vmatpush1.msra.mxu1 %v5374_v11 }
0x2414   : > { %2948 = vmatprep.subr.mxu1 %v5379_v14 }
0x2415   : > { %2949 = vmatpush1.msra.mxu1 %v5383_v17 }
0x2416   : > { %2950 = vmatprep.subr.mxu1 %v5385_v18 }
0x2417   : > { %2951 = vmatpush1.msra.mxu1 %v5387_v19 }
0x2418   : > { %2952 = vmatprep.subr.mxu1 %v5391_v20 }
0x2419   : > { %2953 = vmatpush1.msra.mxu1 %v5395_v22 }
0x241a   : > { %2954 = vmatprep.subr.mxu1 %v5399_v24 }
0x241b   : > { %2955 = vmatpush1.msra.mxu1 %v5402_v25 }
0x241c   : > { %3875 = vmatprep.subr.mxu1 %v4749_v0 }
0x24cc   : > { %v2716_v8 = vpop.f32.mrf.mxu1 }
0x24cd   : > { %v2722_v27 = vadd.f32 %v2721_v12, %v2716_v8 }
0x24ce   : > { %v2718_v31 = vpop.f32.mrf.mxu1 }
0x24cf   : > { %4308 = vtanh.f32 %v2722_v27  ;;  %v2724_v36 = vadd.f32 %v2723_v34, %v2718_v31  ;;  %v3796_v17 = vmul.f32 -1.442695, %v2722_v27 }
0x24d1   : > { %4310 = vtanh.f32 %v2724_v36  ;;  %v3797_v18 = vmul.f32 -1.442695, %v2724_v36 }
0x24d2   : > { %4312 = vpow2.f32 %v3796_v17  ;;  %v2995_v17 = vld [vmem:[#allocation2 + $0x7] ss:$0 sm:$0xff] }
0x24d3   : > { %4314 = vpow2.f32 %v3797_v18 }
0x24dc   : > { %v4309_v11 = vpop.eup %4308 }
0x24dd   : > { %2734 = vrot.lane.b32.xlu0 %v4309_v11, %s4751_s24 }
0x24de   : > { %v4311_v14 = vpop.eup %4310 }
0x24df   : > { %2758 = vrot.lane.b32.xlu1 %v4311_v14, %s4751_s24  ;;  %v4313_v19 = vpop.eup %4312 }
0x24e0   : > { %v4315_v20 = vpop.eup %4314  ;;  %v2728_v22 = vadd.f32 1.0, %v4313_v19 }
0x24e1   : > { %v2752_v24 = vadd.f32 1.0, %v4315_v20  ;;  %v2997_v20 = vld [vmem:[#allocation2 + $0x8] ss:$0 sm:$0xff] }
0x24e2   : > { %4316 = vrcp.f32 %v2728_v22 }
0x24e3   : > { %4318 = vrcp.f32 %v2752_v24 }
0x24ef   : > { %v4317_v25 = vpop.eup %4316 }
0x24f0   : > { %v4319_v26 = vpop.eup %4318  ;;  %v2732_v39 = vmul.f32 %v4317_v25, %v5606_v3 }
0x24f1   : > { %v2756_v42 = vmul.f32 %v4319_v26, %v5610_v7 }
0x254f   : > { %v2735_v21 = vpop.permute.xlu0 %2734 }
0x2550   : > { %v2737_v23 = vmul.f32 %v4317_v25, %v2735_v21 }
0x2551   : > { %v2759_v37 = vpop.permute.xlu1 %2758 }
0x2552   : > { %2739 = vrot.lane.b32.xlu0 %v2737_v23, %s4750_s19  ;;  %v2761_v38 = vmul.f32 %v4319_v26, %v2759_v37 }
0x2554   : > { %2763 = vrot.lane.b32.xlu1 %v2761_v38, %s4750_s19 }
0x25c4   : > { %v2740_v40 = vpop.permute.xlu0 %2739 }
0x25c5   : > { %v2742_v41 = vadd.f32 %v2740_v40, %v2732_v39 }
0x25c6   : > { %v2764_v43 = vpop.permute.xlu1 %2763 }
0x25c7   : > { %4320 = vtanh.f32 %v2742_v41  ;;  %v2766_v44 = vadd.f32 %v2764_v43, %v2756_v42 }
0x25c9   : > { %4322 = vtanh.f32 %v2766_v44 }
0x25d4   : > { %v4321_v45 = vpop.eup %4320 }
0x25d5   : > { %2745 = vrot.lane.b32.xlu0 %v4321_v45, %s4751_s24 }
0x25d6   : > { %v4323_v46 = vpop.eup %4322 }
0x25d7   : > { %2769 = vrot.lane.b32.xlu1 %v4323_v46, %s4751_s24 }
0x2647   : > { %v2746_v47 = vpop.permute.xlu0 %2745 }
0x2648   : > { %v2748_v48 = vmul.f32 %v4317_v25, %v2746_v47 }
0x2649   : > { %v2770_v49 = vpop.permute.xlu1 %2769 }
0x264a   : > { %2774 = vrot.lane.b32.xlu0 %v2748_v48, %s4750_s19  ;;  %v2772_v50 = vmul.f32 %v4319_v26, %v2770_v49 }
0x264c   : > { %2779 = vrot.lane.b32.xlu1 %v2772_v50, %s4751_s24 }
0x26bc   : > { %v2775_v51 = vpop.permute.xlu0 %2774 }
0x26bd   : > { %2777 = vst.msk [vmem:[#allocation4 + $0x5] sm:$0x1] %vm868_vm2, %v2775_v51 }
0x26be   : > { %v2780_v52 = vpop.permute.xlu1 %2779 }
0x26bf   : > { %2782 = vst.msk [vmem:[#allocation4 + $0x2] sm:$0x1] %vm874_vm3, %v2780_v52  ;;  %v2783_v53 = vsel %vm638_vm0, %v2775_v51, %v2780_v52  ;;  %v3065_v52 = vld [vmem:[#allocation16 + $0x38] sm:$0xff] }
0x26c0   : > { %3798 = vmatmul.mubr.msk.f32.vlgmr.msra.gmra.mxu0 %vm733_vm1, %v2783_v53  ;;  %v3064_v53 = vld [vmem:[#allocation16 + $0x30] sm:$0xff] }
0x26c1   : > { %3857 = vmatpush3.msra.mxu0 %v3065_v52  ;;  %3872 = vmatprep.mubr.msk.f32.mxu0 %vm4752_vm4, %v4749_v0 }
0x26c2   : > { %3858 = vmatprep.subr.mxu0 %v4749_v0 }
0x26c3   : > { %3859 = vmatpush3.msra.mxu0 %v3064_v53 }
0x26c4   : > { %3860 = vmatprep.subr.mxu0 %v4749_v0 }
0x2780   : > { %v2853_v30 = vpop.f32.mrf.mxu0 }
0x2781   : > { %v2859_v32 = vadd.f32 %v2858_v29, %v2853_v30  ;;  %v3063_v30 = vld [vmem:[#allocation16 + $0x28] sm:$0xff] }
0x2782   : > { %v2855_v54 = vpop.f32.mrf.mxu0  ;;  %3861 = vmatpush3.msra.mxu0 %v3063_v30 }
0x2783   : > { %4324 = vtanh.f32 %v2859_v32  ;;  %v2861_v56 = vadd.f32 %v2860_v55, %v2855_v54  ;;  %v3799_v59 = vmul.f32 -1.442695, %v2859_v32  ;;  %3862 = vmatprep.subr.mxu0 %v4749_v0  ;;  %v3062_v54 = vld [vmem:[#allocation16 + $0x20] sm:$0xff]  ;;  %v3061_v55 = vld [vmem:[#allocation16 + $0x18] sm:$0xff] }
0x2784   : > { %3863 = vmatpush3.msra.mxu0 %v3062_v54 }
0x2785   : > { %4326 = vtanh.f32 %v2861_v56  ;;  %v3800_v60 = vmul.f32 -1.442695, %v2861_v56  ;;  %3864 = vmatprep.subr.mxu0 %v4749_v0  ;;  %v3060_v56 = vld [vmem:[#allocation16 + $0x10] sm:$0xff] }
0x2786   : > { %4328 = vpow2.f32 %v3799_v59  ;;  %3865 = vmatpush3.msra.mxu0 %v3061_v55 }
0x2787   : > { %4330 = vpow2.f32 %v3800_v60  ;;  %3866 = vmatprep.subr.mxu0 %v4749_v0 }
0x2788   : > { %3867 = vmatpush3.msra.mxu0 %v3060_v56 }
0x2789   : > { %3868 = vmatprep.subr.mxu0 %v4749_v0 }
0x2790   : > { %v4325_v57 = vpop.eup %4324 }
0x2791   : > { %2871 = vrot.lane.b32.xlu0 %v4325_v57, %s4751_s24  ;;  %v3059_v57 = vld [vmem:[#allocation16 + $0x8] sm:$0xff] }
0x2792   : > { %v4327_v58 = vpop.eup %4326  ;;  %3869 = vmatpush3.msra.mxu0 %v3059_v57 }
0x2793   : > { %2895 = vrot.lane.b32.xlu1 %v4327_v58, %s4751_s24  ;;  %v4329_v61 = vpop.eup %4328  ;;  %v3058_v58 = vld [vmem:[#allocation16] sm:$0xff]  ;;  %3870 = vmatprep.subr.mxu0 %v4749_v0 }
0x2794   : > { %v4331_v62 = vpop.eup %4330  ;;  %v2865_v63 = vadd.f32 1.0, %v4329_v61  ;;  %3871 = vmatpush3.msra.mxu0 %v3058_v58 }
0x2795   : > { %v2889_v1 = vadd.f32 1.0, %v4331_v62  ;;  %3885 = vmatprep.subr.mxu0 %v4749_v0 }
0x2796   : > { %4332 = vrcp.f32 %v2865_v63 }
0x2797   : > { %4334 = vrcp.f32 %v2889_v1 }
0x27a3   : > { %v4333_v2 = vpop.eup %4332 }
0x27a4   : > { %v4335_v5 = vpop.eup %4334  ;;  %v2869_v10 = vmul.f32 %v4333_v2, %v2742_v41 }
0x27a5   : > { %v2893_v33 = vmul.f32 %v4335_v5, %v2766_v44 }
0x2803   : > { %v2872_v3 = vpop.permute.xlu0 %2871 }
0x2804   : > { %v2874_v4 = vmul.f32 %v4333_v2, %v2872_v3 }
0x2805   : > { %v2896_v7 = vpop.permute.xlu1 %2895 }
0x2806   : > { %2876 = vrot.lane.b32.xlu0 %v2874_v4, %s4750_s19  ;;  %v2898_v6 = vmul.f32 %v4335_v5, %v2896_v7 }
0x2808   : > { %2900 = vrot.lane.b32.xlu1 %v2898_v6, %s4750_s19 }
0x2878   : > { %v2877_v15 = vpop.permute.xlu0 %2876 }
0x2879   : > { %v2879_v28 = vadd.f32 %v2877_v15, %v2869_v10 }
0x287a   : > { %v2901_v35 = vpop.permute.xlu1 %2900 }
0x287b   : > { %4336 = vtanh.f32 %v2879_v28  ;;  %v2903_v9 = vadd.f32 %v2901_v35, %v2893_v33 }
0x287d   : > { %4338 = vtanh.f32 %v2903_v9 }
0x2888   : > { %v4337_v13 = vpop.eup %4336 }
0x2889   : > { %2882 = vrot.lane.b32.xlu0 %v4337_v13, %s4751_s24  ;;  %v3311_v13 = vld [vmem:[#allocation19 + $0x30] sm:$0xff] }
0x288a   : > { %v4339_v16 = vpop.eup %4338 }
0x288b   : > { %2906 = vrot.lane.b32.xlu1 %v4339_v16, %s4751_s24  ;;  %v3310_v16 = vld [vmem:[#allocation19 + $0x28] sm:$0xff] }
0x28fb   : > { %v2883_v8 = vpop.permute.xlu0 %2882 }
0x28fc   : > { %v2885_v12 = vmul.f32 %v4333_v2, %v2883_v8  ;;  %v3309_v8 = vld [vmem:[#allocation19 + $0x20] sm:$0xff] }
0x28fd   : > { %v2907_v27 = vpop.permute.xlu1 %2906 }
0x28fe   : > { %2911 = vrot.lane.b32.xlu0 %v2885_v12, %s4750_s19  ;;  %v2909_v31 = vmul.f32 %v4335_v5, %v2907_v27  ;;  %v3308_v12 = vld [vmem:[#allocation19 + $0x18] sm:$0xff]  ;;  %v3307_v27 = vld [vmem:[#allocation19 + $0x10] sm:$0xff] }
0x2900   : > { %2916 = vrot.lane.b32.xlu1 %v2909_v31, %s4751_s24  ;;  %v3306_v31 = vld [vmem:[#allocation19 + $0x8] sm:$0xff] }
0x2970   : > { %v2912_v34 = vpop.permute.xlu0 %2911 }
0x2971   : > { %2914 = vst.msk [vmem:[#allocation4 + $0x6] sm:$0x1] %vm868_vm2, %v2912_v34 }
0x2972   : > { %v2917_v36 = vpop.permute.xlu1 %2916 }
0x2973   : > { %2919 = vst.msk [vmem:[#allocation4 + $0x1] sm:$0x1] %vm874_vm3, %v2917_v36  ;;  %v2920_v11 = vsel %vm638_vm0, %v2912_v34, %v2917_v36 }
0x2974   : > { %3801 = vmatmul.mubr.msk.f32.vlgmr.msra.gmra.mxu1 %vm733_vm1, %v2920_v11 }
0x2975   : > { %3877 = vmatprep.mubr.msk.f32.mxu1 %vm4752_vm4, %v4749_v0 }
0x2a34   : > { %v2990_v14 = vpop.f32.mrf.mxu1 }
0x2a35   : > { %v2996_v18 = vadd.f32 %v2995_v17, %v2990_v14  ;;  %v3304_v14 = vld [vmem:[#allocation17 + $0x38] sm:$0xff]  ;;  %v3303_v17 = vld [vmem:[#allocation17 + $0x30] sm:$0xff] }
0x2a36   : > { %v2992_v19 = vpop.f32.mrf.mxu1 }
0x2a37   : > { %4340 = vtanh.f32 %v2996_v18  ;;  %v2998_v22 = vadd.f32 %v2997_v20, %v2992_v19  ;;  %v3802_v21 = vmul.f32 -1.442695, %v2996_v18  ;;  %v3302_v18 = vld [vmem:[#allocation17 + $0x28] sm:$0xff]  ;;  %v3301_v19 = vld [vmem:[#allocation17 + $0x20] sm:$0xff]  ;;  %v3300_v20 = vld [vmem:[#allocation17 + $0x18] sm:$0xff] }
0x2a39   : > { %4342 = vtanh.f32 %v2998_v22  ;;  %v3803_v23 = vmul.f32 -1.442695, %v2998_v22  ;;  %v3299_v22 = vld [vmem:[#allocation17 + $0x10] sm:$0xff] }
0x2a3a   : > { %4344 = vpow2.f32 %v3802_v21  ;;  %v3305_v21 = vld [vmem:[#allocation19] sm:$0xff] }
0x2a3b   : > { %4346 = vpow2.f32 %v3803_v23 }
0x2a44   : > { %v4341_v24 = vpop.eup %4340 }
0x2a45   : > { %3008 = vrot.lane.b32.xlu0 %v4341_v24, %s4751_s24  ;;  %v3298_v24 = vld [vmem:[#allocation17 + $0x8] sm:$0xff] }
0x2a46   : > { %v4343_v25 = vpop.eup %4342 }
0x2a47   : > { %3032 = vrot.lane.b32.xlu1 %v4343_v25, %s4751_s24  ;;  %v4345_v26 = vpop.eup %4344  ;;  %v3297_v25 = vld [vmem:[#allocation17] sm:$0xff] }
0x2a48   : > { %v4347_v37 = vpop.eup %4346  ;;  %v3002_v38 = vadd.f32 1.0, %v4345_v26 }
0x2a49   : > { %v3026_v39 = vadd.f32 1.0, %v4347_v37 }
0x2a4a   : > { %4348 = vrcp.f32 %v3002_v38 }
0x2a4b   : > { %4350 = vrcp.f32 %v3026_v39  ;;  %v3464_v39 = vld [vmem:[#allocation20 + $0x38] sm:$0xff] }
0x2a57   : > { %v4349_v40 = vpop.eup %4348 }
0x2a58   : > { %v4351_v43 = vpop.eup %4350  ;;  %v3006_v46 = vmul.f32 %v4349_v40, %v2879_v28 }
0x2a59   : > { %v3030_v49 = vmul.f32 %v4351_v43, %v2903_v9  ;;  %v3312_v9 = vld [vmem:[#allocation19 + $0x38] sm:$0xff] }
0x2ab7   : > { %v3009_v41 = vpop.permute.xlu0 %3008 }
0x2ab8   : > { %v3011_v42 = vmul.f32 %v4349_v40, %v3009_v41  ;;  %v3462_v41 = vld [vmem:[#allocation20 + $0x28] sm:$0xff] }
0x2ab9   : > { %v3033_v44 = vpop.permute.xlu1 %3032 }
0x2aba   : > { %3013 = vrot.lane.b32.xlu0 %v3011_v42, %s4750_s19  ;;  %v3035_v45 = vmul.f32 %v4351_v43, %v3033_v44  ;;  %v3461_v42 = vld [vmem:[#allocation20 + $0x20] sm:$0xff]  ;;  %v3459_v44 = vld [vmem:[#allocation20 + $0x10] sm:$0xff] }
0x2abc   : > { %3037 = vrot.lane.b32.xlu1 %v3035_v45, %s4750_s19  ;;  %v3458_v45 = vld [vmem:[#allocation20 + $0x8] sm:$0xff] }
0x2b2c   : > { %v3014_v47 = vpop.permute.xlu0 %3013 }
0x2b2d   : > { %v3016_v48 = vadd.f32 %v3014_v47, %v3006_v46  ;;  %v3457_v46 = vld [vmem:[#allocation20] sm:$0xff] }
0x2b2e   : > { %v3038_v50 = vpop.permute.xlu1 %3037 }
0x2b2f   : > { %4352 = vtanh.f32 %v3016_v48  ;;  %v3040_v51 = vadd.f32 %v3038_v50, %v3030_v49 }
0x2b31   : > { %4354 = vtanh.f32 %v3040_v51  ;;  %v3810_v51 = vld [vmem:[#allocation22] ss:$0 sm:$0xff] }
0x2b3c   : > { %v4353_v29 = vpop.eup %4352 }
0x2b3d   : > { %3019 = vrot.lane.b32.xlu0 %v4353_v29, %s4751_s24 }
0x2b3e   : > { %v4355_v32 = vpop.eup %4354 }
0x2b3f   : > { %3043 = vrot.lane.b32.xlu1 %v4355_v32, %s4751_s24 }
0x2baf   : > { %v3020_v59 = vpop.permute.xlu0 %3019 }
0x2bb0   : > { %v3022_v60 = vmul.f32 %v4349_v40, %v3020_v59  ;;  %v3463_v40 = vld [vmem:[#allocation20 + $0x30] sm:$0xff] }
0x2bb1   : > { %v3044_v61 = vpop.permute.xlu1 %3043 }
0x2bb2   : > { %3048 = vrot.lane.b32.xlu0 %v3022_v60, %s4750_s19  ;;  %v3046_v62 = vmul.f32 %v4351_v43, %v3044_v61  ;;  %v3460_v43 = vld [vmem:[#allocation20 + $0x18] sm:$0xff]  ;;  %s3547_s19 = scalar_lea.sflag [#allocation7], %s610_s27 }
0x2bb4   : > { %3053 = vrot.lane.b32.xlu1 %v3046_v62, %s4751_s24  ;;  %s4654_s24 = scalar_lea.vmem %s4653_s17, 256 }
0x2bb5   : > { %p4656_p3 = scmp.lt.s32.totalorder %s4654_s24, %s4648_s20 }
0x2bb7   : > { %p4657_p12 = por %p4656_p3, %p4655_p0 }
0x2bb9   : > { %p4658_p2 = pnand %p4657_p12, %p4651_p11 }
0x2c24   : > { %v3049_v63 = vpop.permute.xlu0 %3048 }
0x2c25   : > { %3051 = vst.msk [vmem:[#allocation4 + $0x7] sm:$0x1] %vm868_vm2, %v3049_v63 }
0x2c26   : > { %v3054_v1 = vpop.permute.xlu1 %3053 }
0x2c27   : > { %3056 = vst.msk [vmem:[#allocation4] sm:$0x1] %vm874_vm3, %v3054_v1 }
0x2c2e   : > { %v5686_v2 = vld [vmem:[#allocation4] sm:$0xff] }
0x2c2f   : > { %3873 = vmatmul.mubr.msk.f32.vlgmr.msra.gmra.mxu0 %vm733_vm1, %v5686_v2  ;;  %3876 = vmatpush3.xpose.msk.msra.mxu1 %vm733_vm1, %v5686_v2 }
0x2c30   : > { %3880 = vmatprep.subr.mxu1 %v4749_v0  ;;  %3901 = vmatprep.mubr.msk.f32.mxu0 %vm4752_vm4, %v4749_v0 }
0x2c31   : > { %3886 = vmatpush3.msra.mxu0 %v3312_v9 }
0x2c32   : > { %3887 = vmatprep.subr.mxu0 %v4749_v0 }
0x2c33   : > { %3888 = vmatpush3.msra.mxu0 %v3311_v13 }
0x2c34   : > { %3889 = vmatprep.subr.mxu0 %v4749_v0 }
0x2c35   : > { %3890 = vmatpush3.msra.mxu0 %v3310_v16 }
0x2c36   : > { %3891 = vmatprep.subr.mxu0 %v4749_v0 }
0x2c37   : > { %3892 = vmatpush3.msra.mxu0 %v3309_v8 }
0x2c38   : > { %3893 = vmatprep.subr.mxu0 %v4749_v0 }
0x2c39   : > { %3894 = vmatpush3.msra.mxu0 %v3308_v12 }
0x2c3a   : > { %3895 = vmatprep.subr.mxu0 %v4749_v0 }
0x2c3b   : > { %3896 = vmatpush3.msra.mxu0 %v3307_v27 }
0x2c3c   : > { %3897 = vmatprep.subr.mxu0 %v4749_v0 }
0x2c3d   : > { %3898 = vmatpush3.msra.mxu0 %v3306_v31 }
0x2c3e   : > { %3899 = vmatprep.subr.mxu0 %v4749_v0 }
0x2c3f   : > { %3900 = vmatpush3.msra.mxu0 %v3305_v21 }
0x2c40   : > { %3923 = vmatprep.subr.mxu0 %v4749_v0 }
0x2cef   : > { %v3135_v3 = vpop.f32.mrf.mxu0 }
0x2cf0   : > { %3878 = vmatmul.mubr.msk.f32.vlgmr.msra.gmra.mxu1 %vm733_vm1, %v3135_v3 }
0x2cf1   : > { %3881 = vmatpush3.msra.mxu1 %v5686_v2  ;;  %v3874_v4 = vpop.f32.mrf.mxu0  ;;  %3882 = vmatprep.mubr.msk.f32.mxu1 %vm4752_vm4, %v4749_v0 }
0x2cf2   : > { %3904 = vmatprep.subr.mxu1 %v4749_v0 }
0x2db0   : > { %v3208_v5 = vpop.f32.mrf.mxu1 }
0x2db1   : > { %v3213_v7 = vsel %vm3212_vm5, %v3208_v5, -inf }
0x2db2   : > { %3214 = vmax.xlane.f32.xlu0 %v3213_v7  ;;  %v3879_v6 = vpop.f32.mrf.mxu1 }
0x2e3b   : > { %v3215_v10 = vpop.xlane.xlu0 %3214 }
0x2e3c   : > { %v3216_v15 = vsub.f32 %v3208_v5, %v3215_v10 }
0x2e3e   : > { %v3217_v28 = vmul.f32 1.442695, %v3216_v15 }
0x2e40   : > { %4356 = vpow2.f32 %v3217_v28 }
0x2e4d   : > { %v4357_v33 = vpop.eup %4356 }
0x2e4e   : > { %v3219_v35 = vsel %vm3212_vm5, %v4357_v33, 0.0 }
0x2e4f   : > { %3220 = vadd.xlane.f32.xlu1 %v3219_v35 }
0x2ed8   : > { %v3221_v34 = vpop.xlane.xlu1 %3220 }
0x2ed9   : > { %4358 = vrcp.f32 %v3221_v34 }
0x2ee6   : > { %v4359_v36 = vpop.eup %4358 }
0x2ee7   : > { %v3223_v11 = vmul.f32 %v4359_v36, %v4357_v33 }
0x2ee9   : > { %3883 = vmatmul.mubr.msk.f32.vlgmr.msra.gmra.mxu1 %vm3212_vm5, %v3223_v11 }
0x2eea   : > { %3905 = vmatpush3.msra.mxu1 %v3304_v14  ;;  %3920 = vmatprep.mubr.msk.f32.mxu1 %vm4752_vm4, %v4749_v0 }
0x2eeb   : > { %3906 = vmatprep.subr.mxu1 %v4749_v0 }
0x2eec   : > { %3907 = vmatpush3.msra.mxu1 %v3303_v17 }
0x2eed   : > { %3908 = vmatprep.subr.mxu1 %v4749_v0 }
0x2eee   : > { %3909 = vmatpush3.msra.mxu1 %v3302_v18 }
0x2eef   : > { %3910 = vmatprep.subr.mxu1 %v4749_v0 }
0x2ef0   : > { %3911 = vmatpush3.msra.mxu1 %v3301_v19 }
0x2ef1   : > { %3912 = vmatprep.subr.mxu1 %v4749_v0 }
0x2ef2   : > { %3913 = vmatpush3.msra.mxu1 %v3300_v20 }
0x2ef3   : > { %3914 = vmatprep.subr.mxu1 %v4749_v0 }
0x2ef4   : > { %3915 = vmatpush3.msra.mxu1 %v3299_v22 }
0x2ef5   : > { %3916 = vmatprep.subr.mxu1 %v4749_v0 }
0x2ef6   : > { %3917 = vmatpush3.msra.mxu1 %v3298_v24 }
0x2ef7   : > { %3918 = vmatprep.subr.mxu1 %v4749_v0 }
0x2ef8   : > { %3919 = vmatpush3.msra.mxu1 %v3297_v25 }
0x2ef9   : > { %3921 = vmatmul.mubr.msk.f32.vlgmr.msra.gmra.mxu1 %vm733_vm1, %v5686_v2 }
0x2fa9   : > { %v3293_v23 = vpop.f32.mrf.mxu1 }
0x2faa   : > { %3902 = vmatmul.mubr.msk.f32.vlgmr.msra.gmra.mxu0 %vm733_vm1, %v3293_v23 }
0x2fab   : > { %v3884_v26 = vpop.f32.mrf.mxu1  ;;  %3939 = vmatprep.mubr.msk.f32.mxu0 %vm4752_vm4, %v4749_v0  ;;  %3924 = vmatpush3.msra.mxu0 %v3464_v39 }
0x2fac   : > { %3925 = vmatprep.subr.mxu0 %v4749_v0 }
0x2fad   : > { %3926 = vmatpush3.msra.mxu0 %v3463_v40 }
0x2fae   : > { %3927 = vmatprep.subr.mxu0 %v4749_v0 }
0x2faf   : > { %3928 = vmatpush3.msra.mxu0 %v3462_v41 }
0x2fb0   : > { %3929 = vmatprep.subr.mxu0 %v4749_v0 }
0x2fb1   : > { %3930 = vmatpush3.msra.mxu0 %v3461_v42 }
0x2fb2   : > { %3931 = vmatprep.subr.mxu0 %v4749_v0 }
0x2fb3   : > { %3932 = vmatpush3.msra.mxu0 %v3460_v43 }
0x2fb4   : > { %3933 = vmatprep.subr.mxu0 %v4749_v0 }
0x2fb5   : > { %3934 = vmatpush3.msra.mxu0 %v3459_v44 }
0x2fb6   : > { %3935 = vmatprep.subr.mxu0 %v4749_v0 }
0x2fb7   : > { %3936 = vmatpush3.msra.mxu0 %v3458_v45 }
0x2fb8   : > { %3937 = vmatprep.subr.mxu0 %v4749_v0 }
0x2fb9   : > { %v3452_v37 = vpop.f32.mrf.mxu1  ;;  %3938 = vmatpush3.msra.mxu0 %v3457_v46 }
0x2fbb   : > { %v3922_v38 = vpop.f32.mrf.mxu1 }
0x306a   : > { %v3382_v47 = vpop.f32.mrf.mxu0 }
0x306b   : > { %v3453_v48 = vadd.f32 %v3452_v37, %v3382_v47 }
0x306c   : > { %v3903_v49 = vpop.f32.mrf.mxu0 }
0x306d   : > { %4360 = vtanh.f32 %v3453_v48 }
0x307a   : > { %v4361_v50 = vpop.eup %4360 }
0x307b   : > { %3940 = vmatmul.mubr.msk.f32.vlgmr.msra.gmra.mxu0 %vm733_vm1, %v4361_v50 }
0x313b   : > { %v3541_v52 = vpop.f32.mrf.mxu0 }
0x313c   : > { %v3542_v53 = vadd.f32 %v3810_v51, %v3541_v52 }
0x313d   : > { %v3941_v0 = vpop.f32.mrf.mxu0 }
0x313e   : > { %3545 = vst [vmem:[%s612_s15] sm:$0xff] %v3542_v53 }
0x313f   : > { %4661 = shalt.err (!%p4658_p2)
}
0x3140   : > { %s4662_s18 = scalar_lea.hbm %s5738_s16, 128  ;;  %s4666_s22 = scalar_lea.hbm %s5787_s14, 256 }
0x3141   : > { %p4663_p1 = scmp.ne.s32.totalorder %s5738_s16, %s4662_s18  ;;  %p4667_p8 = scmp.lt.s32.totalorder %s5738_s16, %s5787_s14 }
0x3142   : > { %p4668_p9 = scmp.lt.s32.totalorder %s4666_s22, %s4662_s18 }
0x3143   : > { %p4664_p4 = pnand %p4663_p1, %p5835_p10 }
0x3144   : > { %p4669_p5 = por %p4668_p9, %p4667_p8 }
0x3145   : > { %p4665_p7 = pneg %p4664_p4 }
0x3147   : > { %p4670_p6 = pnand %p4669_p5, %p4665_p7 }
0x3149   : > { %4673 = shalt.err (!%p4670_p6)
}
0x314a   : > { %3986 = dma.vmem_to_hbm [thread:$0]  (%p5835_p10), %s3561_s25, 128, %s5738_s16, %s3547_s19  }
0x314b PF: > { %s5836_s28 = sld [smem:[#allocation33_spill]] }
0x314c   : > { %s5837_s29 = sld [smem:[#allocation31_spill]] }
0x314d   : > { %s5838_s20 = sld [smem:[#allocation36_spill]] }
0x3151   : > { %p4048_p13 = scmp.ge.s32.totalorder %s5836_s28, 2 }
0x3152   : > { %s3572_s2 = sand.u32 1, %s5837_s29  }
0x3153   : > { %p5839_p11 = scmp.ne.s32.totalorder %s5838_s20, 0  ;;  %s3573_s17 = scalar_lea.sflag [#allocation7], %s3572_s2 }
0x3155   : > { %p4023_p0 = pnand %p4048_p13, %p5839_p11 }
0x3157   : > { %p4024_p3 = pneg %p4023_p0 }
0x3159   : > { %4715 = dma.done.wait (%p4024_p3), %s3573_s17, 128  }
0x315a   : > { %4717 = vsyncadd (%p4024_p3), %s3573_s17, 4294967168  ;;  %s5840_s16 = sld [smem:[#allocation34_spill]]  ;;  %s5843_s29 = smov %s4724_s30 }
0x315b   : > { %s5841_s24 = sld [smem:[#allocation32_spill]] }
0x315c   : > { %s5842_s15 = sld [smem:[#allocation35_spill]] }
0x3160   : > { %p30_p12 = scmp.ge.s32.totalorder %s5840_s16, 4  }
0x3161   : > { %s5844_s30 = smov %s5841_s24 }
0x3162   :  { %32 = sbr.rel (!%p30_p12) target bundleno = 11 (0xb), region = 156 }
0x3167   :  { %3578 = vsyncpa [#allocation6], 1 }
0x3168   :  { %3580 = vsyncpa [#allocation6 + $0x1], 1 }
0x3169   :  { %3581 = vsyncpa [#allocation9], 1 }
0x316a   :  { %3582 = vsyncpa [#allocation12], 1 }
0x316b   :  { %3583 = vsyncpa [#allocation15], 1 }
0x316c   :  { %3584 = vsyncpa [#allocation18], 1 }
0x316d   :  { %3585 = vsyncpa [#allocation21], 1 }
0x316e   :  { %3586 = vsyncpa [#allocation7], 1 }
0x316f   :  { %3588 = vsyncpa [#allocation7 + $0x1], 1 }

</bundles_post_ra>
